<compile_context>
chip_gen: v7x
topology: tpu7x:2x2x1
jax: 0.10.0
libtpu: 0.0.40
codegen_flags: <defaults>
</compile_context>

<pallas_src>
import functools
import math

import jax
import jax.numpy as jnp
from jax.experimental import pallas as pl
from jax.experimental.pallas import tpu as pltpu


def calculate_theta2(d):
    # Pure-Python re-derivation of the sympy/scipy coefficients:
    #   poly_i(x) = (x/2)^i * (1 - x/2)^(d-i) / B(i+1, d+1-i)
    #   thetas[i][m] = coefficient of x^m in poly_i
    # 1 / B(i+1, d+1-i) = (d+1)! / (i! (d-i)!) = (d+1) * C(d, i)
    thetas = []
    for i in range(d + 1):
        inv_beta = (d + 1) * math.comb(d, i)
        coeffs = []
        for m in range(d + 1):
            if m < i:
                coeffs.append(0.0)
            else:
                c = math.comb(d - i, m - i) * ((-1.0) ** (m - i)) / (2.0 ** m)
                coeffs.append(float(inv_beta * c))
        thetas.append(coeffs)
    return thetas


# ---------------------------------------------------------------------------
# Kernels
# ---------------------------------------------------------------------------

def encoder_kernel(x_ref, w1_ref, b1_ref, w2_ref, b2_ref, h_ref):
    """linear_transform_in: Linear(in, 2h) -> ReLU -> Linear(2h, h), per row tile."""
    h1 = jnp.dot(x_ref[...], w1_ref[...], preferred_element_type=jnp.float32)
    h1 = jnp.maximum(h1 + b1_ref[...], 0.0)
    h_ref[...] = (jnp.dot(h1, w2_ref[...], preferred_element_type=jnp.float32)
                  + b2_ref[...])


def propagate_kernel(gc_ref, a_ref, h_ref, allh_ref,
                     feat_ref, delta_ref, agg_ref, acc_ref, *, tm, tk):
    """Fused multi-scale beta-wavelet propagation.

    Grid = (step s, row tile i, reduction tile j). A_hat tiles are streamed from
    HBM; the (N, h) feature state stays resident in VMEM scratch:
        feat_{s+1} = feat_s - A_hat @ feat_s
        acc       += gc[s+1] * feat_{s+1}
    with feat_0 = h, acc_0 = gc[0] * h and gc[k] = sigmoid(lam[0]) * sum_i theta_i[k].
    """
    s = pl.program_id(0)
    i = pl.program_id(1)
    j = pl.program_id(2)
    nj = pl.num_programs(2)

    # One-time init of the resident feature / accumulator state.
    @pl.when((s == 0) & (i == 0) & (j == 0))
    def _():
        feat_ref[...] = h_ref[...]
        acc_ref[...] = gc_ref[0] * h_ref[...]

    # Apply the previous step's Laplacian update once, at the start of step s.
    @pl.when((s > 0) & (i == 0) & (j == 0))
    def _():
        feat_ref[...] = feat_ref[...] - delta_ref[...]

    @pl.when(j == 0)
    def _():
        agg_ref[...] = jnp.zeros_like(agg_ref)

    # agg[rows i] += A_hat[rows i, cols j] @ feat[cols j]
    cols = pl.ds(pl.multiple_of(j * tk, tk), tk)
    agg_ref[...] += jnp.dot(a_ref[...].astype(jnp.float32), feat_ref[cols, :],
                            preferred_element_type=jnp.float32)

    @pl.when(j == nj - 1)
    def _():
        rows = pl.ds(pl.multiple_of(i * tm, tm), tm)
        agg = agg_ref[...]
        f_new = feat_ref[rows, :] - agg          # new feat for this row tile
        delta_ref[rows, :] = agg                 # applied to feat at step s + 1
        new_acc = acc_ref[rows, :] + gc_ref[s + 1] * f_new
        acc_ref[rows, :] = new_acc
        allh_ref[...] = new_acc                  # final step's write wins


def recons_kernel(hl_ref, hr_ref, out_ref):
    """recons tile = sigmoid(all_h[i] @ all_h[j]^T) -- no materialized transpose."""
    logits = jax.lax.dot_general(
        hl_ref[...], hr_ref[...],
        dimension_numbers=(((1,), (1,)), ((), ())),
        preferred_element_type=jnp.float32)
    out_ref[...] = jax.nn.sigmoid(logits)


# ---------------------------------------------------------------------------
# Wrapper
# ---------------------------------------------------------------------------

def _pick_tile(n):
    assert n % 128 == 0, "node count must be a multiple of 128 for this kernel"
    return 256 if n % 256 == 0 else 128


@functools.partial(jax.jit, static_argnames=("thetas",))
def msgad_forward(adj, x, w1, b1, w2, b2, lam, thetas):
    n, in_dim = x.shape
    h2 = w1.shape[1]
    h_dim = w2.shape[1]
    n_k = len(thetas[0])          # d + 1 coefficients per filter
    n_steps = n_k - 1             # d Laplacian sweeps

    tile = _pick_tile(n)
    nt = n // tile
    vmem_params = dict(vmem_limit_bytes=32 * 1024 * 1024)

    # ---- one-time host/XLA prep -------------------------------------------
    # Gated combined coefficients gc[k] = sigmoid(lam[0]) * sum_i theta_i[k].
    c = [float(sum(t[k] for t in thetas)) for k in range(n_k)]
    gc = jax.nn.sigmoid(lam[0, 0]) * jnp.asarray(c, dtype=jnp.float32)

    # Symmetrically-normalized, transposed adjacency streamed as bf16 tiles:
    #   A_hat = D^{-1/2} A^T D^{-1/2}, deg = out-degree clamped to >= 1.
    deg = jnp.sum(adj, axis=1, keepdims=True)
    d_invsqrt = jax.lax.rsqrt(jnp.maximum(deg, 1.0))
    a_hat = (d_invsqrt * adj.T * d_invsqrt.T).astype(jnp.bfloat16)

    # ---- 1) MLP encoder ----------------------------------------------------
    h = pl.pallas_call(
        encoder_kernel,
        out_shape=jax.ShapeDtypeStruct((n, h_dim), jnp.float32),
        grid=(nt,),
        in_specs=[
            pl.BlockSpec((tile, in_dim), lambda i: (i, 0)),
            pl.BlockSpec((in_dim, h2), lambda i: (0, 0)),
            pl.BlockSpec((1, h2), lambda i: (0, 0)),
            pl.BlockSpec((h2, h_dim), lambda i: (0, 0)),
            pl.BlockSpec((1, h_dim), lambda i: (0, 0)),
        ],
        out_specs=pl.BlockSpec((tile, h_dim), lambda i: (i, 0)),
        compiler_params=pltpu.CompilerParams(
            dimension_semantics=("parallel",), **vmem_params),
    )(x, w1, b1, w2, b2)

    # ---- 2) fused multi-scale propagation ----------------------------------
    all_h = pl.pallas_call(
        functools.partial(propagate_kernel, tm=tile, tk=tile),
        out_shape=jax.ShapeDtypeStruct((n, h_dim), jnp.float32),
        grid=(n_steps, nt, nt),
        in_specs=[
            pl.BlockSpec(memory_space=pltpu.MemorySpace.SMEM),    # gc coefficients
            pl.BlockSpec((tile, tile), lambda s, i, j: (i, j)),   # A_hat tiles (bf16)
            pl.BlockSpec((n, h_dim), lambda s, i, j: (0, 0)),     # h, VMEM-resident
        ],
        out_specs=pl.BlockSpec((tile, h_dim), lambda s, i, j: (i, 0)),
        scratch_shapes=[
            pltpu.VMEM((n, h_dim), jnp.float32),      # feat (current step state)
            pltpu.VMEM((n, h_dim), jnp.float32),      # delta (pending update)
            pltpu.VMEM((tile, h_dim), jnp.float32),   # per-row-tile partial sums
            pltpu.VMEM((n, h_dim), jnp.float32),      # gated output accumulator
        ],
        # step/row axes carry state through per-core scratch -> keep sequential.
        compiler_params=pltpu.CompilerParams(
            dimension_semantics=("arbitrary", "arbitrary", "arbitrary"),
            **vmem_params),
    )(gc, a_hat, h)

    # ---- 3) recons = sigmoid(all_h @ all_h^T), lane-dense output tiles ------
    recons = pl.pallas_call(
        recons_kernel,
        out_shape=jax.ShapeDtypeStruct((n, n), jnp.float32),
        grid=(nt, nt),
        in_specs=[
            pl.BlockSpec((tile, h_dim), lambda i, j: (i, 0)),
            pl.BlockSpec((tile, h_dim), lambda i, j: (j, 0)),
        ],
        out_specs=pl.BlockSpec((tile, tile), lambda i, j: (i, j)),
        compiler_params=pltpu.CompilerParams(
            dimension_semantics=("parallel", "parallel"), **vmem_params),
    )(all_h, all_h)

    return recons, all_h


# ---------------------------------------------------------------------------
# Pure-JAX reference (faithful to the original per-scale double loop)
# ---------------------------------------------------------------------------

def msgad_reference(adj, x, w1, b1, w2, b2, lam, thetas):
    deg = jnp.sum(adj, axis=1, keepdims=True)
    dinv = jnp.power(jnp.maximum(deg, 1.0), -0.5)
    h = jnp.maximum(x @ w1 + b1, 0.0) @ w2 + b2
    gate = jax.nn.sigmoid(lam[0, 0])
    all_h = jnp.zeros_like(h)
    for theta in thetas:
        feat = h
        h0 = theta[0] * feat
        for k in range(1, len(theta)):
            feat = feat - dinv * (adj.T @ (feat * dinv))
            h0 = h0 + theta[k] * feat
        all_h = all_h + h0 * gate
    return jax.nn.sigmoid(all_h @ all_h.T), all_h


if __name__ == "__main__":
    N, IN_DIM, H_DIM, D = 512, 16, 32, 4
    thetas = calculate_theta2(D)

    key = jax.random.PRNGKey(0)
    k_adj, k_x, k_w1, k_b1, k_w2, k_b2, k_lam = jax.random.split(key, 7)

    # Random directed graph as dense adjacency (no self loops).
    adj = jax.random.bernoulli(k_adj, 0.05, (N, N)).astype(jnp.float32)
    adj = adj * (1.0 - jnp.eye(N, dtype=jnp.float32))

    x = jax.random.normal(k_x, (N, IN_DIM), dtype=jnp.float32)

    # Deterministic parameter init (nn.Linear weights stored as (in, out)).
    w1 = 0.1 * jax.random.normal(k_w1, (IN_DIM, 2 * H_DIM), dtype=jnp.float32)
    b1 = 0.1 * jax.random.normal(k_b1, (1, 2 * H_DIM), dtype=jnp.float32)
    w2 = 0.1 * jax.random.normal(k_w2, (2 * H_DIM, H_DIM), dtype=jnp.float32)
    b2 = 0.1 * jax.random.normal(k_b2, (1, H_DIM), dtype=jnp.float32)
    lam = jax.random.normal(k_lam, (1, D + 1), dtype=jnp.float32)  # nn.Parameter lam

    thetas_t = tuple(tuple(t) for t in thetas)
    recons, all_h = msgad_forward(adj, x, w1, b1, w2, b2, lam, thetas=thetas_t)
    jax.block_until_ready((recons, all_h))

    recons_ref, all_h_ref = msgad_reference(adj, x, w1, b1, w2, b2, lam, thetas)

    assert recons.shape == (N, N) and all_h.shape == (N, H_DIM)
    assert jnp.allclose(all_h, all_h_ref, atol=1e-2, rtol=1e-2)
    assert jnp.allclose(recons, recons_ref, atol=1e-2, rtol=1e-2)

    print("KERNEL_OK")
</pallas_src>

<mosaic_0001>
module attributes {stable_mosaic.version = 11 : i64} {
  func.func @encoder_kernel(%arg0: i32, %arg1: memref<256x16xf32, #tpu.memory_space<vmem>>, %arg2: memref<16x64xf32, #tpu.memory_space<vmem>>, %arg3: memref<1x64xf32, #tpu.memory_space<vmem>>, %arg4: memref<64x32xf32, #tpu.memory_space<vmem>>, %arg5: memref<1x32xf32, #tpu.memory_space<vmem>>, %arg6: memref<256x32xf32, #tpu.memory_space<vmem>>) attributes {dimension_semantics = [#tpu.dimension_semantics<parallel>], iteration_bounds = array<i64: 2>, scalar_prefetch = 0 : i64, scratch_operands = 0 : i64, tpu.core_type = #tpu.core_type<tc>, window_params = [{transform_indices = @transform_0, window_bounds = array<i64: 256, 16>}, {pipeline_mode = #tpu.pipeline_mode<synchronous>, transform_indices = @transform_1, window_bounds = array<i64: 16, 64>}, {pipeline_mode = #tpu.pipeline_mode<synchronous>, transform_indices = @transform_2, window_bounds = array<i64: 1, 64>}, {pipeline_mode = #tpu.pipeline_mode<synchronous>, transform_indices = @transform_3, window_bounds = array<i64: 64, 32>}, {pipeline_mode = #tpu.pipeline_mode<synchronous>, transform_indices = @transform_4, window_bounds = array<i64: 1, 32>}, {transform_indices = @transform_5, window_bounds = array<i64: 256, 32>}]} {
    %c0 = arith.constant 0 : index
    %c0_0 = arith.constant 0 : index
    %0 = vector.load %arg1[%c0, %c0_0] : memref<256x16xf32, #tpu.memory_space<vmem>>, vector<256x16xf32>
    %c0_1 = arith.constant 0 : index
    %c0_2 = arith.constant 0 : index
    %1 = vector.load %arg2[%c0_1, %c0_2] : memref<16x64xf32, #tpu.memory_space<vmem>>, vector<16x64xf32>
    %cst = arith.constant dense<0.000000e+00> : vector<256x64xf32>
    %2 = tpu.matmul %0, %1, %cst {dimension_numbers = #tpu.dot_dimension_numbers<[1], [0], [0], [1], [0, 0, 1, 1], [], []>} : vector<256x16xf32>, vector<16x64xf32>, vector<256x64xf32> -> vector<256x64xf32>
    %c0_3 = arith.constant 0 : index
    %c0_4 = arith.constant 0 : index
    %3 = vector.load %arg3[%c0_3, %c0_4] : memref<1x64xf32, #tpu.memory_space<vmem>>, vector<1x64xf32>
    %4 = vector.broadcast %3 : vector<1x64xf32> to vector<256x64xf32>
    %5 = arith.addf %2, %4 : vector<256x64xf32>
    %cst_5 = arith.constant 0.000000e+00 : f32
    %6 = vector.broadcast %cst_5 : f32 to vector<256x64xf32>
    %7 = arith.maximumf %5, %6 : vector<256x64xf32>
    %c0_6 = arith.constant 0 : index
    %c0_7 = arith.constant 0 : index
    %8 = vector.load %arg4[%c0_6, %c0_7] : memref<64x32xf32, #tpu.memory_space<vmem>>, vector<64x32xf32>
    %cst_8 = arith.constant dense<0.000000e+00> : vector<256x32xf32>
    %9 = tpu.matmul %7, %8, %cst_8 {dimension_numbers = #tpu.dot_dimension_numbers<[1], [0], [0], [1], [0, 0, 1, 1], [], []>} : vector<256x64xf32>, vector<64x32xf32>, vector<256x32xf32> -> vector<256x32xf32>
    %c0_9 = arith.constant 0 : index
    %c0_10 = arith.constant 0 : index
    %10 = vector.load %arg5[%c0_9, %c0_10] : memref<1x32xf32, #tpu.memory_space<vmem>>, vector<1x32xf32>
    %11 = vector.broadcast %10 : vector<1x32xf32> to vector<256x32xf32>
    %12 = arith.addf %9, %11 : vector<256x32xf32>
    %c0_11 = arith.constant 0 : index
    %c0_12 = arith.constant 0 : index
    %13 = vector.load %arg6[%c0_11, %c0_12] : memref<256x32xf32, #tpu.memory_space<vmem>>, vector<256x32xf32>
    tpu.vector_store %arg6[%c0_11, %c0_12], %12 {strides = array<i32>} : memref<256x32xf32, #tpu.memory_space<vmem>>, vector<256x32xf32>,
    return
  }
  func.func @transform_0(%arg0: i32) -> (i32, i32) {
    %c0_i32 = arith.constant 0 : i32
    %c0_i32_0 = arith.constant 0 : i32
    return %arg0, %c0_i32 : i32, i32
  }
  func.func @transform_1(%arg0: i32) -> (i32, i32) {
    %c0_i32 = arith.constant 0 : i32
    %c0_i32_0 = arith.constant 0 : i32
    %c0_i32_1 = arith.constant 0 : i32
    return %c0_i32, %c0_i32_0 : i32, i32
  }
  func.func @transform_2(%arg0: i32) -> (i32, i32) {
    %c0_i32 = arith.constant 0 : i32
    %c0_i32_0 = arith.constant 0 : i32
    %c0_i32_1 = arith.constant 0 : i32
    return %c0_i32, %c0_i32_0 : i32, i32
  }
  func.func @transform_3(%arg0: i32) -> (i32, i32) {
    %c0_i32 = arith.constant 0 : i32
    %c0_i32_0 = arith.constant 0 : i32
    %c0_i32_1 = arith.constant 0 : i32
    return %c0_i32, %c0_i32_0 : i32, i32
  }
  func.func @transform_4(%arg0: i32) -> (i32, i32) {
    %c0_i32 = arith.constant 0 : i32
    %c0_i32_0 = arith.constant 0 : i32
    %c0_i32_1 = arith.constant 0 : i32
    return %c0_i32, %c0_i32_0 : i32, i32
  }
  func.func @transform_5(%arg0: i32) -> (i32, i32) {
    %c0_i32 = arith.constant 0 : i32
    %c0_i32_0 = arith.constant 0 : i32
    return %arg0, %c0_i32 : i32, i32
  }
}

module attributes {stable_mosaic.version = 11 : i64} {
  func.func @propagate_kernel(%arg0: i32, %arg1: i32, %arg2: i32, %arg3: memref<5xf32, #tpu.memory_space<smem>>, %arg4: memref<256x256xbf16, #tpu.memory_space<vmem>>, %arg5: memref<512x32xf32, #tpu.memory_space<vmem>>, %arg6: memref<256x32xf32, #tpu.memory_space<vmem>>, %arg7: memref<512x32xf32, #tpu.memory_space<vmem>>, %arg8: memref<512x32xf32, #tpu.memory_space<vmem>>, %arg9: memref<256x32xf32, #tpu.memory_space<vmem>>, %arg10: memref<512x32xf32, #tpu.memory_space<vmem>>) attributes {dimension_semantics = [#tpu.dimension_semantics<arbitrary>, #tpu.dimension_semantics<arbitrary>, #tpu.dimension_semantics<arbitrary>], iteration_bounds = array<i64: 4, 2, 2>, scalar_prefetch = 0 : i64, scratch_operands = 4 : i64, tpu.core_type = #tpu.core_type<tc>, window_params = [{transform_indices = @transform_0, window_bounds = array<i64: 5>}, {transform_indices = @transform_1, window_bounds = array<i64: 256, 256>}, {pipeline_mode = #tpu.pipeline_mode<synchronous>, transform_indices = @transform_2, window_bounds = array<i64: 512, 32>}, {transform_indices = @transform_3, window_bounds = array<i64: 256, 32>}]} {
    %c0_i32 = arith.constant 0 : i32
    %0 = arith.cmpi eq, %arg0, %c0_i32 : i32
    %c0_i32_0 = arith.constant 0 : i32
    %1 = arith.cmpi eq, %arg1, %c0_i32_0 : i32
    %2 = arith.andi %0, %1 : i1
    %c0_i32_1 = arith.constant 0 : i32
    %3 = arith.cmpi eq, %arg2, %c0_i32_1 : i32
    %4 = arith.andi %2, %3 : i1
    %5 = arith.extui %4 : i1 to i32
    %c0_i32_2 = arith.constant 0 : i32
    %6 = arith.cmpi ne, %5, %c0_i32_2 : i32
    scf.if %6 {
      %c0_16 = arith.constant 0 : index
      %c0_17 = arith.constant 0 : index
      %30 = vector.load %arg5[%c0_16, %c0_17] : memref<512x32xf32, #tpu.memory_space<vmem>>, vector<512x32xf32>
      %c0_18 = arith.constant 0 : index
      %c0_19 = arith.constant 0 : index
      %31 = vector.load %arg7[%c0_18, %c0_19] : memref<512x32xf32, #tpu.memory_space<vmem>>, vector<512x32xf32>
      tpu.vector_store %arg7[%c0_18, %c0_19], %30 {strides = array<i32>} : memref<512x32xf32, #tpu.memory_space<vmem>>, vector<512x32xf32>,
      %c0_20 = arith.constant 0 : index
      %32 = memref.load %arg3[%c0_20] : memref<5xf32, #tpu.memory_space<smem>>
      %c0_21 = arith.constant 0 : index
      %c0_22 = arith.constant 0 : index
      %33 = vector.load %arg5[%c0_21, %c0_22] : memref<512x32xf32, #tpu.memory_space<vmem>>, vector<512x32xf32>
      %34 = vector.broadcast %32 : f32 to vector<512x32xf32>
      %35 = arith.mulf %34, %33 : vector<512x32xf32>
      %c0_23 = arith.constant 0 : index
      %c0_24 = arith.constant 0 : index
      %36 = vector.load %arg10[%c0_23, %c0_24] : memref<512x32xf32, #tpu.memory_space<vmem>>, vector<512x32xf32>
      tpu.vector_store %arg10[%c0_23, %c0_24], %35 {strides = array<i32>} : memref<512x32xf32, #tpu.memory_space<vmem>>, vector<512x32xf32>,
    } else {
    }
    %c0_i32_3 = arith.constant 0 : i32
    %7 = arith.cmpi sgt, %arg0, %c0_i32_3 : i32
    %c0_i32_4 = arith.constant 0 : i32
    %8 = arith.cmpi eq, %arg1, %c0_i32_4 : i32
    %9 = arith.andi %7, %8 : i1
    %c0_i32_5 = arith.constant 0 : i32
    %10 = arith.cmpi eq, %arg2, %c0_i32_5 : i32
    %11 = arith.andi %9, %10 : i1
    %12 = arith.extui %11 : i1 to i32
    %c0_i32_6 = arith.constant 0 : i32
    %13 = arith.cmpi ne, %12, %c0_i32_6 : i32
    scf.if %13 {
      %c0_16 = arith.constant 0 : index
      %c0_17 = arith.constant 0 : index
      %30 = vector.load %arg7[%c0_16, %c0_17] : memref<512x32xf32, #tpu.memory_space<vmem>>, vector<512x32xf32>
      %c0_18 = arith.constant 0 : index
      %c0_19 = arith.constant 0 : index
      %31 = vector.load %arg8[%c0_18, %c0_19] : memref<512x32xf32, #tpu.memory_space<vmem>>, vector<512x32xf32>
      %32 = arith.subf %30, %31 : vector<512x32xf32>
      %c0_20 = arith.constant 0 : index
      %c0_21 = arith.constant 0 : index
      %33 = vector.load %arg7[%c0_20, %c0_21] : memref<512x32xf32, #tpu.memory_space<vmem>>, vector<512x32xf32>
      tpu.vector_store %arg7[%c0_20, %c0_21], %32 {strides = array<i32>} : memref<512x32xf32, #tpu.memory_space<vmem>>, vector<512x32xf32>,
    } else {
    }
    %c0_i32_7 = arith.constant 0 : i32
    %14 = arith.cmpi eq, %arg2, %c0_i32_7 : i32
    %15 = arith.extui %14 : i1 to i32
    %c0_i32_8 = arith.constant 0 : i32
    %16 = arith.cmpi ne, %15, %c0_i32_8 : i32
    scf.if %16 {
      %cst_16 = arith.constant 0.000000e+00 : f32
      %30 = vector.broadcast %cst_16 : f32 to vector<256x32xf32>
      %c0_17 = arith.constant 0 : index
      %c0_18 = arith.constant 0 : index
      %31 = vector.load %arg9[%c0_17, %c0_18] : memref<256x32xf32, #tpu.memory_space<vmem>>, vector<256x32xf32>
      tpu.vector_store %arg9[%c0_17, %c0_18], %30 {strides = array<i32>} : memref<256x32xf32, #tpu.memory_space<vmem>>, vector<256x32xf32>,
    } else {
    }
    %c256_i32 = arith.constant 256 : i32
    %17 = arith.muli %arg2, %c256_i32 : i32
    %18 = tpu.assume_multiple %17, 256 : i32
    %c0 = arith.constant 0 : index
    %c0_9 = arith.constant 0 : index
    %19 = vector.load %arg9[%c0, %c0_9] : memref<256x32xf32, #tpu.memory_space<vmem>>, vector<256x32xf32>
    %c0_10 = arith.constant 0 : index
    %c0_11 = arith.constant 0 : index
    %20 = vector.load %arg4[%c0_10, %c0_11] : memref<256x256xbf16, #tpu.memory_space<vmem>>, vector<256x256xbf16>
    %21 = arith.extf %20 : vector<256x256xbf16> to vector<256x256xf32>
    %22 = arith.index_cast %18 : i32 to index
    %c0_12 = arith.constant 0 : index
    %23 = vector.load %arg7[%22, %c0_12] : memref<512x32xf32, #tpu.memory_space<vmem>>, vector<256x32xf32>
    %cst = arith.constant dense<0.000000e+00> : vector<256x32xf32>
    %24 = tpu.matmul %21, %23, %cst {dimension_numbers = #tpu.dot_dimension_numbers<[1], [0], [0], [1], [0, 0, 1, 1], [], []>} : vector<256x256xf32>, vector<256x32xf32>, vector<256x32xf32> -> vector<256x32xf32>
    %25 = arith.addf %19, %24 : vector<256x32xf32>
    %c0_13 = arith.constant 0 : index
    %c0_14 = arith.constant 0 : index
    %26 = vector.load %arg9[%c0_13, %c0_14] : memref<256x32xf32, #tpu.memory_space<vmem>>, vector<256x32xf32>
    tpu.vector_store %arg9[%c0_13, %c0_14], %25 {strides = array<i32>} : memref<256x32xf32, #tpu.memory_space<vmem>>, vector<256x32xf32>,
    %c1_i32 = arith.constant 1 : i32
    %27 = arith.cmpi eq, %arg2, %c1_i32 : i32
    %28 = arith.extui %27 : i1 to i32
    %c0_i32_15 = arith.constant 0 : i32
    %29 = arith.cmpi ne, %28, %c0_i32_15 : i32
    scf.if %29 {
      %c256_i32_16 = arith.constant 256 : i32
      %30 = arith.muli %arg1, %c256_i32_16 : i32
      %31 = tpu.assume_multiple %30, 256 : i32
      %c0_17 = arith.constant 0 : index
      %c0_18 = arith.constant 0 : index
      %32 = vector.load %arg9[%c0_17, %c0_18] : memref<256x32xf32, #tpu.memory_space<vmem>>, vector<256x32xf32>
      %33 = arith.index_cast %31 : i32 to index
      %c0_19 = arith.constant 0 : index
      %34 = vector.load %arg7[%33, %c0_19] : memref<512x32xf32, #tpu.memory_space<vmem>>, vector<256x32xf32>
      %35 = arith.subf %34, %32 : vector<256x32xf32>
      %36 = arith.index_cast %31 : i32 to index
      %c0_20 = arith.constant 0 : index
      %37 = vector.load %arg8[%36, %c0_20] : memref<512x32xf32, #tpu.memory_space<vmem>>, vector<256x32xf32>
      tpu.vector_store %arg8[%36, %c0_20], %32 {strides = array<i32>} : memref<512x32xf32, #tpu.memory_space<vmem>>, vector<256x32xf32>,
      %38 = arith.index_cast %31 : i32 to index
      %c0_21 = arith.constant 0 : index
      %39 = vector.load %arg10[%38, %c0_21] : memref<512x32xf32, #tpu.memory_space<vmem>>, vector<256x32xf32>
      %c1_i32_22 = arith.constant 1 : i32
      %40 = arith.addi %arg0, %c1_i32_22 : i32
      %41 = arith.index_cast %40 : i32 to index
      %42 = memref.load %arg3[%41] : memref<5xf32, #tpu.memory_space<smem>>
      %43 = vector.broadcast %42 : f32 to vector<256x32xf32>
      %44 = arith.mulf %43, %35 : vector<256x32xf32>
      %45 = arith.addf %39, %44 : vector<256x32xf32>
      %46 = arith.index_cast %31 : i32 to index
      %c0_23 = arith.constant 0 : index
      %47 = vector.load %arg10[%46, %c0_23] : memref<512x32xf32, #tpu.memory_space<vmem>>, vector<256x32xf32>
      tpu.vector_store %arg10[%46, %c0_23], %45 {strides = array<i32>} : memref<512x32xf32, #tpu.memory_space<vmem>>, vector<256x32xf32>,
      %c0_24 = arith.constant 0 : index
      %c0_25 = arith.constant 0 : index
      %48 = vector.load %arg6[%c0_24, %c0_25] : memref<256x32xf32, #tpu.memory_space<vmem>>, vector<256x32xf32>
      tpu.vector_store %arg6[%c0_24, %c0_25], %45 {strides = array<i32>} : memref<256x32xf32, #tpu.memory_space<vmem>>, vector<256x32xf32>,
    } else {
    }
    return
  }
  func.func @transform_0(%arg0: i32, %arg1: i32, %arg2: i32) -> i32 {
    %c0_i32 = arith.constant 0 : i32
    %c0_i32_0 = arith.constant 0 : i32
    return %c0_i32 : i32
  }
  func.func @transform_1(%arg0: i32, %arg1: i32, %arg2: i32) -> (i32, i32) {
    %c0_i32 = arith.constant 0 : i32
    return %arg1, %arg2 : i32, i32
  }
  func.func @transform_2(%arg0: i32, %arg1: i32, %arg2: i32) -> (i32, i32) {
    %c0_i32 = arith.constant 0 : i32
    %c0_i32_0 = arith.constant 0 : i32
    %c0_i32_1 = arith.constant 0 : i32
    return %c0_i32, %c0_i32_0 : i32, i32
  }
  func.func @transform_3(%arg0: i32, %arg1: i32, %arg2: i32) -> (i32, i32) {
    %c0_i32 = arith.constant 0 : i32
    %c0_i32_0 = arith.constant 0 : i32
    return %arg1, %c0_i32 : i32, i32
  }
}

module attributes {stable_mosaic.version = 11 : i64} {
  func.func @recons_kernel(%arg0: i32, %arg1: i32, %arg2: memref<256x32xf32, #tpu.memory_space<vmem>>, %arg3: memref<256x32xf32, #tpu.memory_space<vmem>>, %arg4: memref<256x256xf32, #tpu.memory_space<vmem>>) attributes {dimension_semantics = [#tpu.dimension_semantics<parallel>, #tpu.dimension_semantics<parallel>], iteration_bounds = array<i64: 2, 2>, scalar_prefetch = 0 : i64, scratch_operands = 0 : i64, tpu.core_type = #tpu.core_type<tc>, window_params = [{transform_indices = @transform_0, window_bounds = array<i64: 256, 32>}, {transform_indices = @transform_1, window_bounds = array<i64: 256, 32>}, {transform_indices = @transform_2, window_bounds = array<i64: 256, 256>}]} {
    %c0 = arith.constant 0 : index
    %c0_0 = arith.constant 0 : index
    %0 = vector.load %arg2[%c0, %c0_0] : memref<256x32xf32, #tpu.memory_space<vmem>>, vector<256x32xf32>
    %c0_1 = arith.constant 0 : index
    %c0_2 = arith.constant 0 : index
    %1 = vector.load %arg3[%c0_1, %c0_2] : memref<256x32xf32, #tpu.memory_space<vmem>>, vector<256x32xf32>
    %cst = arith.constant dense<0.000000e+00> : vector<256x256xf32>
    %2 = tpu.matmul %0, %1, %cst {dimension_numbers = #tpu.dot_dimension_numbers<[1], [1], [0], [0], [0, 0, 1, 0], [], []>} : vector<256x32xf32>, vector<256x32xf32>, vector<256x256xf32> -> vector<256x256xf32>
    %3 = arith.negf %2 : vector<256x256xf32>
    %4 = math.exp %3 : vector<256x256xf32>
    %cst_3 = arith.constant 1.000000e+00 : f32
    %5 = vector.broadcast %cst_3 : f32 to vector<256x256xf32>
    %6 = arith.addf %5, %4 : vector<256x256xf32>
    %7 = arith.divf %5, %6 : vector<256x256xf32>
    %c0_4 = arith.constant 0 : index
    %c0_5 = arith.constant 0 : index
    %8 = vector.load %arg4[%c0_4, %c0_5] : memref<256x256xf32, #tpu.memory_space<vmem>>, vector<256x256xf32>
    tpu.vector_store %arg4[%c0_4, %c0_5], %7 {strides = array<i32>} : memref<256x256xf32, #tpu.memory_space<vmem>>, vector<256x256xf32>,
    return
  }
  func.func @transform_0(%arg0: i32, %arg1: i32) -> (i32, i32) {
    %c0_i32 = arith.constant 0 : i32
    %c0_i32_0 = arith.constant 0 : i32
    return %arg0, %c0_i32 : i32, i32
  }
  func.func @transform_1(%arg0: i32, %arg1: i32) -> (i32, i32) {
    %c0_i32 = arith.constant 0 : i32
    %c0_i32_0 = arith.constant 0 : i32
    return %arg1, %c0_i32 : i32, i32
  }
  func.func @transform_2(%arg0: i32, %arg1: i32) -> (i32, i32) {
    %c0_i32 = arith.constant 0 : i32
    return %arg0, %arg1 : i32, i32
  }
}

</mosaic_0001>

<bundles_post_ra>
// kernel: msgad_forward.5
= control target key start
LH: loop header
LB: loop body
LE: loop exit
PB: predicated region body
PF: predicated region fallthrough
CT: control target
= control target key end

     0   :  { %7 = vsyncpa [#allocation3], 0  ;;  %s2539_s0 = inlined_call_operand.vmem [shape: f32[512,32], index: 0, kind: input, shape index: {}, may-alias: {0,1}]   ;;  %s2540_s1 = inlined_call_operand.vmem [shape: f32[512,32], index: 1, kind: input, shape index: {}, may-alias: {0,1}]   ;;  %s2541_s2 = inlined_call_operand.hbm [shape: f32[512,512], index: 2, kind: output, shape index: {}]  }
   0x1   :  { %9 = vsyncpa [#allocation3 + $0x1], 0  ;;  %s2000_s9 = smov 0   ;;  %s2002_s10 = smov 0  }
   0x2   :  { %s2004_s11 = smov 0   ;;  %s2006_s12 = smov 0  }
   0x3   :  { %s2008_s13 = smov 0   ;;  %s2010_s14 = smov 0  }
   0x4   :  { %s2012_s15 = smov 0   ;;  %s2014_s16 = smov 0  }
   0x5 LB: > { %s1249_s17 = sadd.s32 4294967295, %s1979_s16   ;;  %s1250_s18 = sadd.s32 4294967294, %s1979_s16   ;;  %s1979_s16 = sphi %s2014_s16, %s15_s16   ;;  %s1975_s15 = sphi %s2012_s15, %s2552_s15   ;;  %s1971_s14 = sphi %s2010_s14, %s2551_s14   ;;  %s1967_s13 = sphi %s2008_s13, %s2550_s13   ;;  %s1963_s12 = sphi %s2006_s12, %s2549_s12   ;;  %s1959_s11 = sphi %s2004_s11, %s2548_s11   ;;  %s1955_s10 = sphi %s2002_s10, %s2547_s10   ;;  %s1951_s9 = sphi %s2000_s9, %s2546_s9  }
   0x6   : > { %s24_s19 = sadd.s32 1, %s1971_s14  ;;  %s27_s20 = sadd.s32 1, %s1975_s15 }
   0x7   : > { %p25_p0 = scmp.ge.s32.totalorder %s24_s19, 2  ;;  %p98_p1 = scmp.ne.s32.totalorder %s1959_s11, %s1955_s10 }
   0x8   : > { %p99_p2 = scmp.eq.s32.totalorder %s1249_s17, 3  ;;  %p104_p5 = scmp.ne.s32.totalorder %s1955_s10, %s1951_s9 }
   0x9   : > { %s2554_s19 = smov (%p25_p0, %s24_s19), 0  ;;  %s2556_s20 = smov (!%p25_p0, %s27_s20), %s1975_s15 }
   0xa   : > { %s84_s21 = ssub.s32 %s1971_s14, %s2554_s19  ;;  %p2051_p3 = por %p99_p2, %p98_p1 }
   0xb   : > { %p29_p4 = scmp.ge.s32.totalorder %s2556_s20, 2  ;;  %p105_p6 = scmp.eq.s32.totalorder %s1250_s18, 3 }
   0xc   : > { %p1253_p7 = scmp.ge.s32.totalorder %s1979_s16, 1  ;;  %p141_p9 = scmp.lt.s32.totalorder %s1979_s16, 5 }
   0xd   : > { %s2558_s20 = smov (%p29_p4, %s2556_s20), 0  ;;  %p2060_p8 = por %p105_p6, %p104_p5 }
   0xe   : > { %s83_s24 = ssub.s32 %s1975_s15, %s2558_s20  ;;  %s88_s25 = sadd.s32 1, %s1959_s11 }
   0xf   : > { %s85_s26 = sor.u32 %s84_s21, %s83_s24  ;;  %p142_p10 = pnand %p1253_p7, %p141_p9 }
  0x10   : > { %p86_p11 = scmp.eq.s32.totalorder %s85_s26, 0  ;;  %s1257_s28 = sshll.u32 (!%p142_p10), %s1963_s12, 5  ;;  %vm246_vm0 = vcmask (!%p142_p10), 261120  }
  0x11   : > { %145 = sbr.rel (%p142_p10) target bundleno = 464 (0x1d0), region = 28  ;;  %s1255_s29 = sshll.u32 (!%p142_p10), %s1967_s13, 5  ;;  %vm2080_vm1 = vmpackc.low (!%p142_p10), %vm246_vm0, %vm246_vm0 }
  0x12   : > { %s2069_s27 = scalar_select %p86_p11, %s1959_s11, %s88_s25  }
  0x13   : > { %p175_p12 = scmp.lt.s32.totalorder (!%p142_p10), %s1257_s28, 63  ;;  %p169_p13 = scmp.lt.s32.totalorder (!%p142_p10), %s1255_s29, 63 }
  0x14   : > { %s165_s18 = sand.u32 (!%p142_p10), 1, %s1955_s10   ;;  %s1389_s25 = sshll.u32 (!%p142_p10), %s1963_s12, 1 }
  0x15   : > { %s1254_s21 = sshll.u32 (!%p142_p10), %s165_s18, 9  ;;  %s1394_s26 = sshll.u32 (!%p142_p10), %s1967_s13, 7 }
  0x16   : > { %s2298_s24 = scalar_lea.vmem (!%p142_p10), [#allocation2], %s1254_s21  ;;  %s2487_s4 = scalar_lea.sflag (!%p142_p10), [#allocation3], %s165_s18 }
  0x17   : > { %s1161_s13 = sshll.u32 (!%p142_p10), %s2298_s24, 4  ;;  %s2480_s13 = int_to_ptr.vmem [resolvable:$true] %s1161_s13 }
  0x18   : > { %s2560_s28 = smov (!%p175_p12, %s1257_s28), 63  ;;  %s2562_s29 = smov (!%p169_p13, %s1255_s29), 63 }
  0x19   : > { %s1258_s30 = sshll.u32 %s2560_s28, 3  ;;  %s1256_s6 = sshll.u32 %s2562_s29, 3 }
  0x1a   : > { %s2076_s5 = scalar_lea.vmem %s2540_s1, %s1258_s30  ;;  %s2109_s17 = scalar_lea.vmem %s2539_s0, %s1256_s6 }
  0x1b   : > { %v230_v1 = vld [vmem:[%s2076_s5 + $0x80] sm:$0xff]  ;;  %v231_v2 = vld [vmem:[%s2076_s5 + $0x88] sm:$0xff]  ;;  %v232_v6 = vld [vmem:[%s2076_s5 + $0x90] sm:$0xff]  ;;  %s1158_s28 = sadd.s32 %s1394_s26, %s1389_s25  ;;  %s1981_s6 = smov [#allocation2]  }
  0x1c   : > { %v214_v3 = vld [vmem:[%s2076_s5] sm:$0xff]  ;;  %v1491_v4 = vpack.c.bf16 %v231_v2, %v230_v1  ;;  %v215_v5 = vld [vmem:[%s2076_s5 + $0x8] sm:$0xff]  ;;  %v233_v7 = vld [vmem:[%s2076_s5 + $0x98] sm:$0xff]  ;;  %s1391_s12 = sshll.u32 %s1158_s28, 7  ;;  %s1889_s7 = sshll.u32 %s1981_s6, 4  ;;  %s1890_s7 = int_to_ptr.vmem [resolvable:$false] %s1889_s7 }
  0x1d   : > { %v1494_v8 = vpack.c.bf16 %v215_v5, %v214_v3  ;;  %v1497_v9 = vpack.c.bf16 %v233_v7, %v232_v6  ;;  %v216_v10 = vld [vmem:[%s2076_s5 + $0x10] sm:$0xff]  ;;  %v217_v11 = vld [vmem:[%s2076_s5 + $0x18] sm:$0xff]  ;;  %v234_v12 = vld [vmem:[%s2076_s5 + $0xa0] sm:$0xff]  ;;  %s2477_s3 = scalar_lea.hbm %s2541_s2, %s1391_s12  ;;  %s1891_s8 = scalar_lea.vmem %s1890_s7, 16384 }
  0x1e   : > { %1493 = vmatprep.subr.msk.bf16.mxu0 %vm2080_vm1, %v1491_v4  ;;  %1539 = vmatprep.subr.msk.bf16.mxu1 %vm2080_vm1, %v1491_v4  ;;  %v235_v13 = vld [vmem:[%s2076_s5 + $0xa8] sm:$0xff]  ;;  %v1500_v14 = vpack.c.bf16 %v217_v11, %v216_v10  ;;  %v2112_v16 = vld [vmem:[%s2109_s17] sm:$0xff]  ;;  %v236_v20 = vld [vmem:[%s2076_s5 + $0xb0] sm:$0xff]  ;;  %p1892_p4 = scmp.lt.s32.totalorder %s2480_s13, %s1890_s7 }
  0x1f   : > { %1496 = vmatpush3.bf16.xpose.msk.msra.mxu0 %vm2080_vm1, %v1494_v8  ;;  %1547 = vmatpush3.bf16.xpose.msk.msra.mxu1 %vm2080_vm1, %v1494_v8  ;;  %v1503_v15 = vpack.c.bf16 %v235_v13, %v234_v12  ;;  %v2117_v17 = vld [vmem:[%s2109_s17 + $0x80] sm:$0xff]  ;;  %v219_v19 = vld [vmem:[%s2076_s5 + $0x28] sm:$0xff]  ;;  %v237_v21 = vld [vmem:[%s2076_s5 + $0xb8] sm:$0xff] }
  0x20   : > { %1499 = vmatprep.subr.msk.bf16.mxu0 %vm2080_vm1, %v1497_v9  ;;  %1540 = vmatprep.subr.msk.bf16.mxu1 %vm2080_vm1, %v1497_v9  ;;  %v218_v18 = vld [vmem:[%s2076_s5 + $0x20] sm:$0xff]  ;;  %v1509_v23 = vpack.c.bf16 %v237_v21, %v236_v20  ;;  %v220_v24 = vld [vmem:[%s2076_s5 + $0x30] sm:$0xff]  ;;  %v221_v25 = vld [vmem:[%s2076_s5 + $0x38] sm:$0xff] }
  0x21   : > { %1427 = vmatprep.mubr.msk.f32.mxu0 %vm246_vm0, %v2112_v16  ;;  %1459 = vmatprep.mubr.msk.f32.mxu1 %vm246_vm0, %v2117_v17  ;;  %v1506_v22 = vpack.c.bf16 %v219_v19, %v218_v18  ;;  %v238_v26 = vld [vmem:[%s2076_s5 + $0xc0] sm:$0xff]  ;;  %v239_v27 = vld [vmem:[%s2076_s5 + $0xc8] sm:$0xff]  ;;  %v1512_v28 = vpack.c.bf16 %v221_v25, %v220_v24  ;;  %v240_v32 = vld [vmem:[%s2076_s5 + $0xd0] sm:$0xff] }
  0x22   : > { %v1515_v29 = vpack.c.bf16 %v239_v27, %v238_v26  ;;  %v222_v30 = vld [vmem:[%s2076_s5 + $0x40] sm:$0xff]  ;;  %v223_v31 = vld [vmem:[%s2076_s5 + $0x48] sm:$0xff]  ;;  %v241_v33 = vld [vmem:[%s2076_s5 + $0xd8] sm:$0xff] }
  0x23   : > { %v1518_v34 = vpack.c.bf16 %v223_v31, %v222_v30  ;;  %v1521_v35 = vpack.c.bf16 %v241_v33, %v240_v32  ;;  %v224_v36 = vld [vmem:[%s2076_s5 + $0x50] sm:$0xff]  ;;  %v225_v37 = vld [vmem:[%s2076_s5 + $0x58] sm:$0xff]  ;;  %v242_v38 = vld [vmem:[%s2076_s5 + $0xe0] sm:$0xff] }
  0x24   : > { %v243_v39 = vld [vmem:[%s2076_s5 + $0xe8] sm:$0xff]  ;;  %v1524_v40 = vpack.c.bf16 %v225_v37, %v224_v36  ;;  %v226_v42 = vld [vmem:[%s2076_s5 + $0x60] sm:$0xff]  ;;  %v244_v44 = vld [vmem:[%s2076_s5 + $0xf0] sm:$0xff] }
  0x25   : > { %v1527_v41 = vpack.c.bf16 %v243_v39, %v242_v38  ;;  %v227_v43 = vld [vmem:[%s2076_s5 + $0x68] sm:$0xff]  ;;  %v245_v45 = vld [vmem:[%s2076_s5 + $0xf8] sm:$0xff]  ;;  %v228_v48 = vld [vmem:[%s2076_s5 + $0x70] sm:$0xff] }
  0x26   : > { %v1530_v46 = vpack.c.bf16 %v227_v43, %v226_v42  ;;  %v1533_v47 = vpack.c.bf16 %v245_v45, %v244_v44  ;;  %v229_v49 = vld [vmem:[%s2076_s5 + $0x78] sm:$0xff]  ;;  %v183_v51 = vld [vmem:[%s2109_s17 + $0x8] sm:$0xff]  ;;  %v184_v53 = vld [vmem:[%s2109_s17 + $0x10] sm:$0xff]  ;;  %s1885_s5 = scalar_lea.vmem %s2480_s13, 8192 }
  0x27   : > { %1502 = vmatpush3.bf16.xpose.msk.msra.mxu0 %vm2080_vm1, %v1500_v14  ;;  %1548 = vmatpush3.bf16.xpose.msk.msra.mxu1 %vm2080_vm1, %v1500_v14  ;;  %v1536_v50 = vpack.c.bf16 %v229_v49, %v228_v48  ;;  %v199_v52 = vld [vmem:[%s2109_s17 + $0x88] sm:$0xff]  ;;  %v200_v54 = vld [vmem:[%s2109_s17 + $0x90] sm:$0xff]  ;;  %v185_v55 = vld [vmem:[%s2109_s17 + $0x18] sm:$0xff]  ;;  %p1886_p0 = scmp.ne.s32.totalorder %s2480_s13, %s1885_s5  ;;  %p1893_p5 = scmp.lt.s32.totalorder %s1891_s8, %s1885_s5 }
  0x28   : > { %1505 = vmatprep.subr.msk.bf16.mxu0 %vm2080_vm1, %v1503_v15  ;;  %1541 = vmatprep.subr.msk.bf16.mxu1 %vm2080_vm1, %v1503_v15  ;;  %v201_v56 = vld [vmem:[%s2109_s17 + $0x98] sm:$0xff]  ;;  %v186_v57 = vld [vmem:[%s2109_s17 + $0x20] sm:$0xff]  ;;  %v187_v59 = vld [vmem:[%s2109_s17 + $0x28] sm:$0xff] }
  0x29   : > { %v202_v58 = vld [vmem:[%s2109_s17 + $0xa0] sm:$0xff]  ;;  %v203_v60 = vld [vmem:[%s2109_s17 + $0xa8] sm:$0xff]  ;;  %v188_v61 = vld [vmem:[%s2109_s17 + $0x30] sm:$0xff]  ;;  %p1887_p1 = pnand %p1886_p0, %p2051_p3  ;;  %p1894_p6 = por %p1893_p5, %p1892_p4 }
  0x2a   : > { %v204_v62 = vld [vmem:[%s2109_s17 + $0xb0] sm:$0xff]  ;;  %v189_v63 = vld [vmem:[%s2109_s17 + $0x38] sm:$0xff]  ;;  %v190_v1 = vld [vmem:[%s2109_s17 + $0x40] sm:$0xff] }
  0x2b   : > { %v205_v0 = vld [vmem:[%s2109_s17 + $0xb8] sm:$0xff]  ;;  %v206_v2 = vld [vmem:[%s2109_s17 + $0xc0] sm:$0xff]  ;;  %v191_v3 = vld [vmem:[%s2109_s17 + $0x48] sm:$0xff]  ;;  %p1888_p2 = pneg %p1887_p1 }
  0x2c   : > { %v207_v4 = vld [vmem:[%s2109_s17 + $0xc8] sm:$0xff]  ;;  %v192_v5 = vld [vmem:[%s2109_s17 + $0x50] sm:$0xff]  ;;  %v193_v7 = vld [vmem:[%s2109_s17 + $0x58] sm:$0xff] }
  0x2d   : > { %v208_v6 = vld [vmem:[%s2109_s17 + $0xd0] sm:$0xff]  ;;  %v209_v8 = vld [vmem:[%s2109_s17 + $0xd8] sm:$0xff]  ;;  %v194_v9 = vld [vmem:[%s2109_s17 + $0x60] sm:$0xff]  ;;  %p1895_p7 = pnand %p1894_p6, %p1888_p2 }
  0x2e   : > { %v210_v10 = vld [vmem:[%s2109_s17 + $0xe0] sm:$0xff]  ;;  %v195_v11 = vld [vmem:[%s2109_s17 + $0x68] sm:$0xff]  ;;  %v196_v13 = vld [vmem:[%s2109_s17 + $0x70] sm:$0xff] }
  0x2f   : > { %1508 = vmatpush3.bf16.xpose.msk.msra.mxu0 %vm2080_vm1, %v1506_v22  ;;  %1549 = vmatpush3.bf16.xpose.msk.msra.mxu1 %vm2080_vm1, %v1506_v22  ;;  %v211_v12 = vld [vmem:[%s2109_s17 + $0xe8] sm:$0xff]  ;;  %v212_v14 = vld [vmem:[%s2109_s17 + $0xf0] sm:$0xff]  ;;  %v197_v15 = vld [vmem:[%s2109_s17 + $0x78] sm:$0xff] }
  0x30   : > { %1511 = vmatprep.subr.msk.bf16.mxu0 %vm2080_vm1, %v1509_v23  ;;  %1542 = vmatprep.subr.msk.bf16.mxu1 %vm2080_vm1, %v1509_v23 }
  0x37   : > { %1514 = vmatpush3.bf16.xpose.msk.msra.mxu0 %vm2080_vm1, %v1512_v28  ;;  %1550 = vmatpush3.bf16.xpose.msk.msra.mxu1 %vm2080_vm1, %v1512_v28 }
  0x38   : > { %1517 = vmatprep.subr.msk.bf16.mxu0 %vm2080_vm1, %v1515_v29  ;;  %1543 = vmatprep.subr.msk.bf16.mxu1 %vm2080_vm1, %v1515_v29 }
  0x3f   : > { %1520 = vmatpush3.bf16.xpose.msk.msra.mxu0 %vm2080_vm1, %v1518_v34  ;;  %1551 = vmatpush3.bf16.xpose.msk.msra.mxu1 %vm2080_vm1, %v1518_v34 }
  0x40   : > { %1523 = vmatprep.subr.msk.bf16.mxu0 %vm2080_vm1, %v1521_v35  ;;  %1544 = vmatprep.subr.msk.bf16.mxu1 %vm2080_vm1, %v1521_v35 }
  0x47   : > { %1526 = vmatpush3.bf16.xpose.msk.msra.mxu0 %vm2080_vm1, %v1524_v40  ;;  %1552 = vmatpush3.bf16.xpose.msk.msra.mxu1 %vm2080_vm1, %v1524_v40 }
  0x48   : > { %1529 = vmatprep.subr.msk.bf16.mxu0 %vm2080_vm1, %v1527_v41  ;;  %1545 = vmatprep.subr.msk.bf16.mxu1 %vm2080_vm1, %v1527_v41 }
  0x4f   : > { %1532 = vmatpush3.bf16.xpose.msk.msra.mxu0 %vm2080_vm1, %v1530_v46  ;;  %1553 = vmatpush3.bf16.xpose.msk.msra.mxu1 %vm2080_vm1, %v1530_v46 }
  0x50   : > { %1535 = vmatprep.subr.msk.bf16.mxu0 %vm2080_vm1, %v1533_v47  ;;  %1546 = vmatprep.subr.msk.bf16.mxu1 %vm2080_vm1, %v1533_v47 }
  0x57   : > { %1538 = vmatpush3.bf16.xpose.msk.msra.mxu0 %vm2080_vm1, %v1536_v50  ;;  %1554 = vmatpush3.bf16.xpose.msk.msra.mxu1 %vm2080_vm1, %v1536_v50 }
  0x5e   : > { %1428 = vmatmul.mubr.msk.f32.vlgmr.msra.gmra.mrb[0].mxu0 %vm246_vm0, %v2112_v16  ;;  %1460 = vmatmul.mubr.msk.f32.vlgmr.msra.gmra.mrb[0].mxu1 %vm246_vm0, %v2117_v17  ;;  %v213_v16 = vld [vmem:[%s2109_s17 + $0xf8] sm:$0xff] }
  0x5f   : > { %1429 = vmatprep.mubr.msk.f32.mxu0 %vm246_vm0, %v183_v51  ;;  %1461 = vmatprep.mubr.msk.f32.mxu1 %vm246_vm0, %v199_v52 }
  0x62   : > { %1430 = vmatmul.mubr.msk.f32.gmra.mrb[2].mxu0 %vm246_vm0, %v183_v51  ;;  %1462 = vmatmul.mubr.msk.f32.gmra.mrb[2].mxu1 %vm246_vm0, %v199_v52 }
  0x63   : > { %1431 = vmatprep.mubr.msk.f32.mxu0 %vm246_vm0, %v184_v53  ;;  %1463 = vmatprep.mubr.msk.f32.mxu1 %vm246_vm0, %v200_v54 }
  0x66   : > { %1432 = vmatmul.mubr.msk.f32.gmra.mrb[4].mxu0 %vm246_vm0, %v184_v53  ;;  %1464 = vmatmul.mubr.msk.f32.gmra.mrb[4].mxu1 %vm246_vm0, %v200_v54 }
  0x67   : > { %1433 = vmatprep.mubr.msk.f32.mxu0 %vm246_vm0, %v185_v55  ;;  %1465 = vmatprep.mubr.msk.f32.mxu1 %vm246_vm0, %v201_v56 }
  0x6a   : > { %1434 = vmatmul.mubr.msk.f32.gmra.mrb[6].mxu0 %vm246_vm0, %v185_v55  ;;  %1466 = vmatmul.mubr.msk.f32.gmra.mrb[6].mxu1 %vm246_vm0, %v201_v56 }
  0x6b   : > { %1435 = vmatprep.mubr.msk.f32.mxu0 %vm246_vm0, %v186_v57  ;;  %1467 = vmatprep.mubr.msk.f32.mxu1 %vm246_vm0, %v202_v58 }
  0x6e   : > { %1436 = vmatmul.mubr.msk.f32.gmra.mrb[8].mxu0 %vm246_vm0, %v186_v57  ;;  %1468 = vmatmul.mubr.msk.f32.gmra.mrb[8].mxu1 %vm246_vm0, %v202_v58 }
  0x6f   : > { %1437 = vmatprep.mubr.msk.f32.mxu0 %vm246_vm0, %v187_v59  ;;  %1469 = vmatprep.mubr.msk.f32.mxu1 %vm246_vm0, %v203_v60 }
  0x72   : > { %1438 = vmatmul.mubr.msk.f32.gmra.mrb[10].mxu0 %vm246_vm0, %v187_v59  ;;  %1470 = vmatmul.mubr.msk.f32.gmra.mrb[10].mxu1 %vm246_vm0, %v203_v60 }
  0x73   : > { %1439 = vmatprep.mubr.msk.f32.mxu0 %vm246_vm0, %v188_v61  ;;  %1471 = vmatprep.mubr.msk.f32.mxu1 %vm246_vm0, %v204_v62 }
  0x76   : > { %1440 = vmatmul.mubr.msk.f32.gmra.mrb[12].mxu0 %vm246_vm0, %v188_v61  ;;  %1472 = vmatmul.mubr.msk.f32.gmra.mrb[12].mxu1 %vm246_vm0, %v204_v62 }
  0x77   : > { %1441 = vmatprep.mubr.msk.f32.mxu0 %vm246_vm0, %v189_v63  ;;  %1473 = vmatprep.mubr.msk.f32.mxu1 %vm246_vm0, %v205_v0 }
  0x7a   : > { %1442 = vmatmul.mubr.msk.f32.gmra.mrb[14].mxu0 %vm246_vm0, %v189_v63  ;;  %1474 = vmatmul.mubr.msk.f32.gmra.mrb[14].mxu1 %vm246_vm0, %v205_v0 }
  0x7b   : > { %1443 = vmatprep.mubr.msk.f32.mxu0 %vm246_vm0, %v190_v1  ;;  %1475 = vmatprep.mubr.msk.f32.mxu1 %vm246_vm0, %v206_v2 }
  0x7e   : > { %1444 = vmatmul.mubr.msk.f32.gmra.mrb[16].mxu0 %vm246_vm0, %v190_v1  ;;  %1476 = vmatmul.mubr.msk.f32.gmra.mrb[16].mxu1 %vm246_vm0, %v206_v2 }
  0x7f   : > { %1445 = vmatprep.mubr.msk.f32.mxu0 %vm246_vm0, %v191_v3  ;;  %1477 = vmatprep.mubr.msk.f32.mxu1 %vm246_vm0, %v207_v4 }
  0x82   : > { %1446 = vmatmul.mubr.msk.f32.gmra.mrb[18].mxu0 %vm246_vm0, %v191_v3  ;;  %1478 = vmatmul.mubr.msk.f32.gmra.mrb[18].mxu1 %vm246_vm0, %v207_v4 }
  0x83   : > { %1447 = vmatprep.mubr.msk.f32.mxu0 %vm246_vm0, %v192_v5  ;;  %1479 = vmatprep.mubr.msk.f32.mxu1 %vm246_vm0, %v208_v6 }
  0x86   : > { %1448 = vmatmul.mubr.msk.f32.gmra.mrb[20].mxu0 %vm246_vm0, %v192_v5  ;;  %1480 = vmatmul.mubr.msk.f32.gmra.mrb[20].mxu1 %vm246_vm0, %v208_v6 }
  0x87   : > { %1449 = vmatprep.mubr.msk.f32.mxu0 %vm246_vm0, %v193_v7  ;;  %1481 = vmatprep.mubr.msk.f32.mxu1 %vm246_vm0, %v209_v8 }
  0x8a   : > { %1450 = vmatmul.mubr.msk.f32.gmra.mrb[22].mxu0 %vm246_vm0, %v193_v7  ;;  %1482 = vmatmul.mubr.msk.f32.gmra.mrb[22].mxu1 %vm246_vm0, %v209_v8 }
  0x8b   : > { %1451 = vmatprep.mubr.msk.f32.mxu0 %vm246_vm0, %v194_v9  ;;  %1483 = vmatprep.mubr.msk.f32.mxu1 %vm246_vm0, %v210_v10 }
  0x8e   : > { %1452 = vmatmul.mubr.msk.f32.gmra.mrb[24].mxu0 %vm246_vm0, %v194_v9  ;;  %1484 = vmatmul.mubr.msk.f32.gmra.mrb[24].mxu1 %vm246_vm0, %v210_v10 }
  0x8f   : > { %1453 = vmatprep.mubr.msk.f32.mxu0 %vm246_vm0, %v195_v11  ;;  %1485 = vmatprep.mubr.msk.f32.mxu1 %vm246_vm0, %v211_v12 }
  0x92   : > { %1454 = vmatmul.mubr.msk.f32.gmra.mrb[26].mxu0 %vm246_vm0, %v195_v11  ;;  %1486 = vmatmul.mubr.msk.f32.gmra.mrb[26].mxu1 %vm246_vm0, %v211_v12 }
  0x93   : > { %1455 = vmatprep.mubr.msk.f32.mxu0 %vm246_vm0, %v196_v13  ;;  %1487 = vmatprep.mubr.msk.f32.mxu1 %vm246_vm0, %v212_v14 }
  0x96   : > { %1456 = vmatmul.mubr.msk.f32.gmra.mrb[28].mxu0 %vm246_vm0, %v196_v13  ;;  %1488 = vmatmul.mubr.msk.f32.gmra.mrb[28].mxu1 %vm246_vm0, %v212_v14 }
  0x97   : > { %1457 = vmatprep.mubr.msk.f32.mxu0 %vm246_vm0, %v197_v15  ;;  %1489 = vmatprep.mubr.msk.f32.mxu1 %vm246_vm0, %v213_v16 }
  0x9a   : > { %1458 = vmatmul.mubr.msk.f32.gmra.mrb[30].mxu0 %vm246_vm0, %v197_v15  ;;  %1490 = vmatmul.mubr.msk.f32.gmra.mrb[30].mxu1 %vm246_vm0, %v213_v16 }
 0x131   : > { %v505_v17 = vpop.f32.mrb[0].mxu0  ;;  %v601_v18 = vpop.f32.mrb[0].mxu1 }
 0x132   : > { %v1323_v19 = vmul.f32 -1.442695, %v505_v17  ;;  %v1355_v20 = vmul.f32 -1.442695, %v601_v18  ;;  %v507_v21 = vpop.f32.mrb[1].mxu0  ;;  %v603_v22 = vpop.f32.mrb[1].mxu1 }
 0x133   : > { %v1324_v23 = vmul.f32 -1.442695, %v507_v21  ;;  %v1356_v24 = vmul.f32 -1.442695, %v603_v22 }
 0x134   : > { %1629 = vpow2.f32 %v1323_v19 }
 0x135   : > { %1631 = vpow2.f32 %v1355_v20  ;;  %v511_v25 = vpop.f32.mrb[2].mxu0  ;;  %v607_v26 = vpop.f32.mrb[2].mxu1 }
 0x136   : > { %1633 = vpow2.f32 %v1324_v23  ;;  %v1325_v27 = vmul.f32 -1.442695, %v511_v25  ;;  %v1357_v28 = vmul.f32 -1.442695, %v607_v26  ;;  %v513_v29 = vpop.f32.mrb[3].mxu0  ;;  %v609_v30 = vpop.f32.mrb[3].mxu1 }
 0x137   : > { %1635 = vpow2.f32 %v1356_v24  ;;  %v1326_v31 = vmul.f32 -1.442695, %v513_v29  ;;  %v1358_v32 = vmul.f32 -1.442695, %v609_v30 }
 0x138   : > { %1637 = vpow2.f32 %v1325_v27 }
 0x139   : > { %1639 = vpow2.f32 %v1357_v28  ;;  %v517_v33 = vpop.f32.mrb[4].mxu0  ;;  %v613_v34 = vpop.f32.mrb[4].mxu1 }
 0x13a   : > { %1641 = vpow2.f32 %v1326_v31  ;;  %v1327_v35 = vmul.f32 -1.442695, %v517_v33  ;;  %v1359_v36 = vmul.f32 -1.442695, %v613_v34  ;;  %v519_v37 = vpop.f32.mrb[5].mxu0  ;;  %v615_v38 = vpop.f32.mrb[5].mxu1 }
 0x13b   : > { %1643 = vpow2.f32 %v1358_v32  ;;  %v1328_v39 = vmul.f32 -1.442695, %v519_v37  ;;  %v1360_v40 = vmul.f32 -1.442695, %v615_v38 }
 0x13c   : > { %1645 = vpow2.f32 %v1327_v35 }
 0x13d   : > { %1647 = vpow2.f32 %v1359_v36  ;;  %v523_v41 = vpop.f32.mrb[6].mxu0  ;;  %v619_v42 = vpop.f32.mrb[6].mxu1 }
 0x13e   : > { %v1630_v43 = vpop.eup %1629  ;;  %1649 = vpow2.f32 %v1328_v39  ;;  %v1329_v44 = vmul.f32 -1.442695, %v523_v41  ;;  %v525_v45 = vpop.f32.mrb[7].mxu0  ;;  %v1361_v17 = vmul.f32 -1.442695, %v619_v42 }
 0x13f   : > { %v621_v46 = vpop.f32.mrb[7].mxu1  ;;  %v1632_v47 = vpop.eup %1631  ;;  %v888_v48 = vadd.f32 1.0, %v1630_v43  ;;  %1651 = vpow2.f32 %v1360_v40  ;;  %v1330_v21 = vmul.f32 -1.442695, %v525_v45 }
 0x140   : > { %v1634_v49 = vpop.eup %1633  ;;  %v920_v50 = vadd.f32 1.0, %v1632_v47  ;;  %1653 = vpow2.f32 %v1329_v44  ;;  %v1362_v24 = vmul.f32 -1.442695, %v621_v46 }
 0x141   : > { %v1636_v51 = vpop.eup %1635  ;;  %1655 = vrcp.f32 %v888_v48  ;;  %v889_v52 = vadd.f32 1.0, %v1634_v49  ;;  %v529_v53 = vpop.f32.mrb[8].mxu0 }
 0x142   : > { %v625_v54 = vpop.f32.mrb[8].mxu1  ;;  %v1638_v55 = vpop.eup %1637  ;;  %1657 = vrcp.f32 %v920_v50  ;;  %v921_v56 = vadd.f32 1.0, %v1636_v51  ;;  %v1331_v26 = vmul.f32 -1.442695, %v529_v53 }
 0x143   : > { %v531_v57 = vpop.f32.mrb[9].mxu0  ;;  %v1640_v58 = vpop.eup %1639  ;;  %1659 = vrcp.f32 %v889_v52  ;;  %v890_v59 = vadd.f32 1.0, %v1638_v55  ;;  %v1363_v30 = vmul.f32 -1.442695, %v625_v54 }
 0x144   : > { %v627_v60 = vpop.f32.mrb[9].mxu1  ;;  %v1642_v61 = vpop.eup %1641  ;;  %1661 = vrcp.f32 %v921_v56  ;;  %v922_v62 = vadd.f32 1.0, %v1640_v58  ;;  %v1332_v34 = vmul.f32 -1.442695, %v531_v57 }
 0x145   : > { %v1644_v63 = vpop.eup %1643  ;;  %1663 = vrcp.f32 %v890_v59  ;;  %v891_v0 = vadd.f32 1.0, %v1642_v61  ;;  %v535_v1 = vpop.f32.mrb[10].mxu0  ;;  %v1364_v36 = vmul.f32 -1.442695, %v627_v60 }
 0x146   : > { %v631_v2 = vpop.f32.mrb[10].mxu1  ;;  %v1646_v3 = vpop.eup %1645  ;;  %1665 = vrcp.f32 %v922_v62  ;;  %v923_v4 = vadd.f32 1.0, %v1644_v63  ;;  %v1333_v38 = vmul.f32 -1.442695, %v535_v1 }
 0x147   : > { %v537_v5 = vpop.f32.mrb[11].mxu0  ;;  %v1648_v6 = vpop.eup %1647  ;;  %1667 = vrcp.f32 %v891_v0  ;;  %v892_v7 = vadd.f32 1.0, %v1646_v3  ;;  %v1365_v42 = vmul.f32 -1.442695, %v631_v2 }
 0x148   : > { %v633_v8 = vpop.f32.mrb[11].mxu1  ;;  %v1650_v9 = vpop.eup %1649  ;;  %1669 = vrcp.f32 %v923_v4  ;;  %v924_v10 = vadd.f32 1.0, %v1648_v6  ;;  %v1334_v46 = vmul.f32 -1.442695, %v537_v5 }
 0x149   : > { %v1652_v11 = vpop.eup %1651  ;;  %1671 = vrcp.f32 %v892_v7  ;;  %v893_v12 = vadd.f32 1.0, %v1650_v9  ;;  %v541_v13 = vpop.f32.mrb[12].mxu0  ;;  %v1366_v48 = vmul.f32 -1.442695, %v633_v8 }
 0x14a   : > { %v2292_v14 = vpop.f32.mrb[12].mxu1  ;;  %v1654_v15 = vpop.eup %1653  ;;  %1673 = vrcp.f32 %v924_v10  ;;  %v925_v16 = vadd.f32 1.0, %v1652_v11  ;;  %v1335_v50 = vmul.f32 -1.442695, %v541_v13 }
 0x14b   : > { %v2294_v18 = vpop.f32.mrb[13].mxu0  ;;  %v1656_v19 = vpop.eup %1655  ;;  %1675 = vrcp.f32 %v893_v12  ;;  %v894_v20 = vadd.f32 1.0, %v1654_v15  ;;  %v1367_v54 = vmul.f32 -1.442695, %v2292_v14 }
 0x14c   : > { %v2296_v22 = vpop.f32.mrb[13].mxu1  ;;  %v1658_v23 = vpop.eup %1657  ;;  %1080 = vst [vmem:[%s2298_s24] sm:$0xff] %v1656_v19  ;;  %1677 = vrcp.f32 %v925_v16 }
 0x14d   : > { %v1660_v25 = vpop.eup %1659  ;;  %1112 = vst [vmem:[%s2298_s24 + $0x100] sm:$0xff] %v1658_v23  ;;  %1679 = vrcp.f32 %v894_v20  ;;  %v2302_v27 = vpop.f32.mrb[14].mxu0 }
 0x14e   : > { %v2304_v28 = vpop.f32.mrb[14].mxu1  ;;  %v1662_v29 = vpop.eup %1661  ;;  %1081 = vst [vmem:[%s2298_s24 + $0x8] sm:$0xff] %v1660_v25  ;;  %1681 = vpow2.f32 %v1361_v17 }
 0x14f   : > { %v2307_v31 = vpop.f32.mrb[15].mxu0  ;;  %v2309_v32 = vpop.f32.mrb[15].mxu1  ;;  %1113 = vst [vmem:[%s2298_s24 + $0x108] sm:$0xff] %v1662_v29  ;;  %1683 = vpow2.f32 %v1330_v21 }
 0x150   : > { %v1664_v33 = vpop.eup %1663  ;;  %1685 = vpow2.f32 %v1362_v24 }
 0x151   : > { %v1666_v35 = vpop.eup %1665  ;;  %1082 = vst [vmem:[%s2298_s24 + $0x10] sm:$0xff] %v1664_v33  ;;  %1687 = vpow2.f32 %v1331_v26  ;;  %v2314_v39 = vpop.f32.mrb[16].mxu0 }
 0x152   : > { %v1668_v37 = vpop.eup %1667  ;;  %1114 = vst [vmem:[%s2298_s24 + $0x110] sm:$0xff] %v1666_v35  ;;  %v2316_v40 = vpop.f32.mrb[16].mxu1  ;;  %1689 = vpow2.f32 %v1363_v30 }
 0x153   : > { %v1670_v41 = vpop.eup %1669  ;;  %1083 = vst [vmem:[%s2298_s24 + $0x18] sm:$0xff] %v1668_v37  ;;  %v2319_v43 = vpop.f32.mrb[17].mxu0  ;;  %1691 = vpow2.f32 %v1332_v34  ;;  %v1336_v37 = vmul.f32 -1.442695, %v2294_v18 }
 0x154   : > { %v2321_v44 = vpop.f32.mrb[17].mxu1  ;;  %v1672_v45 = vpop.eup %1671  ;;  %1115 = vst [vmem:[%s2298_s24 + $0x118] sm:$0xff] %v1670_v41  ;;  %1693 = vpow2.f32 %v1364_v36 }
 0x155   : > { %v1674_v47 = vpop.eup %1673  ;;  %1084 = vst [vmem:[%s2298_s24 + $0x20] sm:$0xff] %v1672_v45  ;;  %1695 = vpow2.f32 %v1333_v38  ;;  %v2326_v51 = vpop.f32.mrb[18].mxu0 }
 0x156   : > { %v1676_v49 = vpop.eup %1675  ;;  %1116 = vst [vmem:[%s2298_s24 + $0x120] sm:$0xff] %v1674_v47  ;;  %v2328_v52 = vpop.f32.mrb[18].mxu1  ;;  %1697 = vpow2.f32 %v1365_v42  ;;  %v1368_v42 = vmul.f32 -1.442695, %v2296_v22  ;;  %v1369_v22 = vmul.f32 -1.442695, %v2304_v28 }
 0x157   : > { %v1678_v53 = vpop.eup %1677  ;;  %1085 = vst [vmem:[%s2298_s24 + $0x28] sm:$0xff] %v1676_v49  ;;  %v2332_v55 = vpop.f32.mrb[19].mxu0  ;;  %1699 = vpow2.f32 %v1334_v46  ;;  %v1339_v28 = vmul.f32 -1.442695, %v2314_v39  ;;  %v1372_v39 = vmul.f32 -1.442695, %v2321_v44 }
 0x158   : > { %v2334_v56 = vpop.f32.mrb[19].mxu1  ;;  %v1680_v57 = vpop.eup %1679  ;;  %1117 = vst [vmem:[%s2298_s24 + $0x128] sm:$0xff] %v1678_v53  ;;  %1701 = vpow2.f32 %v1366_v48  ;;  %v1337_v48 = vmul.f32 -1.442695, %v2302_v27  ;;  %v1370_v27 = vmul.f32 -1.442695, %v2309_v32 }
 0x159   : > { %v1682_v58 = vpop.eup %1681  ;;  %1086 = vst [vmem:[%s2298_s24 + $0x30] sm:$0xff] %v1680_v57  ;;  %1703 = vpow2.f32 %v1335_v50  ;;  %v2338_v61 = vpop.f32.mrb[20].mxu0  ;;  %v1371_v32 = vmul.f32 -1.442695, %v2316_v40  ;;  %v1341_v40 = vmul.f32 -1.442695, %v2326_v51 }
 0x15a   : > { %v1684_v59 = vpop.eup %1683  ;;  %v926_v60 = vadd.f32 1.0, %v1682_v58  ;;  %v2340_v62 = vpop.f32.mrb[20].mxu1  ;;  %1705 = vpow2.f32 %v1367_v54  ;;  %v1338_v54 = vmul.f32 -1.442695, %v2307_v31  ;;  %v1373_v44 = vmul.f32 -1.442695, %v2328_v52 }
 0x15b   : > { %v1686_v63 = vpop.eup %1685  ;;  %v895_v0 = vadd.f32 1.0, %v1684_v59  ;;  %v2342_v1 = vpop.f32.mrb[21].mxu0 }
 0x15c   : > { %v1688_v2 = vpop.eup %1687  ;;  %1707 = vrcp.f32 %v926_v60  ;;  %v927_v3 = vadd.f32 1.0, %v1686_v63  ;;  %v2344_v4 = vpop.f32.mrb[21].mxu1 }
 0x15d   : > { %v1690_v5 = vpop.eup %1689  ;;  %1709 = vrcp.f32 %v895_v0  ;;  %v896_v6 = vadd.f32 1.0, %v1688_v2  ;;  %v2346_v9 = vpop.f32.mrb[22].mxu0 }
 0x15e   : > { %v1692_v7 = vpop.eup %1691  ;;  %1711 = vrcp.f32 %v927_v3  ;;  %v928_v8 = vadd.f32 1.0, %v1690_v5  ;;  %v2348_v10 = vpop.f32.mrb[22].mxu1  ;;  %v1340_v3 = vmul.f32 -1.442695, %v2319_v43 }
 0x15f   : > { %v1694_v11 = vpop.eup %1693  ;;  %1713 = vrcp.f32 %v896_v6  ;;  %v897_v12 = vadd.f32 1.0, %v1692_v7  ;;  %v2350_v13 = vpop.f32.mrb[23].mxu0 }
 0x160   : > { %v1696_v14 = vpop.eup %1695  ;;  %1715 = vrcp.f32 %v928_v8  ;;  %v929_v15 = vadd.f32 1.0, %v1694_v11  ;;  %v2352_v16 = vpop.f32.mrb[23].mxu1 }
 0x161   : > { %v1698_v17 = vpop.eup %1697  ;;  %1717 = vrcp.f32 %v897_v12  ;;  %v898_v19 = vadd.f32 1.0, %v1696_v14  ;;  %v2354_v23 = vpop.f32.mrb[24].mxu0 }
 0x162   : > { %v1700_v20 = vpop.eup %1699  ;;  %1719 = vrcp.f32 %v929_v15  ;;  %v930_v21 = vadd.f32 1.0, %v1698_v17  ;;  %v2356_v24 = vpop.f32.mrb[24].mxu1  ;;  %v1342_v15 = vmul.f32 -1.442695, %v2332_v55 }
 0x163   : > { %v1702_v25 = vpop.eup %1701  ;;  %1721 = vrcp.f32 %v898_v19  ;;  %v899_v26 = vadd.f32 1.0, %v1700_v20  ;;  %v2358_v29 = vpop.f32.mrb[25].mxu0 }
 0x164   : > { %v1704_v30 = vpop.eup %1703  ;;  %1723 = vrcp.f32 %v930_v21  ;;  %v931_v33 = vadd.f32 1.0, %v1702_v25  ;;  %v2360_v34 = vpop.f32.mrb[25].mxu1 }
 0x165   : > { %v1706_v35 = vpop.eup %1705  ;;  %1725 = vrcp.f32 %v899_v26  ;;  %v900_v36 = vadd.f32 1.0, %v1704_v30  ;;  %v2364_v45 = vpop.f32.mrb[26].mxu0 }
 0x166   : > { %v1708_v38 = vpop.eup %1707  ;;  %1727 = vrcp.f32 %v931_v33  ;;  %v932_v41 = vadd.f32 1.0, %v1706_v35  ;;  %v2366_v46 = vpop.f32.mrb[26].mxu1 }
 0x167   : > { %v1710_v47 = vpop.eup %1709  ;;  %1118 = vst [vmem:[%s2298_s24 + $0x130] sm:$0xff] %v1708_v38  ;;  %1729 = vrcp.f32 %v900_v36  ;;  %v2370_v49 = vpop.f32.mrb[27].mxu0 }
 0x168   : > { %v2372_v50 = vpop.f32.mrb[27].mxu1  ;;  %v1712_v18 = vpop.eup %1711  ;;  %1087 = vst [vmem:[%s2298_s24 + $0x38] sm:$0xff] %v1710_v47  ;;  %1731 = vrcp.f32 %v932_v41 }
 0x169   : > { %v1714_v53 = vpop.eup %1713  ;;  %1119 = vst [vmem:[%s2298_s24 + $0x138] sm:$0xff] %v1712_v18  ;;  %1733 = vpow2.f32 %v1336_v37  ;;  %v2380_v58 = vpop.f32.mrb[28].mxu0 }
 0x16a   : > { %v1716_v57 = vpop.eup %1715  ;;  %1088 = vst [vmem:[%s2298_s24 + $0x40] sm:$0xff] %v1714_v53  ;;  %1735 = vpow2.f32 %v1368_v42  ;;  %v2382_v59 = vpop.f32.mrb[28].mxu1 }
 0x16b   : > { %v1718_v60 = vpop.eup %1717  ;;  %1120 = vst [vmem:[%s2298_s24 + $0x140] sm:$0xff] %v1716_v57  ;;  %1737 = vpow2.f32 %v1337_v48  ;;  %v2386_v63 = vpop.f32.mrb[29].mxu0 }
 0x16c   : > { %v2388_v0 = vpop.f32.mrb[29].mxu1  ;;  %v1720_v31 = vpop.eup %1719  ;;  %1089 = vst [vmem:[%s2298_s24 + $0x48] sm:$0xff] %v1718_v60  ;;  %1739 = vpow2.f32 %v1369_v22 }
 0x16d   : > { %v1722_v2 = vpop.eup %1721  ;;  %1121 = vst [vmem:[%s2298_s24 + $0x148] sm:$0xff] %v1720_v31  ;;  %1741 = vpow2.f32 %v1338_v54  ;;  %v2396_v6 = vpop.f32.mrb[30].mxu0 }
 0x16e   : > { %v1724_v5 = vpop.eup %1723  ;;  %1090 = vst [vmem:[%s2298_s24 + $0x50] sm:$0xff] %v1722_v2  ;;  %1743 = vpow2.f32 %v1370_v27  ;;  %v2398_v7 = vpop.f32.mrb[30].mxu1  ;;  %v1343_v2 = vmul.f32 -1.442695, %v2338_v61  ;;  %v1345_v61 = vmul.f32 -1.442695, %v2346_v9 }
 0x16f   : > { %v1726_v8 = vpop.eup %1725  ;;  %1122 = vst [vmem:[%s2298_s24 + $0x150] sm:$0xff] %v1724_v5  ;;  %1745 = vpow2.f32 %v1339_v28  ;;  %v2402_v11 = vpop.f32.mrb[31].mxu0  ;;  %v1374_v28 = vmul.f32 -1.442695, %v2334_v56  ;;  %v1375_v5 = vmul.f32 -1.442695, %v2340_v62 }
 0x170   : > { %v2404_v43 = vpop.f32.mrb[31].mxu1  ;;  %v1728_v12 = vpop.eup %1727  ;;  %1091 = vst [vmem:[%s2298_s24 + $0x58] sm:$0xff] %v1726_v8  ;;  %1747 = vpow2.f32 %v1371_v32  ;;  %v1344_v8 = vmul.f32 -1.442695, %v2342_v1  ;;  %v1376_v56 = vmul.f32 -1.442695, %v2344_v4 }
 0x171   : > { %v1730_v14 = vpop.eup %1729  ;;  %1123 = vst [vmem:[%s2298_s24 + $0x158] sm:$0xff] %v1728_v12  ;;  %1749 = vpow2.f32 %v1340_v3  ;;  %v1377_v62 = vmul.f32 -1.442695, %v2348_v10  ;;  %v1346_v1 = vmul.f32 -1.442695, %v2350_v13 }
 0x172   : > { %v1732_v17 = vpop.eup %1731  ;;  %1092 = vst [vmem:[%s2298_s24 + $0x60] sm:$0xff] %v1730_v14  ;;  %1751 = vpow2.f32 %v1372_v39  ;;  %v1378_v4 = vmul.f32 -1.442695, %v2352_v16  ;;  %v1347_v9 = vmul.f32 -1.442695, %v2354_v23 }
 0x173   : > { %v1734_v19 = vpop.eup %1733  ;;  %1124 = vst [vmem:[%s2298_s24 + $0x160] sm:$0xff] %v1732_v17  ;;  %1753 = vpow2.f32 %v1341_v40  ;;  %v1379_v10 = vmul.f32 -1.442695, %v2356_v24  ;;  %v1348_v13 = vmul.f32 -1.442695, %v2358_v29 }
 0x174   : > { %v1736_v51 = vpop.eup %1735  ;;  %v901_v20 = vadd.f32 1.0, %v1734_v19  ;;  %1755 = vpow2.f32 %v1373_v44  ;;  %v1380_v16 = vmul.f32 -1.442695, %v2360_v34 }
 0x175   : > { %v1738_v21 = vpop.eup %1737  ;;  %v933_v25 = vadd.f32 1.0, %v1736_v51  ;;  %1757 = vpow2.f32 %v1342_v15 }
 0x176   : > { %v1740_v26 = vpop.eup %1739  ;;  %1759 = vrcp.f32 %v901_v20  ;;  %v902_v52 = vadd.f32 1.0, %v1738_v21 }
 0x177   : > { %v1742_v30 = vpop.eup %1741  ;;  %1761 = vrcp.f32 %v933_v25  ;;  %v934_v33 = vadd.f32 1.0, %v1740_v26 }
 0x178   : > { %v1744_v35 = vpop.eup %1743  ;;  %1763 = vrcp.f32 %v902_v52  ;;  %v903_v55 = vadd.f32 1.0, %v1742_v30 }
 0x179   : > { %v1746_v36 = vpop.eup %1745  ;;  %1765 = vrcp.f32 %v934_v33  ;;  %v935_v37 = vadd.f32 1.0, %v1744_v35 }
 0x17a   : > { %v1748_v38 = vpop.eup %1747  ;;  %1767 = vrcp.f32 %v903_v55  ;;  %v904_v41 = vadd.f32 1.0, %v1746_v36 }
 0x17b   : > { %v1750_v42 = vpop.eup %1749  ;;  %1769 = vrcp.f32 %v935_v37  ;;  %v936_v47 = vadd.f32 1.0, %v1748_v38 }
 0x17c   : > { %v1752_v48 = vpop.eup %1751  ;;  %1771 = vrcp.f32 %v904_v41  ;;  %v905_v18 = vadd.f32 1.0, %v1750_v42 }
 0x17d   : > { %v1754_v22 = vpop.eup %1753  ;;  %1773 = vrcp.f32 %v936_v47  ;;  %v937_v53 = vadd.f32 1.0, %v1752_v48 }
 0x17e   : > { %v1756_v54 = vpop.eup %1755  ;;  %1775 = vrcp.f32 %v905_v18  ;;  %v906_v57 = vadd.f32 1.0, %v1754_v22 }
 0x17f   : > { %v1758_v27 = vpop.eup %1757  ;;  %1777 = vrcp.f32 %v937_v53  ;;  %v938_v60 = vadd.f32 1.0, %v1756_v54 }
 0x180   : > { %v1760_v31 = vpop.eup %1759  ;;  %1779 = vrcp.f32 %v906_v57  ;;  %v907_v32 = vadd.f32 1.0, %v1758_v27 }
 0x181   : > { %v1762_v3 = vpop.eup %1761  ;;  %1093 = vst [vmem:[%s2298_s24 + $0x68] sm:$0xff] %v1760_v31  ;;  %1781 = vrcp.f32 %v938_v60 }
 0x182   : > { %v1764_v39 = vpop.eup %1763  ;;  %1125 = vst [vmem:[%s2298_s24 + $0x168] sm:$0xff] %v1762_v3  ;;  %1783 = vrcp.f32 %v907_v32 }
 0x183   : > { %v1766_v40 = vpop.eup %1765  ;;  %1094 = vst [vmem:[%s2298_s24 + $0x70] sm:$0xff] %v1764_v39  ;;  %1785 = vpow2.f32 %v1374_v28  ;;  %v1349_v28 = vmul.f32 -1.442695, %v2364_v45  ;;  %v1351_v45 = vmul.f32 -1.442695, %v2380_v58 }
 0x184   : > { %v1768_v12 = vpop.eup %1767  ;;  %1126 = vst [vmem:[%s2298_s24 + $0x170] sm:$0xff] %v1766_v40  ;;  %1787 = vpow2.f32 %v1343_v2  ;;  %v1381_v2 = vmul.f32 -1.442695, %v2366_v46  ;;  %v1383_v46 = vmul.f32 -1.442695, %v2382_v59 }
 0x185   : > { %v1770_v44 = vpop.eup %1769  ;;  %1095 = vst [vmem:[%s2298_s24 + $0x78] sm:$0xff] %v1768_v12  ;;  %1789 = vpow2.f32 %v1375_v5  ;;  %v1350_v5 = vmul.f32 -1.442695, %v2370_v49  ;;  %v1352_v49 = vmul.f32 -1.442695, %v2386_v63 }
 0x186   : > { %v1772_v14 = vpop.eup %1771  ;;  %1127 = vst [vmem:[%s2298_s24 + $0x178] sm:$0xff] %v1770_v44  ;;  %1791 = vpow2.f32 %v1344_v8  ;;  %v1382_v8 = vmul.f32 -1.442695, %v2372_v50  ;;  %v1384_v50 = vmul.f32 -1.442695, %v2388_v0 }
 0x187   : > { %v1774_v15 = vpop.eup %1773  ;;  %1096 = vst [vmem:[%s2298_s24 + $0x80] sm:$0xff] %v1772_v14  ;;  %1793 = vpow2.f32 %v1376_v56  ;;  %v1353_v58 = vmul.f32 -1.442695, %v2396_v6  ;;  %v1385_v59 = vmul.f32 -1.442695, %v2398_v7 }
 0x188   : > { %v1776_v17 = vpop.eup %1775  ;;  %1128 = vst [vmem:[%s2298_s24 + $0x180] sm:$0xff] %v1774_v15  ;;  %1795 = vpow2.f32 %v1345_v61  ;;  %v1354_v14 = vmul.f32 -1.442695, %v2402_v11  ;;  %v1386_v0 = vmul.f32 -1.442695, %v2404_v43 }
 0x189   : > { %v1778_v19 = vpop.eup %1777  ;;  %1097 = vst [vmem:[%s2298_s24 + $0x88] sm:$0xff] %v1776_v17  ;;  %1797 = vpow2.f32 %v1377_v62 }
 0x18a   : > { %v1780_v51 = vpop.eup %1779  ;;  %1129 = vst [vmem:[%s2298_s24 + $0x188] sm:$0xff] %v1778_v19  ;;  %1799 = vpow2.f32 %v1346_v1 }
 0x18b   : > { %v1782_v20 = vpop.eup %1781  ;;  %1098 = vst [vmem:[%s2298_s24 + $0x90] sm:$0xff] %v1780_v51  ;;  %1801 = vpow2.f32 %v1378_v4 }
 0x18c   : > { %v1784_v21 = vpop.eup %1783  ;;  %1130 = vst [vmem:[%s2298_s24 + $0x190] sm:$0xff] %v1782_v20  ;;  %1803 = vpow2.f32 %v1347_v9 }
 0x18d   : > { %v1786_v23 = vpop.eup %1785  ;;  %1099 = vst [vmem:[%s2298_s24 + $0x98] sm:$0xff] %v1784_v21  ;;  %1805 = vpow2.f32 %v1379_v10 }
 0x18e   : > { %v1788_v25 = vpop.eup %1787  ;;  %v939_v26 = vadd.f32 1.0, %v1786_v23  ;;  %1807 = vpow2.f32 %v1348_v13 }
 0x18f   : > { %v1790_v24 = vpop.eup %1789  ;;  %v908_v52 = vadd.f32 1.0, %v1788_v25  ;;  %1809 = vpow2.f32 %v1380_v16 }
 0x190   : > { %v1792_v30 = vpop.eup %1791  ;;  %1811 = vrcp.f32 %v939_v26  ;;  %v940_v29 = vadd.f32 1.0, %v1790_v24 }
 0x191   : > { %v1794_v33 = vpop.eup %1793  ;;  %1813 = vrcp.f32 %v908_v52  ;;  %v909_v35 = vadd.f32 1.0, %v1792_v30 }
 0x192   : > { %v1796_v55 = vpop.eup %1795  ;;  %1815 = vrcp.f32 %v940_v29  ;;  %v941_v34 = vadd.f32 1.0, %v1794_v33 }
 0x193   : > { %v1798_v36 = vpop.eup %1797  ;;  %1817 = vrcp.f32 %v909_v35  ;;  %v910_v37 = vadd.f32 1.0, %v1796_v55 }
 0x194   : > { %v1800_v38 = vpop.eup %1799  ;;  %1819 = vrcp.f32 %v941_v34  ;;  %v942_v41 = vadd.f32 1.0, %v1798_v36 }
 0x195   : > { %v1802_v42 = vpop.eup %1801  ;;  %1821 = vrcp.f32 %v910_v37  ;;  %v911_v47 = vadd.f32 1.0, %v1800_v38 }
 0x196   : > { %v1804_v48 = vpop.eup %1803  ;;  %1823 = vrcp.f32 %v942_v41  ;;  %v943_v18 = vadd.f32 1.0, %v1802_v42 }
 0x197   : > { %v1806_v22 = vpop.eup %1805  ;;  %1825 = vrcp.f32 %v911_v47  ;;  %v912_v53 = vadd.f32 1.0, %v1804_v48 }
 0x198   : > { %v1808_v54 = vpop.eup %1807  ;;  %1827 = vrcp.f32 %v943_v18  ;;  %v944_v57 = vadd.f32 1.0, %v1806_v22 }
 0x199   : > { %v1810_v27 = vpop.eup %1809  ;;  %1829 = vrcp.f32 %v912_v53  ;;  %v913_v60 = vadd.f32 1.0, %v1808_v54 }
 0x19a   : > { %v1812_v31 = vpop.eup %1811  ;;  %1831 = vrcp.f32 %v944_v57  ;;  %v945_v32 = vadd.f32 1.0, %v1810_v27 }
 0x19b   : > { %v1814_v3 = vpop.eup %1813  ;;  %1131 = vst [vmem:[%s2298_s24 + $0x198] sm:$0xff] %v1812_v31  ;;  %1833 = vrcp.f32 %v913_v60 }
 0x19c   : > { %v1816_v39 = vpop.eup %1815  ;;  %1100 = vst [vmem:[%s2298_s24 + $0xa0] sm:$0xff] %v1814_v3  ;;  %1835 = vrcp.f32 %v945_v32 }
 0x19d   : > { %v1818_v40 = vpop.eup %1817  ;;  %1132 = vst [vmem:[%s2298_s24 + $0x1a0] sm:$0xff] %v1816_v39  ;;  %1837 = vpow2.f32 %v1349_v28 }
 0x19e   : > { %v1820_v56 = vpop.eup %1819  ;;  %1101 = vst [vmem:[%s2298_s24 + $0xa8] sm:$0xff] %v1818_v40  ;;  %1839 = vpow2.f32 %v1381_v2 }
 0x19f   : > { %v1822_v12 = vpop.eup %1821  ;;  %1133 = vst [vmem:[%s2298_s24 + $0x1a8] sm:$0xff] %v1820_v56  ;;  %1841 = vpow2.f32 %v1350_v5 }
 0x1a0   : > { %v1824_v61 = vpop.eup %1823  ;;  %1102 = vst [vmem:[%s2298_s24 + $0xb0] sm:$0xff] %v1822_v12  ;;  %1843 = vpow2.f32 %v1382_v8 }
 0x1a1   : > { %v1826_v44 = vpop.eup %1825  ;;  %1134 = vst [vmem:[%s2298_s24 + $0x1b0] sm:$0xff] %v1824_v61  ;;  %1845 = vpow2.f32 %v1351_v45 }
 0x1a2   : > { %v1828_v62 = vpop.eup %1827  ;;  %1103 = vst [vmem:[%s2298_s24 + $0xb8] sm:$0xff] %v1826_v44  ;;  %1847 = vpow2.f32 %v1383_v46 }
 0x1a3   : > { %v1830_v63 = vpop.eup %1829  ;;  %1135 = vst [vmem:[%s2298_s24 + $0x1b8] sm:$0xff] %v1828_v62  ;;  %1849 = vpow2.f32 %v1352_v49 }
 0x1a4   : > { %v1832_v1 = vpop.eup %1831  ;;  %1104 = vst [vmem:[%s2298_s24 + $0xc0] sm:$0xff] %v1830_v63  ;;  %1851 = vpow2.f32 %v1384_v50 }
 0x1a5   : > { %v1834_v15 = vpop.eup %1833  ;;  %1136 = vst [vmem:[%s2298_s24 + $0x1c0] sm:$0xff] %v1832_v1  ;;  %1853 = vpow2.f32 %v1353_v58 }
 0x1a6   : > { %v1836_v6 = vpop.eup %1835  ;;  %1105 = vst [vmem:[%s2298_s24 + $0xc8] sm:$0xff] %v1834_v15  ;;  %1855 = vpow2.f32 %v1385_v59 }
 0x1a7   : > { %v1838_v4 = vpop.eup %1837  ;;  %1137 = vst [vmem:[%s2298_s24 + $0x1c8] sm:$0xff] %v1836_v6  ;;  %1857 = vpow2.f32 %v1354_v14 }
 0x1a8   : > { %v1840_v7 = vpop.eup %1839  ;;  %v914_v17 = vadd.f32 1.0, %v1838_v4  ;;  %1859 = vpow2.f32 %v1386_v0 }
 0x1a9   : > { %v1842_v9 = vpop.eup %1841  ;;  %v946_v19 = vadd.f32 1.0, %v1840_v7 }
 0x1aa   : > { %v1844_v11 = vpop.eup %1843  ;;  %1861 = vrcp.f32 %v914_v17  ;;  %v915_v10 = vadd.f32 1.0, %v1842_v9 }
 0x1ab   : > { %v1846_v51 = vpop.eup %1845  ;;  %1863 = vrcp.f32 %v946_v19  ;;  %v947_v43 = vadd.f32 1.0, %v1844_v11 }
 0x1ac   : > { %v1848_v13 = vpop.eup %1847  ;;  %1865 = vrcp.f32 %v915_v10  ;;  %v916_v20 = vadd.f32 1.0, %v1846_v51 }
 0x1ad   : > { %v1850_v16 = vpop.eup %1849  ;;  %1867 = vrcp.f32 %v947_v43  ;;  %v948_v21 = vadd.f32 1.0, %v1848_v13 }
 0x1ae   : > { %v1852_v23 = vpop.eup %1851  ;;  %1869 = vrcp.f32 %v916_v20  ;;  %v917_v25 = vadd.f32 1.0, %v1850_v16 }
 0x1af   : > { %v1854_v26 = vpop.eup %1853  ;;  %1871 = vrcp.f32 %v948_v21  ;;  %v949_v24 = vadd.f32 1.0, %v1852_v23 }
 0x1b0   : > { %v1856_v52 = vpop.eup %1855  ;;  %1873 = vrcp.f32 %v917_v25  ;;  %v918_v30 = vadd.f32 1.0, %v1854_v26 }
 0x1b1   : > { %v1858_v29 = vpop.eup %1857  ;;  %1875 = vrcp.f32 %v949_v24  ;;  %v950_v33 = vadd.f32 1.0, %v1856_v52 }
 0x1b2   : > { %v1860_v35 = vpop.eup %1859  ;;  %1877 = vrcp.f32 %v918_v30  ;;  %v919_v55 = vadd.f32 1.0, %v1858_v29 }
 0x1b3   : > { %1879 = vrcp.f32 %v950_v33  ;;  %v951_v34 = vadd.f32 1.0, %v1860_v35 }
 0x1b4   : > { %v1862_v36 = vpop.eup %1861  ;;  %1881 = vrcp.f32 %v919_v55 }
 0x1b5   : > { %v1864_v37 = vpop.eup %1863  ;;  %1106 = vst [vmem:[%s2298_s24 + $0xd0] sm:$0xff] %v1862_v36  ;;  %1883 = vrcp.f32 %v951_v34 }
 0x1b6   : > { %v1866_v38 = vpop.eup %1865  ;;  %1138 = vst [vmem:[%s2298_s24 + $0x1d0] sm:$0xff] %v1864_v37 }
 0x1b7   : > { %v1868_v41 = vpop.eup %1867  ;;  %1107 = vst [vmem:[%s2298_s24 + $0xd8] sm:$0xff] %v1866_v38 }
 0x1b8   : > { %v1870_v42 = vpop.eup %1869  ;;  %1139 = vst [vmem:[%s2298_s24 + $0x1d8] sm:$0xff] %v1868_v41 }
 0x1b9   : > { %v1872_v47 = vpop.eup %1871  ;;  %1108 = vst [vmem:[%s2298_s24 + $0xe0] sm:$0xff] %v1870_v42 }
 0x1ba   : > { %v1874_v48 = vpop.eup %1873  ;;  %1140 = vst [vmem:[%s2298_s24 + $0x1e0] sm:$0xff] %v1872_v47 }
 0x1bb   : > { %v1876_v18 = vpop.eup %1875  ;;  %1109 = vst [vmem:[%s2298_s24 + $0xe8] sm:$0xff] %v1874_v48 }
 0x1bc   : > { %v1878_v22 = vpop.eup %1877  ;;  %1141 = vst [vmem:[%s2298_s24 + $0x1e8] sm:$0xff] %v1876_v18 }
 0x1bd   : > { %v1880_v53 = vpop.eup %1879  ;;  %1110 = vst [vmem:[%s2298_s24 + $0xf0] sm:$0xff] %v1878_v22 }
 0x1be   : > { %v1882_v54 = vpop.eup %1881  ;;  %1142 = vst [vmem:[%s2298_s24 + $0x1f0] sm:$0xff] %v1880_v53 }
 0x1bf   : > { %v1884_v57 = vpop.eup %1883  ;;  %1111 = vst [vmem:[%s2298_s24 + $0xf8] sm:$0xff] %v1882_v54 }
 0x1c0   : > { %1143 = vst [vmem:[%s2298_s24 + $0x1f8] sm:$0xff] %v1884_v57 }
 0x1c1   : > { %1898 = shalt.err (!%p1895_p7)
}
 0x1c2   : > { %s1899_s17 = scalar_lea.hbm %s2477_s3, 8192  ;;  %s1903_s24 = scalar_lea.hbm %s2541_s2, 32768 }
 0x1c3   : > { %p1900_p9 = scmp.ne.s32.totalorder %s2477_s3, %s1899_s17  ;;  %p1904_p12 = scmp.lt.u32.totalorder %s2477_s3, %s2541_s2 }
 0x1c4   : > { %p1905_p13 = scmp.lt.u32.totalorder %s1903_s24, %s1899_s17  ;;  %p1907_p1 = scmp.lt.u32.totalorder %s1899_s17, %s2477_s3 }
 0x1c5   : > { %p1901_p10 = pnand %p1900_p9, %p2051_p3 }
 0x1c6   : > { %p1906_p0 = por %p1905_p13, %p1904_p12 }
 0x1c7   : > { %p1902_p11 = pneg %p1901_p10 }
 0x1c8   : > { %p1908_p2 = por %p1907_p1, %p1906_p0 }
 0x1ca   : > { %p1909_p4 = pnand %p1908_p2, %p1902_p11 }
 0x1cc   : > { %1912 = shalt.err (!%p1909_p4)
}
 0x1cd   : > { %s1982_s28 = smov 256   ;;  %s1983_s12 = smov 512  }
 0x1ce   : > { %s1984_s29 = smov 16  }
 0x1cf   : > { %1555 = dma.vmem_to_hbm [thread:$0]  (%p2051_p3), %s2480_s13, 8192, %s2477_s3, %s2487_s4, %s1982_s28, %s1983_s12, %s1984_s29  }
 0x1d0 PF: > { %p1561_p5 = scmp.ge.s32.totalorder %s1979_s16, 2  ;;  %s1176_s30 = sand.u32 1, %s1951_s9  }
 0x1d1   : > { %s1177_s5 = scalar_lea.sflag [#allocation3], %s1176_s30 }
 0x1d2   : > { %p1558_p6 = pnand %p1561_p5, %p2060_p8 }
 0x1d4   : > { %1946 = dma.done.wait (!%p1558_p6), %s1177_s5, 8192  }
 0x1d5   : > { %1948 = vsyncadd (!%p1558_p6), %s1177_s5, 4294959104  ;;  %s15_s16 = sadd.s32 1, %s1979_s16   ;;  %s2546_s9 = smov %s1955_s10 }
 0x1d6   : > { %p12_p7 = scmp.ge.s32.totalorder %s15_s16, 6   ;;  %s2547_s10 = smov %s1959_s11 }
 0x1d7   : > { %s2548_s11 = smov %s2069_s27  ;;  %s2549_s12 = smov %s1971_s14 }
 0x1d8   : > { %s2550_s13 = smov %s1975_s15  ;;  %s2551_s14 = smov %s2554_s19 }
 0x1d9   : > { %s2552_s15 = smov %s2558_s20  ;;  %14 = sbr.rel (!%p12_p7) target bundleno = 5 (0x5), region = 66 }
 0x1e0   :  { %1182 = vsyncpa [#allocation3], 1 }
 0x1e1   :  { %1184 = vsyncpa [#allocation3 + $0x1], 1 }

// kernel: msgad_forward.3
= control target key start
LH: loop header
LB: loop body
LE: loop exit
PB: predicated region body
PF: predicated region fallthrough
CT: control target
= control target key end

     0   :  { %s1390_s18 = smov 0   ;;  %s1682_s0 = inlined_call_operand.vmem [shape: f32[512,16], index: 0, kind: input, shape index: {}]   ;;  %s1683_s1 = inlined_call_operand.vmem [shape: f32[16,64], index: 1, kind: input, shape index: {}]   ;;  %s1684_s2 = inlined_call_operand.vmem [shape: f32[1,64], index: 2, kind: input, shape index: {}]   ;;  %s1685_s3 = inlined_call_operand.vmem [shape: f32[64,32], index: 3, kind: input, shape index: {}]   ;;  %s1686_s4 = inlined_call_operand.vmem [shape: f32[1,32], index: 4, kind: input, shape index: {}]   ;;  %s1687_s5 = inlined_call_operand.vmem [shape: f32[512,32], index: 5, kind: output, shape index: {}]  }
   0x1 LB: > { %s1049_s19 = sadd.s32 4294967295, %s1358_s18   ;;  %p1053_p0 = scmp.ge.s32.totalorder %s1358_s18, 1  ;;  %s1358_s18 = sphi %s1390_s18, %s15_s18  }
   0x2   : > { %p188_p1 = scmp.lt.s32.totalorder %s1358_s18, 3 }
   0x4   : > { %p189_p2 = pnand %p1053_p0, %p188_p1 }
   0x5   : > { %v260_v0 = vld [vmem:[%s1683_s1] sm:$0xff] (!%p189_p2)  ;;  %v261_v1 = vld [vmem:[%s1683_s1 + $0x8] sm:$0xff] (!%p189_p2)  ;;  %s1054_s24 = sshll.u32 (!%p189_p2), %s1049_s19, 5  ;;  %v625_v5 = vld [vmem:[%s1685_s3 + $0x10] sm:$0xff] (!%p189_p2)  ;;  %vm269_vm0 = vcmask (!%p189_p2), 130048   ;;  %vm638_vm1 = vcmask (!%p189_p2), 523264  }
   0x6   : > { %192 = sbr.rel (%p189_p2) target bundleno = 512 (0x200), region = 40  ;;  %v623_v2 = vld [vmem:[%s1685_s3] sm:$0xff] (!%p189_p2)  ;;  %v1316_v3 = vpack.c.bf16 (!%p189_p2), %v261_v1, %v260_v0  ;;  %p217_p3 = scmp.lt.s32.totalorder (!%p189_p2), %s1054_s24, 63  ;;  %v624_v4 = vld [vmem:[%s1685_s3 + $0x8] sm:$0xff] (!%p189_p2)  ;;  %v626_v6 = vld [vmem:[%s1685_s3 + $0x18] sm:$0xff] (!%p189_p2)  ;;  %vm960_vm2 = vcmask (!%p189_p2), 261120  }
   0x7   : > { %v1320_v7 = vpack.c.bf16 (!%p189_p2), %v624_v4, %v623_v2  ;;  %v1324_v8 = vpack.c.bf16 (!%p189_p2), %v626_v6, %v625_v5  ;;  %v627_v9 = vld [vmem:[%s1685_s3 + $0x20] sm:$0xff] (!%p189_p2)  ;;  %v628_v10 = vld [vmem:[%s1685_s3 + $0x28] sm:$0xff] (!%p189_p2)  ;;  %v629_v44 = vld [vmem:[%s1685_s3 + $0x30] sm:$0xff] (!%p189_p2) }
   0x8   : > { %1317 = vmatprep.subr.bf16.mxu0 (!%p189_p2), %v1316_v3  ;;  %v1328_v14 = vpack.c.bf16 (!%p189_p2), %v628_v10, %v627_v9  ;;  %v630_v45 = vld [vmem:[%s1685_s3 + $0x38] sm:$0xff] (!%p189_p2)  ;;  %v1505_v47 = vld [vmem:[%s1684_s2] ss:$0 sm:$0xff] (!%p189_p2) }
   0x9   : > { %1319 = vmatpush3.bf16.msra.mxu0 (!%p189_p2), %v1316_v3  ;;  %1336 = vmatprep.subr.bf16.mxu1 (!%p189_p2), %v1320_v7  ;;  %v1332_v46 = vpack.c.bf16 (!%p189_p2), %v630_v45, %v629_v44 }
   0xa   : > { %1321 = vmatprep.subr.bf16.mxu0 (!%p189_p2), %v1320_v7  ;;  %1340 = vmatpush3.bf16.msra.mxu1 (!%p189_p2), %v1320_v7 }
   0xb   : > { %1337 = vmatprep.subr.bf16.mxu1 (!%p189_p2), %v1324_v8 }
   0xd   : > { %s1689_s24 = smov (!%p217_p3, %s1054_s24), 63 }
   0xe   : > { %s1055_s8 = sshll.u32 %s1689_s24, 3  ;;  %1341 = vmatpush3.bf16.msra.mxu1 %v1324_v8 }
   0xf   : > { %s1424_s11 = scalar_lea.vmem %s1682_s0, %s1055_s8  ;;  %1338 = vmatprep.subr.bf16.mxu1 %v1328_v14  ;;  %s1581_s28 = scalar_lea.vmem %s1687_s5, %s1055_s8 }
  0x10   : > { %v228_v11 = vld [vmem:[%s1424_s11] sm:$0xff]  ;;  %v229_v12 = vld [vmem:[%s1424_s11 + $0x8] sm:$0xff]  ;;  %v230_v13 = vld [vmem:[%s1424_s11 + $0x10] sm:$0xff] }
  0x11   : > { %1204 = vmatprep.mubr.msk.f32.mxu0 %vm269_vm0, %v228_v11  ;;  %v231_v15 = vld [vmem:[%s1424_s11 + $0x18] sm:$0xff]  ;;  %v232_v16 = vld [vmem:[%s1424_s11 + $0x20] sm:$0xff]  ;;  %v233_v17 = vld [vmem:[%s1424_s11 + $0x28] sm:$0xff] }
  0x12   : > { %1205 = vmatmul.mubr.msk.f32.vlgmr.msra.gmra.mrb[0].mxu0 %vm269_vm0, %v229_v12  ;;  %1342 = vmatpush3.bf16.msra.mxu1 %v1328_v14  ;;  %v234_v18 = vld [vmem:[%s1424_s11 + $0x30] sm:$0xff]  ;;  %v235_v19 = vld [vmem:[%s1424_s11 + $0x38] sm:$0xff]  ;;  %v236_v20 = vld [vmem:[%s1424_s11 + $0x40] sm:$0xff] }
  0x13   : > { %1207 = vmatprep.mubr.msk.f32.mxu0 %vm269_vm0, %v230_v13  ;;  %1323 = vmatpush3.bf16.msra.mxu0 %v1320_v7  ;;  %v237_v21 = vld [vmem:[%s1424_s11 + $0x48] sm:$0xff]  ;;  %v238_v22 = vld [vmem:[%s1424_s11 + $0x50] sm:$0xff]  ;;  %v239_v23 = vld [vmem:[%s1424_s11 + $0x58] sm:$0xff] }
  0x14   : > { %1325 = vmatprep.subr.bf16.mxu0 %v1324_v8  ;;  %v240_v24 = vld [vmem:[%s1424_s11 + $0x60] sm:$0xff]  ;;  %v241_v25 = vld [vmem:[%s1424_s11 + $0x68] sm:$0xff]  ;;  %v242_v26 = vld [vmem:[%s1424_s11 + $0x70] sm:$0xff]  ;;  %1339 = vmatprep.subr.bf16.mxu1 %v1332_v46 }
  0x15   : > { %v243_v27 = vld [vmem:[%s1424_s11 + $0x78] sm:$0xff]  ;;  %v244_v28 = vld [vmem:[%s1424_s11 + $0x80] sm:$0xff]  ;;  %v245_v29 = vld [vmem:[%s1424_s11 + $0x88] sm:$0xff] }
  0x16   : > { %1208 = vmatmul.mubr.msk.f32.gmra.mrb[2].mxu0 %vm269_vm0, %v231_v15  ;;  %v246_v30 = vld [vmem:[%s1424_s11 + $0x90] sm:$0xff]  ;;  %v247_v31 = vld [vmem:[%s1424_s11 + $0x98] sm:$0xff]  ;;  %v248_v32 = vld [vmem:[%s1424_s11 + $0xa0] sm:$0xff]  ;;  %1343 = vmatpush3.bf16.msra.mxu1 %v1332_v46 }
  0x17   : > { %1210 = vmatprep.mubr.msk.f32.mxu0 %vm269_vm0, %v232_v16  ;;  %1327 = vmatpush3.bf16.msra.mxu0 %v1324_v8  ;;  %v249_v33 = vld [vmem:[%s1424_s11 + $0xa8] sm:$0xff]  ;;  %v250_v34 = vld [vmem:[%s1424_s11 + $0xb0] sm:$0xff]  ;;  %v251_v35 = vld [vmem:[%s1424_s11 + $0xb8] sm:$0xff] }
  0x18   : > { %1329 = vmatprep.subr.bf16.mxu0 %v1328_v14  ;;  %v252_v36 = vld [vmem:[%s1424_s11 + $0xc0] sm:$0xff]  ;;  %v253_v37 = vld [vmem:[%s1424_s11 + $0xc8] sm:$0xff]  ;;  %v254_v38 = vld [vmem:[%s1424_s11 + $0xd0] sm:$0xff] }
  0x19   : > { %v255_v39 = vld [vmem:[%s1424_s11 + $0xd8] sm:$0xff]  ;;  %v256_v40 = vld [vmem:[%s1424_s11 + $0xe0] sm:$0xff]  ;;  %v257_v41 = vld [vmem:[%s1424_s11 + $0xe8] sm:$0xff] }
  0x1a   : > { %1211 = vmatmul.mubr.msk.f32.gmra.mrb[4].mxu0 %vm269_vm0, %v233_v17  ;;  %v258_v42 = vld [vmem:[%s1424_s11 + $0xf0] sm:$0xff]  ;;  %v259_v43 = vld [vmem:[%s1424_s11 + $0xf8] sm:$0xff] }
  0x1b   : > { %1213 = vmatprep.mubr.msk.f32.mxu0 %vm269_vm0, %v234_v18  ;;  %1331 = vmatpush3.bf16.msra.mxu0 %v1328_v14 }
  0x1c   : > { %1333 = vmatprep.subr.bf16.mxu0 %v1332_v46 }
  0x1e   : > { %1214 = vmatmul.mubr.msk.f32.gmra.mrb[6].mxu0 %vm269_vm0, %v235_v19 }
  0x1f   : > { %1216 = vmatprep.mubr.msk.f32.mxu0 %vm269_vm0, %v236_v20  ;;  %1335 = vmatpush3.bf16.msra.mxu0 %v1332_v46 }
  0x22   : > { %1217 = vmatmul.mubr.msk.f32.gmra.mrb[8].mxu0 %vm269_vm0, %v237_v21 }
  0x23   : > { %1219 = vmatprep.mubr.msk.f32.mxu0 %vm269_vm0, %v238_v22 }
  0x26   : > { %1220 = vmatmul.mubr.msk.f32.gmra.mrb[10].mxu0 %vm269_vm0, %v239_v23 }
  0x27   : > { %1222 = vmatprep.mubr.msk.f32.mxu0 %vm269_vm0, %v240_v24 }
  0x2a   : > { %1223 = vmatmul.mubr.msk.f32.gmra.mrb[12].mxu0 %vm269_vm0, %v241_v25 }
  0x2b   : > { %1225 = vmatprep.mubr.msk.f32.mxu0 %vm269_vm0, %v242_v26 }
  0x2e   : > { %1226 = vmatmul.mubr.msk.f32.gmra.mrb[14].mxu0 %vm269_vm0, %v243_v27 }
  0x2f   : > { %1228 = vmatprep.mubr.msk.f32.mxu0 %vm269_vm0, %v244_v28 }
  0x32   : > { %1229 = vmatmul.mubr.msk.f32.gmra.mrb[16].mxu0 %vm269_vm0, %v245_v29 }
  0x33   : > { %1231 = vmatprep.mubr.msk.f32.mxu0 %vm269_vm0, %v246_v30 }
  0x36   : > { %1232 = vmatmul.mubr.msk.f32.gmra.mrb[18].mxu0 %vm269_vm0, %v247_v31 }
  0x37   : > { %1234 = vmatprep.mubr.msk.f32.mxu0 %vm269_vm0, %v248_v32 }
  0x3a   : > { %1235 = vmatmul.mubr.msk.f32.gmra.mrb[20].mxu0 %vm269_vm0, %v249_v33 }
  0x3b   : > { %1237 = vmatprep.mubr.msk.f32.mxu0 %vm269_vm0, %v250_v34 }
  0x3e   : > { %1238 = vmatmul.mubr.msk.f32.gmra.mrb[22].mxu0 %vm269_vm0, %v251_v35 }
  0x3f   : > { %1240 = vmatprep.mubr.msk.f32.mxu0 %vm269_vm0, %v252_v36 }
  0x42   : > { %1241 = vmatmul.mubr.msk.f32.gmra.mrb[24].mxu0 %vm269_vm0, %v253_v37 }
  0x43   : > { %1243 = vmatprep.mubr.msk.f32.mxu0 %vm269_vm0, %v254_v38 }
  0x46   : > { %1244 = vmatmul.mubr.msk.f32.gmra.mrb[26].mxu0 %vm269_vm0, %v255_v39 }
  0x47   : > { %1246 = vmatprep.mubr.msk.f32.mxu0 %vm269_vm0, %v256_v40 }
  0x4a   : > { %1247 = vmatmul.mubr.msk.f32.gmra.mrb[28].mxu0 %vm269_vm0, %v257_v41 }
  0x4b   : > { %1249 = vmatprep.mubr.msk.f32.mxu0 %vm269_vm0, %v258_v42 }
  0x4e   : > { %1250 = vmatmul.mubr.msk.f32.gmra.mrb[30].mxu0 %vm269_vm0, %v259_v43 }
  0xe5   : > { %v1206_v48 = vpop.f32.mrb[0].mxu0 }
  0xe6   : > { %v438_v49 = vadd.f32 %v1206_v48, %v1505_v47  ;;  %v432_v50 = vpop.f32.mrb[1].mxu0 }
  0xe7   : > { %v433_v51 = vadd.f32 %v1505_v47, %v432_v50 }
  0xe8   : > { %v592_v54 = vmax.f32 %v438_v49, 0.0 }
  0xe9   : > { %v591_v52 = vmax.f32 %v433_v51, 0.0  ;;  %v1209_v53 = vpop.f32.mrb[2].mxu0 }
  0xea   : > { %v448_v55 = vadd.f32 %v1209_v53, %v1505_v47  ;;  %v442_v56 = vpop.f32.mrb[3].mxu0 }
  0xeb   : > { %v443_v57 = vadd.f32 %v1505_v47, %v442_v56  ;;  %1268 = vmatprep.mubr.msk.f32.mxu0 %vm638_vm1, %v591_v52 }
  0xec   : > { %1269 = vmatmul.mubr.msk.f32.vlgmr.msra.gmra.mrb[32].mxu0 %vm638_vm1, %v592_v54  ;;  %v594_v60 = vmax.f32 %v448_v55, 0.0 }
  0xed   : > { %v593_v58 = vmax.f32 %v443_v57, 0.0  ;;  %v1212_v59 = vpop.f32.mrb[4].mxu0 }
  0xee   : > { %v458_v61 = vadd.f32 %v1212_v59, %v1505_v47  ;;  %v452_v62 = vpop.f32.mrb[5].mxu0 }
  0xef   : > { %v453_v63 = vadd.f32 %v1505_v47, %v452_v62  ;;  %1271 = vmatprep.mubr.msk.f32.mxu1 %vm638_vm1, %v593_v58 }
  0xf0   : > { %1272 = vmatmul.mubr.msk.f32.vlgmr.msra.gmra.mrb[0].mxu1 %vm638_vm1, %v594_v60  ;;  %v596_v2 = vmax.f32 %v458_v61, 0.0 }
  0xf1   : > { %v595_v0 = vmax.f32 %v453_v63, 0.0  ;;  %v1215_v1 = vpop.f32.mrb[6].mxu0 }
  0xf2   : > { %v468_v3 = vadd.f32 %v1215_v1, %v1505_v47  ;;  %v462_v4 = vpop.f32.mrb[7].mxu0 }
  0xf3   : > { %v463_v5 = vadd.f32 %v1505_v47, %v462_v4  ;;  %1274 = vmatprep.mubr.msk.f32.mxu1 %vm638_vm1, %v595_v0 }
  0xf4   : > { %1275 = vmatmul.mubr.msk.f32.gmra.mrb[2].mxu1 %vm638_vm1, %v596_v2  ;;  %v598_v8 = vmax.f32 %v468_v3, 0.0 }
  0xf5   : > { %v597_v6 = vmax.f32 %v463_v5, 0.0  ;;  %v1218_v7 = vpop.f32.mrb[8].mxu0 }
  0xf6   : > { %v478_v9 = vadd.f32 %v1218_v7, %v1505_v47  ;;  %v472_v10 = vpop.f32.mrb[9].mxu0 }
  0xf7   : > { %v473_v11 = vadd.f32 %v1505_v47, %v472_v10  ;;  %1277 = vmatprep.mubr.msk.f32.mxu1 %vm638_vm1, %v597_v6 }
  0xf8   : > { %1278 = vmatmul.mubr.msk.f32.gmra.mrb[4].mxu1 %vm638_vm1, %v598_v8  ;;  %v600_v14 = vmax.f32 %v478_v9, 0.0 }
  0xf9   : > { %v599_v12 = vmax.f32 %v473_v11, 0.0  ;;  %v1221_v13 = vpop.f32.mrb[10].mxu0 }
  0xfa   : > { %v488_v15 = vadd.f32 %v1221_v13, %v1505_v47  ;;  %v482_v16 = vpop.f32.mrb[11].mxu0 }
  0xfb   : > { %v483_v17 = vadd.f32 %v1505_v47, %v482_v16  ;;  %1280 = vmatprep.mubr.msk.f32.mxu1 %vm638_vm1, %v599_v12 }
  0xfc   : > { %1281 = vmatmul.mubr.msk.f32.gmra.mrb[6].mxu1 %vm638_vm1, %v600_v14  ;;  %v602_v20 = vmax.f32 %v488_v15, 0.0 }
  0xfd   : > { %v601_v18 = vmax.f32 %v483_v17, 0.0  ;;  %v1224_v19 = vpop.f32.mrb[12].mxu0  ;;  %v1574_v17 = vld [vmem:[%s1686_s4] ss:$0 sm:$0xff] }
  0xfe   : > { %v498_v21 = vadd.f32 %v1224_v19, %v1505_v47  ;;  %v492_v22 = vpop.f32.mrb[13].mxu0 }
  0xff   : > { %v493_v23 = vadd.f32 %v1505_v47, %v492_v22  ;;  %1283 = vmatprep.mubr.msk.f32.mxu1 %vm638_vm1, %v601_v18 }
 0x100   : > { %1284 = vmatmul.mubr.msk.f32.gmra.mrb[8].mxu1 %vm638_vm1, %v602_v20  ;;  %v604_v26 = vmax.f32 %v498_v21, 0.0 }
 0x101   : > { %v603_v24 = vmax.f32 %v493_v23, 0.0  ;;  %v1227_v25 = vpop.f32.mrb[14].mxu0 }
 0x102   : > { %v508_v27 = vadd.f32 %v1227_v25, %v1505_v47  ;;  %v502_v28 = vpop.f32.mrb[15].mxu0 }
 0x103   : > { %v503_v29 = vadd.f32 %v1505_v47, %v502_v28  ;;  %1286 = vmatprep.mubr.msk.f32.mxu1 %vm638_vm1, %v603_v24 }
 0x104   : > { %1287 = vmatmul.mubr.msk.f32.gmra.mrb[10].mxu1 %vm638_vm1, %v604_v26  ;;  %v606_v32 = vmax.f32 %v508_v27, 0.0 }
 0x105   : > { %v605_v30 = vmax.f32 %v503_v29, 0.0  ;;  %v1230_v31 = vpop.f32.mrb[16].mxu0 }
 0x106   : > { %v518_v33 = vadd.f32 %v1230_v31, %v1505_v47  ;;  %v512_v34 = vpop.f32.mrb[17].mxu0 }
 0x107   : > { %v513_v35 = vadd.f32 %v1505_v47, %v512_v34  ;;  %1289 = vmatprep.mubr.msk.f32.mxu1 %vm638_vm1, %v605_v30 }
 0x108   : > { %1290 = vmatmul.mubr.msk.f32.gmra.mrb[12].mxu1 %vm638_vm1, %v606_v32  ;;  %v608_v38 = vmax.f32 %v518_v33, 0.0 }
 0x109   : > { %v607_v36 = vmax.f32 %v513_v35, 0.0  ;;  %v1233_v37 = vpop.f32.mrb[18].mxu0 }
 0x10a   : > { %v528_v39 = vadd.f32 %v1233_v37, %v1505_v47  ;;  %v522_v40 = vpop.f32.mrb[19].mxu0 }
 0x10b   : > { %v523_v41 = vadd.f32 %v1505_v47, %v522_v40  ;;  %1292 = vmatprep.mubr.msk.f32.mxu1 %vm638_vm1, %v607_v36 }
 0x10c   : > { %1293 = vmatmul.mubr.msk.f32.gmra.mrb[14].mxu1 %vm638_vm1, %v608_v38  ;;  %v610_v44 = vmax.f32 %v528_v39, 0.0 }
 0x10d   : > { %v609_v42 = vmax.f32 %v523_v41, 0.0  ;;  %v1236_v43 = vpop.f32.mrb[20].mxu0 }
 0x10e   : > { %v538_v45 = vadd.f32 %v1236_v43, %v1505_v47  ;;  %v532_v46 = vpop.f32.mrb[21].mxu0 }
 0x10f   : > { %v533_v48 = vadd.f32 %v1505_v47, %v532_v46  ;;  %1295 = vmatprep.mubr.msk.f32.mxu1 %vm638_vm1, %v609_v42 }
 0x110   : > { %1296 = vmatmul.mubr.msk.f32.gmra.mrb[16].mxu1 %vm638_vm1, %v610_v44  ;;  %v612_v51 = vmax.f32 %v538_v45, 0.0 }
 0x111   : > { %v611_v49 = vmax.f32 %v533_v48, 0.0  ;;  %v1239_v50 = vpop.f32.mrb[22].mxu0 }
 0x112   : > { %v548_v52 = vadd.f32 %v1239_v50, %v1505_v47  ;;  %v542_v53 = vpop.f32.mrb[23].mxu0 }
 0x113   : > { %v543_v54 = vadd.f32 %v1505_v47, %v542_v53  ;;  %1298 = vmatprep.mubr.msk.f32.mxu1 %vm638_vm1, %v611_v49 }
 0x114   : > { %1299 = vmatmul.mubr.msk.f32.gmra.mrb[18].mxu1 %vm638_vm1, %v612_v51  ;;  %v614_v57 = vmax.f32 %v548_v52, 0.0 }
 0x115   : > { %v613_v55 = vmax.f32 %v543_v54, 0.0  ;;  %v1242_v56 = vpop.f32.mrb[24].mxu0 }
 0x116   : > { %v558_v58 = vadd.f32 %v1242_v56, %v1505_v47  ;;  %v552_v59 = vpop.f32.mrb[25].mxu0 }
 0x117   : > { %v553_v60 = vadd.f32 %v1505_v47, %v552_v59  ;;  %1301 = vmatprep.mubr.msk.f32.mxu1 %vm638_vm1, %v613_v55 }
 0x118   : > { %1302 = vmatmul.mubr.msk.f32.gmra.mrb[20].mxu1 %vm638_vm1, %v614_v57  ;;  %v616_v63 = vmax.f32 %v558_v58, 0.0 }
 0x119   : > { %v615_v61 = vmax.f32 %v553_v60, 0.0  ;;  %v1245_v62 = vpop.f32.mrb[26].mxu0 }
 0x11a   : > { %v568_v0 = vadd.f32 %v1245_v62, %v1505_v47  ;;  %v562_v1 = vpop.f32.mrb[27].mxu0 }
 0x11b   : > { %v563_v2 = vadd.f32 %v1505_v47, %v562_v1  ;;  %1304 = vmatprep.mubr.msk.f32.mxu1 %vm638_vm1, %v615_v61 }
 0x11c   : > { %1305 = vmatmul.mubr.msk.f32.gmra.mrb[22].mxu1 %vm638_vm1, %v616_v63  ;;  %v618_v5 = vmax.f32 %v568_v0, 0.0 }
 0x11d   : > { %v617_v3 = vmax.f32 %v563_v2, 0.0  ;;  %v1248_v4 = vpop.f32.mrb[28].mxu0 }
 0x11e   : > { %v578_v6 = vadd.f32 %v1248_v4, %v1505_v47  ;;  %v572_v7 = vpop.f32.mrb[29].mxu0 }
 0x11f   : > { %v573_v8 = vadd.f32 %v1505_v47, %v572_v7  ;;  %1307 = vmatprep.mubr.msk.f32.mxu1 %vm638_vm1, %v617_v3 }
 0x120   : > { %1308 = vmatmul.mubr.msk.f32.gmra.mrb[24].mxu1 %vm638_vm1, %v618_v5  ;;  %v620_v11 = vmax.f32 %v578_v6, 0.0 }
 0x121   : > { %v619_v9 = vmax.f32 %v573_v8, 0.0  ;;  %v1251_v10 = vpop.f32.mrb[30].mxu0 }
 0x122   : > { %v588_v12 = vadd.f32 %v1251_v10, %v1505_v47  ;;  %v582_v13 = vpop.f32.mrb[31].mxu0 }
 0x123   : > { %v583_v14 = vadd.f32 %v1505_v47, %v582_v13  ;;  %1310 = vmatprep.mubr.msk.f32.mxu1 %vm638_vm1, %v619_v9 }
 0x124   : > { %1311 = vmatmul.mubr.msk.f32.gmra.mrb[26].mxu1 %vm638_vm1, %v620_v11  ;;  %v622_v16 = vmax.f32 %v588_v12, 0.0 }
 0x125   : > { %v621_v15 = vmax.f32 %v583_v14, 0.0 }
 0x127   : > { %1313 = vmatprep.mubr.msk.f32.mxu1 %vm638_vm1, %v621_v15 }
 0x128   : > { %1314 = vmatmul.mubr.msk.f32.gmra.mrb[28].mxu1 %vm638_vm1, %v622_v16 }
 0x1bf   : > { %v1270_v47 = vpop.f32.mrb[32].mxu0 }
 0x1c0   : > { %v807_v18 = vadd.f32 %v1270_v47, %v1574_v17  ;;  %v801_v19 = vpop.f32.mrb[33].mxu0 }
 0x1c1   : > { %v802_v20 = vadd.f32 %v1574_v17, %v801_v19 }
 0x1c2   : > { %962 = vst.msk [vmem:[%s1581_s28 + $0x8] sm:$0xff] %vm960_vm2, %v807_v18 }
 0x1c3   : > { %961 = vst.msk [vmem:[%s1581_s28] sm:$0xff] %vm960_vm2, %v802_v20  ;;  %v1273_v21 = vpop.f32.mrb[0].mxu1 }
 0x1c4   : > { %v817_v22 = vadd.f32 %v1273_v21, %v1574_v17  ;;  %v811_v23 = vpop.f32.mrb[1].mxu1 }
 0x1c5   : > { %v812_v24 = vadd.f32 %v1574_v17, %v811_v23 }
 0x1c6   : > { %964 = vst.msk [vmem:[%s1581_s28 + $0x18] sm:$0xff] %vm960_vm2, %v817_v22 }
 0x1c7   : > { %963 = vst.msk [vmem:[%s1581_s28 + $0x10] sm:$0xff] %vm960_vm2, %v812_v24  ;;  %v1276_v25 = vpop.f32.mrb[2].mxu1 }
 0x1c8   : > { %v827_v26 = vadd.f32 %v1276_v25, %v1574_v17  ;;  %v821_v27 = vpop.f32.mrb[3].mxu1 }
 0x1c9   : > { %v822_v28 = vadd.f32 %v1574_v17, %v821_v27 }
 0x1ca   : > { %966 = vst.msk [vmem:[%s1581_s28 + $0x28] sm:$0xff] %vm960_vm2, %v827_v26 }
 0x1cb   : > { %965 = vst.msk [vmem:[%s1581_s28 + $0x20] sm:$0xff] %vm960_vm2, %v822_v28  ;;  %v1279_v29 = vpop.f32.mrb[4].mxu1 }
 0x1cc   : > { %v837_v30 = vadd.f32 %v1279_v29, %v1574_v17  ;;  %v831_v31 = vpop.f32.mrb[5].mxu1 }
 0x1cd   : > { %v832_v32 = vadd.f32 %v1574_v17, %v831_v31 }
 0x1ce   : > { %968 = vst.msk [vmem:[%s1581_s28 + $0x38] sm:$0xff] %vm960_vm2, %v837_v30 }
 0x1cf   : > { %967 = vst.msk [vmem:[%s1581_s28 + $0x30] sm:$0xff] %vm960_vm2, %v832_v32  ;;  %v1282_v33 = vpop.f32.mrb[6].mxu1 }
 0x1d0   : > { %v847_v34 = vadd.f32 %v1282_v33, %v1574_v17  ;;  %v841_v35 = vpop.f32.mrb[7].mxu1 }
 0x1d1   : > { %v842_v36 = vadd.f32 %v1574_v17, %v841_v35 }
 0x1d2   : > { %970 = vst.msk [vmem:[%s1581_s28 + $0x48] sm:$0xff] %vm960_vm2, %v847_v34 }
 0x1d3   : > { %969 = vst.msk [vmem:[%s1581_s28 + $0x40] sm:$0xff] %vm960_vm2, %v842_v36  ;;  %v1285_v37 = vpop.f32.mrb[8].mxu1 }
 0x1d4   : > { %v857_v38 = vadd.f32 %v1285_v37, %v1574_v17  ;;  %v851_v39 = vpop.f32.mrb[9].mxu1 }
 0x1d5   : > { %v852_v40 = vadd.f32 %v1574_v17, %v851_v39 }
 0x1d6   : > { %972 = vst.msk [vmem:[%s1581_s28 + $0x58] sm:$0xff] %vm960_vm2, %v857_v38 }
 0x1d7   : > { %971 = vst.msk [vmem:[%s1581_s28 + $0x50] sm:$0xff] %vm960_vm2, %v852_v40  ;;  %v1288_v41 = vpop.f32.mrb[10].mxu1 }
 0x1d8   : > { %v867_v42 = vadd.f32 %v1288_v41, %v1574_v17  ;;  %v861_v43 = vpop.f32.mrb[11].mxu1 }
 0x1d9   : > { %v862_v44 = vadd.f32 %v1574_v17, %v861_v43 }
 0x1da   : > { %974 = vst.msk [vmem:[%s1581_s28 + $0x68] sm:$0xff] %vm960_vm2, %v867_v42 }
 0x1db   : > { %973 = vst.msk [vmem:[%s1581_s28 + $0x60] sm:$0xff] %vm960_vm2, %v862_v44  ;;  %v1291_v45 = vpop.f32.mrb[12].mxu1 }
 0x1dc   : > { %v877_v46 = vadd.f32 %v1291_v45, %v1574_v17  ;;  %v871_v48 = vpop.f32.mrb[13].mxu1 }
 0x1dd   : > { %v872_v49 = vadd.f32 %v1574_v17, %v871_v48 }
 0x1de   : > { %976 = vst.msk [vmem:[%s1581_s28 + $0x78] sm:$0xff] %vm960_vm2, %v877_v46 }
 0x1df   : > { %975 = vst.msk [vmem:[%s1581_s28 + $0x70] sm:$0xff] %vm960_vm2, %v872_v49  ;;  %v1294_v50 = vpop.f32.mrb[14].mxu1 }
 0x1e0   : > { %v887_v51 = vadd.f32 %v1294_v50, %v1574_v17  ;;  %v881_v52 = vpop.f32.mrb[15].mxu1 }
 0x1e1   : > { %v882_v53 = vadd.f32 %v1574_v17, %v881_v52 }
 0x1e2   : > { %978 = vst.msk [vmem:[%s1581_s28 + $0x88] sm:$0xff] %vm960_vm2, %v887_v51 }
 0x1e3   : > { %977 = vst.msk [vmem:[%s1581_s28 + $0x80] sm:$0xff] %vm960_vm2, %v882_v53  ;;  %v1297_v54 = vpop.f32.mrb[16].mxu1 }
 0x1e4   : > { %v897_v55 = vadd.f32 %v1297_v54, %v1574_v17  ;;  %v891_v56 = vpop.f32.mrb[17].mxu1 }
 0x1e5   : > { %v892_v57 = vadd.f32 %v1574_v17, %v891_v56 }
 0x1e6   : > { %980 = vst.msk [vmem:[%s1581_s28 + $0x98] sm:$0xff] %vm960_vm2, %v897_v55 }
 0x1e7   : > { %979 = vst.msk [vmem:[%s1581_s28 + $0x90] sm:$0xff] %vm960_vm2, %v892_v57  ;;  %v1300_v58 = vpop.f32.mrb[18].mxu1 }
 0x1e8   : > { %v907_v59 = vadd.f32 %v1300_v58, %v1574_v17  ;;  %v901_v60 = vpop.f32.mrb[19].mxu1 }
 0x1e9   : > { %v902_v61 = vadd.f32 %v1574_v17, %v901_v60 }
 0x1ea   : > { %982 = vst.msk [vmem:[%s1581_s28 + $0xa8] sm:$0xff] %vm960_vm2, %v907_v59 }
 0x1eb   : > { %981 = vst.msk [vmem:[%s1581_s28 + $0xa0] sm:$0xff] %vm960_vm2, %v902_v61  ;;  %v1303_v62 = vpop.f32.mrb[20].mxu1 }
 0x1ec   : > { %v917_v63 = vadd.f32 %v1303_v62, %v1574_v17  ;;  %v911_v0 = vpop.f32.mrb[21].mxu1 }
 0x1ed   : > { %v912_v1 = vadd.f32 %v1574_v17, %v911_v0 }
 0x1ee   : > { %984 = vst.msk [vmem:[%s1581_s28 + $0xb8] sm:$0xff] %vm960_vm2, %v917_v63 }
 0x1ef   : > { %983 = vst.msk [vmem:[%s1581_s28 + $0xb0] sm:$0xff] %vm960_vm2, %v912_v1  ;;  %v1306_v2 = vpop.f32.mrb[22].mxu1 }
 0x1f0   : > { %v927_v3 = vadd.f32 %v1306_v2, %v1574_v17  ;;  %v921_v4 = vpop.f32.mrb[23].mxu1 }
 0x1f1   : > { %v922_v5 = vadd.f32 %v1574_v17, %v921_v4 }
 0x1f2   : > { %986 = vst.msk [vmem:[%s1581_s28 + $0xc8] sm:$0xff] %vm960_vm2, %v927_v3 }
 0x1f3   : > { %985 = vst.msk [vmem:[%s1581_s28 + $0xc0] sm:$0xff] %vm960_vm2, %v922_v5  ;;  %v1309_v6 = vpop.f32.mrb[24].mxu1 }
 0x1f4   : > { %v937_v7 = vadd.f32 %v1309_v6, %v1574_v17  ;;  %v931_v8 = vpop.f32.mrb[25].mxu1 }
 0x1f5   : > { %v932_v9 = vadd.f32 %v1574_v17, %v931_v8 }
 0x1f6   : > { %988 = vst.msk [vmem:[%s1581_s28 + $0xd8] sm:$0xff] %vm960_vm2, %v937_v7 }
 0x1f7   : > { %987 = vst.msk [vmem:[%s1581_s28 + $0xd0] sm:$0xff] %vm960_vm2, %v932_v9  ;;  %v1312_v10 = vpop.f32.mrb[26].mxu1 }
 0x1f8   : > { %v947_v11 = vadd.f32 %v1312_v10, %v1574_v17  ;;  %v941_v12 = vpop.f32.mrb[27].mxu1 }
 0x1f9   : > { %v942_v13 = vadd.f32 %v1574_v17, %v941_v12 }
 0x1fa   : > { %990 = vst.msk [vmem:[%s1581_s28 + $0xe8] sm:$0xff] %vm960_vm2, %v947_v11 }
 0x1fb   : > { %989 = vst.msk [vmem:[%s1581_s28 + $0xe0] sm:$0xff] %vm960_vm2, %v942_v13  ;;  %v1315_v14 = vpop.f32.mrb[28].mxu1 }
 0x1fc   : > { %v957_v15 = vadd.f32 %v1315_v14, %v1574_v17  ;;  %v951_v16 = vpop.f32.mrb[29].mxu1 }
 0x1fd   : > { %v952_v47 = vadd.f32 %v1574_v17, %v951_v16 }
 0x1fe   : > { %992 = vst.msk [vmem:[%s1581_s28 + $0xf8] sm:$0xff] %vm960_vm2, %v957_v15 }
 0x1ff   : > { %991 = vst.msk [vmem:[%s1581_s28 + $0xf0] sm:$0xff] %vm960_vm2, %v952_v47 }
 0x200 PF: > { %s15_s18 = sadd.s32 1, %s1358_s18  }
 0x201   : > { %p12_p4 = scmp.ge.s32.totalorder %s15_s18, 4  }
 0x203   :  { %14 = sbr.rel (!%p12_p4) target bundleno = 1 (0x1), region = 70 }

// kernel: msgad_forward.4
= control target key start
LH: loop header
LB: loop body
LE: loop exit
PB: predicated region body
PF: predicated region fallthrough
CT: control target
= control target key end

     0   :  { %8 = vsyncpa [#allocation7], 0  ;;  %s2158_s12 = smov 0   ;;  %s2160_s13 = smov 0   ;;  %s3559_s0 = inlined_call_operand.vmem [shape: f32[5], index: 0, kind: input, shape index: {}]   ;;  %s3560_s1 = inlined_call_operand.vmem [shape: bf16[512,512], index: 1, kind: input, shape index: {}]   ;;  %s3561_s2 = inlined_call_operand.vmem [shape: f32[512,32], index: 2, kind: input, shape index: {}]   ;;  %s3562_s3 = inlined_call_operand.vmem [shape: f32[512,32], index: 3, kind: output, shape index: {}]  }
   0x1   :  { %s2162_s14 = smov 0   ;;  %s2164_s15 = smov 0  }
   0x2   :  { %s2166_s16 = smov 0   ;;  %s2168_s17 = smov 0  }
   0x3   :  { %s2170_s18 = smov 0   ;;  %s2172_s19 = smov 0  }
   0x4   :  { %s2174_s20 = smov 0  }
   0x5 LB: > { %s1857_s21 = sadd.s32 4294967295, %s2133_s20   ;;  %s26_s22 = sadd.s32 1, %s2121_s17  ;;  %s2133_s20 = sphi %s2174_s20, %s14_s20   ;;  %s2129_s19 = sphi %s2172_s19, %s3573_s19   ;;  %s2125_s18 = sphi %s2170_s18, %s3572_s18   ;;  %s2121_s17 = sphi %s2168_s17, %s3571_s17   ;;  %s2117_s16 = sphi %s2166_s16, %s3570_s16   ;;  %s2113_s15 = sphi %s2164_s15, %s3569_s15   ;;  %s2109_s14 = sphi %s2162_s14, %s3568_s14   ;;  %s2105_s13 = sphi %s2160_s13, %s3567_s13   ;;  %s2101_s12 = sphi %s2158_s12, %s3566_s12  }
   0x6   : > { %p27_p0 = scmp.ge.s32.totalorder %s26_s22, 2  ;;  %s29_s23 = sadd.s32 1, %s2125_s18 }
   0x7   : > { %s33_s24 = sadd.s32 1, %s2129_s19  ;;  %s63_s25 = sadd.s32 1, %s2105_s13 }
   0x8   : > { %s3575_s22 = smov (%p27_p0, %s26_s22), 0  ;;  %s3577_s23 = smov (!%p27_p0, %s29_s23), %s2125_s18 }
   0x9   : > { %s59_s26 = ssub.s32 %s2121_s17, %s3575_s22  ;;  %p70_p1 = scmp.ne.s32.totalorder %s2105_s13, %s2101_s12 }
   0xa   : > { %p31_p2 = scmp.ge.s32.totalorder %s3577_s23, 2  ;;  %p71_p3 = scmp.eq.s32.totalorder %s2133_s20, 0 }
   0xb   : > { %p1859_p4 = scmp.ge.s32.totalorder %s2133_s20, 1  ;;  %p134_p5 = scmp.lt.s32.totalorder %s2133_s20, 17 }
   0xc   : > { %s3579_s23 = smov (%p31_p2, %s3577_s23), 0  ;;  %s3581_s24 = smov (!%p31_p2, %s33_s24), %s2129_s19 }
   0xd   : > { %s58_s27 = ssub.s32 %s2125_s18, %s3579_s23  ;;  %p2223_p6 = por %p71_p3, %p70_p1 }
   0xe   : > { %p35_p7 = scmp.ge.s32.totalorder %s3581_s24, 4  ;;  %s60_s29 = sor.u32 %s59_s26, %s58_s27 }
   0xf   : > { %p61_p8 = scmp.eq.s32.totalorder %s60_s29, 0  ;;  %p2227_p9 = pnand %p1859_p4, %p134_p5 }
  0x10   : > { %s3583_s24 = smov (%p35_p7, %s3581_s24), 0  ;;  %p2238_p11 = scmp.eq.s32.totalorder %s1857_s21, 0 }
  0x11   : > { %s2234_s4 = scalar_select %p61_p8, %s2105_s13, %s63_s25  }
  0x12   : > { %p1963_p10 = pneg %p2227_p9  ;;  %s147_s8 = sshll.u32 %s3559_s0, 4  ;;  %s148_s8 = int_to_ptr.vmem [resolvable:$true] %s147_s8 }
  0x13   : > { %s2044_s9 = scalar_lea.vmem %s148_s8, 16  ;;  %p2052_p3 = scmp.lt.s32.totalorder %s148_s8, %s148_s8 }
  0x14   : > { %p1964_p12 = pnand %p2238_p11, %p1963_p10  ;;  %p2045_p13 = scmp.ne.s32.totalorder %s148_s8, %s2044_s9 }
  0x15   : > { %p2053_p4 = scmp.lt.s32.totalorder %s2044_s9, %s2044_s9 }
  0x16   : > { %p2046_p0 = pneg %p1964_p12 }
  0x17   : > { %p2054_p5 = por %p2053_p4, %p2052_p3 }
  0x18   : > { %p2047_p1 = pnand %p2046_p0, %p2045_p13 }
  0x1a   : > { %p2048_p2 = pneg %p2047_p1 }
  0x1c   : > { %p2055_p7 = pnand %p2054_p5, %p2048_p2 }
  0x1e   : > { %2058 = shalt.err (!%p2055_p7)
}
  0x1f   : > { %s2135_s10 = smov [#allocation6]   ;;  %p1861_p8 = scmp.ge.s32.totalorder %s2133_s20, 16 }
  0x20   : > { %1966 = dma.vmem_to_smem (!%p1964_p12), %s148_s8, 16, %s2135_s10, [#allocation7]  }
  0x21   : > { %157 = sbr.rel (%p1861_p8) target bundleno = 63 (0x3f), region = 24 }
  0x28   : > { %160 = sbr.rel (!%p2223_p6) target bundleno = 63 (0x3f), region = 28  ;;  %s162_s11 = sand.u32 (%p2223_p6), 1, %s2105_s13  }
  0x29   : > { %s1864_s21 = sshll.u32 (%p2223_p6), %s2121_s17, 1  ;;  %s1862_s25 = sshll.u32 (%p2223_p6), %s162_s11, 8 }
  0x2a   : > { %s1878_s26 = sshll.u32 (%p2223_p6), %s2125_s18, 7  ;;  %s2261_s28 = scalar_lea.vmem (%p2223_p6), [#allocation8], %s1862_s25 }
  0x2b   : > { %s168_s27 = sadd.s32 (%p2223_p6), %s1878_s26, %s1864_s21 }
  0x2c   : > { %s1866_s29 = sshll.u32 (%p2223_p6), %s168_s27, 2 }
  0x2d   : > { %s2256_s9 = scalar_lea.vmem (%p2223_p6), %s3560_s1, %s1866_s29 }
  0x2e   : > { %v260_v0 = vld [vmem:[%s2256_s9] sm:$0xff] (%p2223_p6)  ;;  %v262_v1 = vld [vmem:[%s2256_s9 + $0x10] sm:$0xff] (%p2223_p6) }
  0x2f   : > { %v264_v2 = vld [vmem:[%s2256_s9 + $0x20] sm:$0xff]  ;;  %261 = vst [vmem:[%s2261_s28] sm:$0xff] %v260_v0  ;;  %263 = vst [vmem:[%s2261_s28 + $0x8] sm:$0xff] %v262_v1  ;;  %v266_v3 = vld [vmem:[%s2256_s9 + $0x30] sm:$0xff] }
  0x30   : > { %265 = vst [vmem:[%s2261_s28 + $0x10] sm:$0xff] %v264_v2  ;;  %v268_v4 = vld [vmem:[%s2256_s9 + $0x40] sm:$0xff]  ;;  %v270_v5 = vld [vmem:[%s2256_s9 + $0x50] sm:$0xff]  ;;  %267 = vst [vmem:[%s2261_s28 + $0x18] sm:$0xff] %v266_v3 }
  0x31   : > { %269 = vst [vmem:[%s2261_s28 + $0x20] sm:$0xff] %v268_v4  ;;  %271 = vst [vmem:[%s2261_s28 + $0x28] sm:$0xff] %v270_v5  ;;  %v272_v6 = vld [vmem:[%s2256_s9 + $0x60] sm:$0xff]  ;;  %v274_v7 = vld [vmem:[%s2256_s9 + $0x70] sm:$0xff] }
  0x32   : > { %v276_v8 = vld [vmem:[%s2256_s9 + $0x80] sm:$0xff]  ;;  %273 = vst [vmem:[%s2261_s28 + $0x30] sm:$0xff] %v272_v6  ;;  %275 = vst [vmem:[%s2261_s28 + $0x38] sm:$0xff] %v274_v7  ;;  %v278_v9 = vld [vmem:[%s2256_s9 + $0x90] sm:$0xff] }
  0x33   : > { %277 = vst [vmem:[%s2261_s28 + $0x40] sm:$0xff] %v276_v8  ;;  %v280_v10 = vld [vmem:[%s2256_s9 + $0xa0] sm:$0xff]  ;;  %v282_v11 = vld [vmem:[%s2256_s9 + $0xb0] sm:$0xff]  ;;  %279 = vst [vmem:[%s2261_s28 + $0x48] sm:$0xff] %v278_v9 }
  0x34   : > { %281 = vst [vmem:[%s2261_s28 + $0x50] sm:$0xff] %v280_v10  ;;  %283 = vst [vmem:[%s2261_s28 + $0x58] sm:$0xff] %v282_v11  ;;  %v284_v12 = vld [vmem:[%s2256_s9 + $0xc0] sm:$0xff]  ;;  %v286_v13 = vld [vmem:[%s2256_s9 + $0xd0] sm:$0xff] }
  0x35   : > { %v288_v14 = vld [vmem:[%s2256_s9 + $0xe0] sm:$0xff]  ;;  %285 = vst [vmem:[%s2261_s28 + $0x60] sm:$0xff] %v284_v12  ;;  %287 = vst [vmem:[%s2261_s28 + $0x68] sm:$0xff] %v286_v13  ;;  %v290_v15 = vld [vmem:[%s2256_s9 + $0xf0] sm:$0xff] }
  0x36   : > { %289 = vst [vmem:[%s2261_s28 + $0x70] sm:$0xff] %v288_v14  ;;  %v292_v16 = vld [vmem:[%s2256_s9 + $0x100] sm:$0xff]  ;;  %v294_v17 = vld [vmem:[%s2256_s9 + $0x110] sm:$0xff]  ;;  %291 = vst [vmem:[%s2261_s28 + $0x78] sm:$0xff] %v290_v15 }
  0x37   : > { %293 = vst [vmem:[%s2261_s28 + $0x80] sm:$0xff] %v292_v16  ;;  %295 = vst [vmem:[%s2261_s28 + $0x88] sm:$0xff] %v294_v17  ;;  %v296_v18 = vld [vmem:[%s2256_s9 + $0x120] sm:$0xff]  ;;  %v298_v19 = vld [vmem:[%s2256_s9 + $0x130] sm:$0xff] }
  0x38   : > { %v300_v20 = vld [vmem:[%s2256_s9 + $0x140] sm:$0xff]  ;;  %297 = vst [vmem:[%s2261_s28 + $0x90] sm:$0xff] %v296_v18  ;;  %299 = vst [vmem:[%s2261_s28 + $0x98] sm:$0xff] %v298_v19  ;;  %v302_v21 = vld [vmem:[%s2256_s9 + $0x150] sm:$0xff] }
  0x39   : > { %301 = vst [vmem:[%s2261_s28 + $0xa0] sm:$0xff] %v300_v20  ;;  %v304_v22 = vld [vmem:[%s2256_s9 + $0x160] sm:$0xff]  ;;  %v306_v23 = vld [vmem:[%s2256_s9 + $0x170] sm:$0xff]  ;;  %303 = vst [vmem:[%s2261_s28 + $0xa8] sm:$0xff] %v302_v21 }
  0x3a   : > { %305 = vst [vmem:[%s2261_s28 + $0xb0] sm:$0xff] %v304_v22  ;;  %307 = vst [vmem:[%s2261_s28 + $0xb8] sm:$0xff] %v306_v23  ;;  %v308_v24 = vld [vmem:[%s2256_s9 + $0x180] sm:$0xff]  ;;  %v310_v25 = vld [vmem:[%s2256_s9 + $0x190] sm:$0xff] }
  0x3b   : > { %v312_v26 = vld [vmem:[%s2256_s9 + $0x1a0] sm:$0xff]  ;;  %309 = vst [vmem:[%s2261_s28 + $0xc0] sm:$0xff] %v308_v24  ;;  %311 = vst [vmem:[%s2261_s28 + $0xc8] sm:$0xff] %v310_v25  ;;  %v314_v27 = vld [vmem:[%s2256_s9 + $0x1b0] sm:$0xff] }
  0x3c   : > { %313 = vst [vmem:[%s2261_s28 + $0xd0] sm:$0xff] %v312_v26  ;;  %v316_v28 = vld [vmem:[%s2256_s9 + $0x1c0] sm:$0xff]  ;;  %v318_v29 = vld [vmem:[%s2256_s9 + $0x1d0] sm:$0xff]  ;;  %315 = vst [vmem:[%s2261_s28 + $0xd8] sm:$0xff] %v314_v27 }
  0x3d   : > { %317 = vst [vmem:[%s2261_s28 + $0xe0] sm:$0xff] %v316_v28  ;;  %319 = vst [vmem:[%s2261_s28 + $0xe8] sm:$0xff] %v318_v29  ;;  %v320_v30 = vld [vmem:[%s2256_s9 + $0x1e0] sm:$0xff]  ;;  %v322_v31 = vld [vmem:[%s2256_s9 + $0x1f0] sm:$0xff] }
  0x3e   : > { %321 = vst [vmem:[%s2261_s28 + $0xf0] sm:$0xff] %v320_v30  ;;  %323 = vst [vmem:[%s2261_s28 + $0xf8] sm:$0xff] %v322_v31 }
  0x3f PF: > { %332 = sbr.rel (%p2227_p9) target bundleno = 608 (0x260), region = 66 }
  0x46   : > { %2096 = dma.done.wait (%p2238_p11), [#allocation7], 16  }
  0x47   : > { %2098 = vsyncadd (%p2238_p11), [#allocation7], 4294967280  ;;  %s339_s8 = sand.u32 1, %s2101_s12  }
  0x48   : > { %s1869_s10 = sshll.u32 %s339_s8, 8 }
  0x49   : > { %s2331_s11 = scalar_lea.vmem [#allocation8], %s1869_s10 }
  0x4a   : > { %345 = sfence }
  0x4b   : > { %s1870_s30 = sshll.u32 %s2113_s15, 5  ;;  %p371_p6 = scmp.eq.s32.totalorder %s2117_s16, 0 }
  0x4c   : > { %p366_p9 = scmp.lt.s32.totalorder %s1870_s30, 63  ;;  %p372_p10 = scmp.eq.s32.totalorder %s2113_s15, 0 }
  0x4d   : > { %p375_p11 = scmp.eq.s32.totalorder %s2109_s14, 0 }
  0x4e   : > { %s3585_s30 = smov (!%p366_p9, %s1870_s30), 63  ;;  %p373_p12 = pnand %p372_p10, %p371_p6 }
  0x4f   : > { %s1871_s5 = sshll.u32 %s3585_s30, 3 }
  0x50   : > { %s2342_s25 = scalar_lea.vmem %s3562_s3, %s1871_s5  ;;  %p374_p13 = pneg %p373_p12 }
  0x52   : > { %p376_p0 = pnand %p375_p11, %p374_p13 }
  0x53   : > { %v380_v32 = vld [vmem:[%s3561_s2] sm:$0xff] (!%p376_p0)  ;;  %vm444_vm0 = vcmask (!%p376_p0), 261120   ;;  %v381_v33 = vld [vmem:[%s3561_s2 + $0x8] sm:$0xff] (!%p376_p0)  ;;  %v382_v34 = vld [vmem:[%s3561_s2 + $0x10] sm:$0xff] (!%p376_p0)  ;;  %s2355_s28 = sld [smem:[#allocation6]] (!%p376_p0) }
  0x54   : > { %379 = sbr.rel (%p376_p0) target bundleno = 148 (0x94), region = 78  ;;  %445 = vst.msk [vmem:[#allocation2] sm:$0xff] (!%p376_p0), %vm444_vm0, %v380_v32  ;;  %446 = vst.msk [vmem:[#allocation2 + $0x8] sm:$0xff] (!%p376_p0), %vm444_vm0, %v381_v33  ;;  %v383_v35 = vld [vmem:[%s3561_s2 + $0x18] sm:$0xff] (!%p376_p0)  ;;  %v384_v36 = vld [vmem:[%s3561_s2 + $0x20] sm:$0xff] (!%p376_p0) }
  0x55   : > { %447 = vst.msk [vmem:[#allocation2 + $0x10] sm:$0xff] (!%p376_p0), %vm444_vm0, %v382_v34  ;;  %v385_v37 = vld [vmem:[%s3561_s2 + $0x28] sm:$0xff] (!%p376_p0)  ;;  %448 = vst.msk [vmem:[#allocation2 + $0x18] sm:$0xff] (!%p376_p0), %vm444_vm0, %v383_v35  ;;  %v386_v38 = vld [vmem:[%s3561_s2 + $0x30] sm:$0xff] (!%p376_p0) }
  0x56   : > { %449 = vst.msk [vmem:[#allocation2 + $0x20] sm:$0xff] (!%p376_p0), %vm444_vm0, %v384_v36  ;;  %450 = vst.msk [vmem:[#allocation2 + $0x28] sm:$0xff] (!%p376_p0), %vm444_vm0, %v385_v37  ;;  %v387_v39 = vld [vmem:[%s3561_s2 + $0x38] sm:$0xff] (!%p376_p0)  ;;  %v388_v40 = vld [vmem:[%s3561_s2 + $0x40] sm:$0xff] (!%p376_p0) }
  0x57   : > { %451 = vst.msk [vmem:[#allocation2 + $0x30] sm:$0xff] (!%p376_p0), %vm444_vm0, %v386_v38  ;;  %452 = vst.msk [vmem:[#allocation2 + $0x38] sm:$0xff] (!%p376_p0), %vm444_vm0, %v387_v39  ;;  %v389_v41 = vld [vmem:[%s3561_s2 + $0x48] sm:$0xff] (!%p376_p0)  ;;  %v390_v42 = vld [vmem:[%s3561_s2 + $0x50] sm:$0xff] (!%p376_p0) }
  0x58   : > { %453 = vst.msk [vmem:[#allocation2 + $0x40] sm:$0xff] (!%p376_p0), %vm444_vm0, %v388_v40  ;;  %v391_v43 = vld [vmem:[%s3561_s2 + $0x58] sm:$0xff] (!%p376_p0)  ;;  %454 = vst.msk [vmem:[#allocation2 + $0x48] sm:$0xff] (!%p376_p0), %vm444_vm0, %v389_v41  ;;  %v392_v44 = vld [vmem:[%s3561_s2 + $0x60] sm:$0xff] (!%p376_p0) }
  0x59   : > { %455 = vst.msk [vmem:[#allocation2 + $0x50] sm:$0xff] (!%p376_p0), %vm444_vm0, %v390_v42  ;;  %456 = vst.msk [vmem:[#allocation2 + $0x58] sm:$0xff] (!%p376_p0), %vm444_vm0, %v391_v43  ;;  %v393_v45 = vld [vmem:[%s3561_s2 + $0x68] sm:$0xff] (!%p376_p0)  ;;  %v394_v46 = vld [vmem:[%s3561_s2 + $0x70] sm:$0xff] (!%p376_p0)  ;;  %v2442_v53 = vstv (!%p376_p0), %s2355_s28 }
  0x5a   : > { %457 = vst.msk [vmem:[#allocation2 + $0x60] sm:$0xff] (!%p376_p0), %vm444_vm0, %v392_v44  ;;  %458 = vst.msk [vmem:[#allocation2 + $0x68] sm:$0xff] (!%p376_p0), %vm444_vm0, %v393_v45  ;;  %v395_v47 = vld [vmem:[%s3561_s2 + $0x78] sm:$0xff] (!%p376_p0)  ;;  %v2414_v48 = vld [vmem:[%s3561_s2 + $0x80] sm:$0xff] (!%p376_p0)  ;;  %v575_v57 = vmul.f32 (!%p376_p0), %v2442_v53, %v380_v32  ;;  %v576_v58 = vmul.f32 (!%p376_p0), %v2442_v53, %v381_v33  ;;  %v577_v59 = vmul.f32 (!%p376_p0), %v2442_v53, %v382_v34 }
  0x5b   : > { %459 = vst.msk [vmem:[#allocation2 + $0x70] sm:$0xff] %vm444_vm0, %v394_v46  ;;  %v2419_v49 = vld [vmem:[%s3561_s2 + $0x88] sm:$0xff]  ;;  %460 = vst.msk [vmem:[#allocation2 + $0x78] sm:$0xff] %vm444_vm0, %v395_v47  ;;  %v2429_v50 = vld [vmem:[%s3561_s2 + $0x90] sm:$0xff]  ;;  %v578_v60 = vmul.f32 %v2442_v53, %v383_v35  ;;  %v579_v0 = vmul.f32 %v2442_v53, %v384_v36  ;;  %v580_v1 = vmul.f32 %v2442_v53, %v385_v37 }
  0x5c   : > { %461 = vst.msk [vmem:[#allocation2 + $0x80] sm:$0xff] %vm444_vm0, %v2414_v48  ;;  %462 = vst.msk [vmem:[#allocation2 + $0x88] sm:$0xff] %vm444_vm0, %v2419_v49  ;;  %v2434_v51 = vld [vmem:[%s3561_s2 + $0x98] sm:$0xff]  ;;  %v2439_v52 = vld [vmem:[%s3561_s2 + $0xa0] sm:$0xff]  ;;  %v581_v2 = vmul.f32 %v2442_v53, %v386_v38  ;;  %v582_v3 = vmul.f32 %v2442_v53, %v387_v39  ;;  %v583_v7 = vmul.f32 %v2442_v53, %v388_v40 }
  0x5d   : > { %463 = vst.msk [vmem:[#allocation2 + $0x90] sm:$0xff] %vm444_vm0, %v2429_v50  ;;  %464 = vst.msk [vmem:[#allocation2 + $0x98] sm:$0xff] %vm444_vm0, %v2434_v51  ;;  %v2453_v54 = vld [vmem:[%s3561_s2 + $0xa8] sm:$0xff]  ;;  %v2458_v55 = vld [vmem:[%s3561_s2 + $0xb0] sm:$0xff]  ;;  %v584_v8 = vmul.f32 %v2442_v53, %v389_v41  ;;  %v585_v9 = vmul.f32 %v2442_v53, %v390_v42  ;;  %v586_v10 = vmul.f32 %v2442_v53, %v391_v43 }
  0x5e   : > { %465 = vst.msk [vmem:[#allocation2 + $0xa0] sm:$0xff] %vm444_vm0, %v2439_v52  ;;  %v2463_v56 = vld [vmem:[%s3561_s2 + $0xb8] sm:$0xff]  ;;  %466 = vst.msk [vmem:[#allocation2 + $0xa8] sm:$0xff] %vm444_vm0, %v2453_v54  ;;  %v2478_v61 = vld [vmem:[%s3561_s2 + $0xc0] sm:$0xff]  ;;  %v587_v14 = vmul.f32 %v2442_v53, %v392_v44  ;;  %v588_v15 = vmul.f32 %v2442_v53, %v393_v45  ;;  %v589_v16 = vmul.f32 %v2442_v53, %v394_v46 }
  0x5f   : > { %467 = vst.msk [vmem:[#allocation2 + $0xb0] sm:$0xff] %vm444_vm0, %v2458_v55  ;;  %468 = vst.msk [vmem:[#allocation2 + $0xb8] sm:$0xff] %vm444_vm0, %v2463_v56  ;;  %v2483_v62 = vld [vmem:[%s3561_s2 + $0xc8] sm:$0xff]  ;;  %v2488_v63 = vld [vmem:[%s3561_s2 + $0xd0] sm:$0xff]  ;;  %v590_v17 = vmul.f32 %v2442_v53, %v395_v47  ;;  %v591_v21 = vmul.f32 %v2442_v53, %v2414_v48  ;;  %v592_v22 = vmul.f32 %v2442_v53, %v2419_v49 }
  0x60   : > { %469 = vst.msk [vmem:[#allocation2 + $0xc0] sm:$0xff] %vm444_vm0, %v2478_v61  ;;  %470 = vst.msk [vmem:[#allocation2 + $0xc8] sm:$0xff] %vm444_vm0, %v2483_v62  ;;  %v2503_v4 = vld [vmem:[%s3561_s2 + $0xd8] sm:$0xff]  ;;  %v2508_v5 = vld [vmem:[%s3561_s2 + $0xe0] sm:$0xff]  ;;  %v593_v23 = vmul.f32 %v2442_v53, %v2429_v50  ;;  %v594_v24 = vmul.f32 %v2442_v53, %v2434_v51  ;;  %v595_v28 = vmul.f32 %v2442_v53, %v2439_v52 }
  0x61   : > { %471 = vst.msk [vmem:[#allocation2 + $0xd0] sm:$0xff] %vm444_vm0, %v2488_v63  ;;  %v2513_v6 = vld [vmem:[%s3561_s2 + $0xe8] sm:$0xff]  ;;  %639 = vst.msk [vmem:[#allocation5] sm:$0xff] %vm444_vm0, %v575_v57  ;;  %v2532_v11 = vld [vmem:[%s3561_s2 + $0xf0] sm:$0xff]  ;;  %v596_v29 = vmul.f32 %v2442_v53, %v2453_v54  ;;  %v597_v30 = vmul.f32 %v2442_v53, %v2458_v55  ;;  %v598_v31 = vmul.f32 %v2442_v53, %v2463_v56 }
  0x62   : > { %640 = vst.msk [vmem:[#allocation5 + $0x8] sm:$0xff] %vm444_vm0, %v576_v58  ;;  %641 = vst.msk [vmem:[#allocation5 + $0x10] sm:$0xff] %vm444_vm0, %v577_v59  ;;  %v2537_v12 = vld [vmem:[%s3561_s2 + $0xf8] sm:$0xff]  ;;  %v2542_v13 = vld [vmem:[%s3561_s2 + $0x100] sm:$0xff]  ;;  %v599_v35 = vmul.f32 %v2442_v53, %v2478_v61  ;;  %v600_v36 = vmul.f32 %v2442_v53, %v2483_v62  ;;  %v601_v37 = vmul.f32 %v2442_v53, %v2488_v63 }
  0x63   : > { %642 = vst.msk [vmem:[#allocation5 + $0x18] sm:$0xff] %vm444_vm0, %v578_v60  ;;  %472 = vst.msk [vmem:[#allocation2 + $0xd8] sm:$0xff] %vm444_vm0, %v2503_v4  ;;  %v2561_v18 = vld [vmem:[%s3561_s2 + $0x108] sm:$0xff]  ;;  %v2566_v19 = vld [vmem:[%s3561_s2 + $0x110] sm:$0xff]  ;;  %v602_v38 = vmul.f32 %v2442_v53, %v2503_v4  ;;  %v603_v42 = vmul.f32 %v2442_v53, %v2508_v5  ;;  %v604_v43 = vmul.f32 %v2442_v53, %v2513_v6 }
  0x64   : > { %473 = vst.msk [vmem:[#allocation2 + $0xe0] sm:$0xff] %vm444_vm0, %v2508_v5  ;;  %474 = vst.msk [vmem:[#allocation2 + $0xe8] sm:$0xff] %vm444_vm0, %v2513_v6  ;;  %v2571_v20 = vld [vmem:[%s3561_s2 + $0x118] sm:$0xff]  ;;  %v2594_v25 = vld [vmem:[%s3561_s2 + $0x120] sm:$0xff]  ;;  %v605_v44 = vmul.f32 %v2442_v53, %v2532_v11  ;;  %v606_v45 = vmul.f32 %v2442_v53, %v2537_v12  ;;  %v607_v49 = vmul.f32 %v2442_v53, %v2542_v13 }
  0x65   : > { %643 = vst.msk [vmem:[#allocation5 + $0x20] sm:$0xff] %vm444_vm0, %v579_v0  ;;  %644 = vst.msk [vmem:[#allocation5 + $0x28] sm:$0xff] %vm444_vm0, %v580_v1  ;;  %v2599_v26 = vld [vmem:[%s3561_s2 + $0x128] sm:$0xff]  ;;  %v2604_v27 = vld [vmem:[%s3561_s2 + $0x130] sm:$0xff]  ;;  %v608_v50 = vmul.f32 %v2442_v53, %v2561_v18  ;;  %v609_v51 = vmul.f32 %v2442_v53, %v2566_v19  ;;  %v610_v52 = vmul.f32 %v2442_v53, %v2571_v20 }
  0x66   : > { %645 = vst.msk [vmem:[#allocation5 + $0x30] sm:$0xff] %vm444_vm0, %v581_v2  ;;  %646 = vst.msk [vmem:[#allocation5 + $0x38] sm:$0xff] %vm444_vm0, %v582_v3  ;;  %v419_v32 = vld [vmem:[%s3561_s2 + $0x138] sm:$0xff]  ;;  %v420_v33 = vld [vmem:[%s3561_s2 + $0x140] sm:$0xff]  ;;  %v611_v57 = vmul.f32 %v2442_v53, %v2594_v25  ;;  %v612_v58 = vmul.f32 %v2442_v53, %v2599_v26  ;;  %v613_v59 = vmul.f32 %v2442_v53, %v2604_v27 }
  0x67   : > { %475 = vst.msk [vmem:[#allocation2 + $0xf0] sm:$0xff] %vm444_vm0, %v2532_v11  ;;  %476 = vst.msk [vmem:[#allocation2 + $0xf8] sm:$0xff] %vm444_vm0, %v2537_v12  ;;  %v421_v34 = vld [vmem:[%s3561_s2 + $0x148] sm:$0xff]  ;;  %v422_v39 = vld [vmem:[%s3561_s2 + $0x150] sm:$0xff]  ;;  %v614_v60 = vmul.f32 %v2442_v53, %v419_v32  ;;  %v615_v0 = vmul.f32 %v2442_v53, %v420_v33 }
  0x68   : > { %477 = vst.msk [vmem:[#allocation2 + $0x100] sm:$0xff] %vm444_vm0, %v2542_v13  ;;  %647 = vst.msk [vmem:[#allocation5 + $0x40] sm:$0xff] %vm444_vm0, %v583_v7  ;;  %v423_v40 = vld [vmem:[%s3561_s2 + $0x158] sm:$0xff]  ;;  %v424_v41 = vld [vmem:[%s3561_s2 + $0x160] sm:$0xff]  ;;  %v616_v1 = vmul.f32 %v2442_v53, %v421_v34  ;;  %v617_v2 = vmul.f32 %v2442_v53, %v422_v39 }
  0x69   : > { %648 = vst.msk [vmem:[#allocation5 + $0x48] sm:$0xff] %vm444_vm0, %v584_v8  ;;  %649 = vst.msk [vmem:[#allocation5 + $0x50] sm:$0xff] %vm444_vm0, %v585_v9  ;;  %v425_v46 = vld [vmem:[%s3561_s2 + $0x168] sm:$0xff]  ;;  %v426_v47 = vld [vmem:[%s3561_s2 + $0x170] sm:$0xff]  ;;  %v618_v3 = vmul.f32 %v2442_v53, %v423_v40  ;;  %v619_v7 = vmul.f32 %v2442_v53, %v424_v41 }
  0x6a   : > { %650 = vst.msk [vmem:[#allocation5 + $0x58] sm:$0xff] %vm444_vm0, %v586_v10  ;;  %478 = vst.msk [vmem:[#allocation2 + $0x108] sm:$0xff] %vm444_vm0, %v2561_v18  ;;  %v427_v48 = vld [vmem:[%s3561_s2 + $0x178] sm:$0xff]  ;;  %v428_v54 = vld [vmem:[%s3561_s2 + $0x180] sm:$0xff]  ;;  %v620_v8 = vmul.f32 %v2442_v53, %v425_v46  ;;  %v621_v9 = vmul.f32 %v2442_v53, %v426_v47 }
  0x6b   : > { %479 = vst.msk [vmem:[#allocation2 + $0x110] sm:$0xff] %vm444_vm0, %v2566_v19  ;;  %480 = vst.msk [vmem:[#allocation2 + $0x118] sm:$0xff] %vm444_vm0, %v2571_v20  ;;  %v429_v55 = vld [vmem:[%s3561_s2 + $0x188] sm:$0xff]  ;;  %v430_v56 = vld [vmem:[%s3561_s2 + $0x190] sm:$0xff]  ;;  %v622_v10 = vmul.f32 %v2442_v53, %v427_v48 }
  0x6c   : > { %651 = vst.msk [vmem:[#allocation5 + $0x60] sm:$0xff] %vm444_vm0, %v587_v14  ;;  %652 = vst.msk [vmem:[#allocation5 + $0x68] sm:$0xff] %vm444_vm0, %v588_v15  ;;  %v431_v61 = vld [vmem:[%s3561_s2 + $0x198] sm:$0xff]  ;;  %v432_v62 = vld [vmem:[%s3561_s2 + $0x1a0] sm:$0xff]  ;;  %v623_v14 = vmul.f32 %v2442_v53, %v428_v54  ;;  %v624_v15 = vmul.f32 %v2442_v53, %v429_v55 }
  0x6d   : > { %653 = vst.msk [vmem:[#allocation5 + $0x70] sm:$0xff] %vm444_vm0, %v589_v16  ;;  %654 = vst.msk [vmem:[#allocation5 + $0x78] sm:$0xff] %vm444_vm0, %v590_v17  ;;  %v433_v63 = vld [vmem:[%s3561_s2 + $0x1a8] sm:$0xff]  ;;  %v434_v4 = vld [vmem:[%s3561_s2 + $0x1b0] sm:$0xff]  ;;  %v625_v16 = vmul.f32 %v2442_v53, %v430_v56  ;;  %v626_v17 = vmul.f32 %v2442_v53, %v431_v61 }
  0x6e   : > { %481 = vst.msk [vmem:[#allocation2 + $0x120] sm:$0xff] %vm444_vm0, %v2594_v25  ;;  %482 = vst.msk [vmem:[#allocation2 + $0x128] sm:$0xff] %vm444_vm0, %v2599_v26  ;;  %v435_v5 = vld [vmem:[%s3561_s2 + $0x1b8] sm:$0xff]  ;;  %v436_v6 = vld [vmem:[%s3561_s2 + $0x1c0] sm:$0xff] }
  0x6f   : > { %483 = vst.msk [vmem:[#allocation2 + $0x130] sm:$0xff] %vm444_vm0, %v2604_v27  ;;  %655 = vst.msk [vmem:[#allocation5 + $0x80] sm:$0xff] %vm444_vm0, %v591_v21  ;;  %v437_v11 = vld [vmem:[%s3561_s2 + $0x1c8] sm:$0xff]  ;;  %v438_v12 = vld [vmem:[%s3561_s2 + $0x1d0] sm:$0xff]  ;;  %v627_v21 = vmul.f32 %v2442_v53, %v432_v62  ;;  %v631_v26 = vmul.f32 %v2442_v53, %v436_v6 }
  0x70   : > { %656 = vst.msk [vmem:[#allocation5 + $0x88] sm:$0xff] %vm444_vm0, %v592_v22  ;;  %657 = vst.msk [vmem:[#allocation5 + $0x90] sm:$0xff] %vm444_vm0, %v593_v23  ;;  %v439_v13 = vld [vmem:[%s3561_s2 + $0x1d8] sm:$0xff]  ;;  %v440_v18 = vld [vmem:[%s3561_s2 + $0x1e0] sm:$0xff]  ;;  %v628_v22 = vmul.f32 %v2442_v53, %v433_v63  ;;  %v629_v23 = vmul.f32 %v2442_v53, %v434_v4  ;;  %v632_v27 = vmul.f32 %v2442_v53, %v437_v11 }
  0x71   : > { %658 = vst.msk [vmem:[#allocation5 + $0x98] sm:$0xff] %vm444_vm0, %v594_v24  ;;  %484 = vst.msk [vmem:[#allocation2 + $0x138] sm:$0xff] %vm444_vm0, %v419_v32  ;;  %v441_v19 = vld [vmem:[%s3561_s2 + $0x1e8] sm:$0xff]  ;;  %v442_v20 = vld [vmem:[%s3561_s2 + $0x1f0] sm:$0xff]  ;;  %v630_v24 = vmul.f32 %v2442_v53, %v435_v5 }
  0x72   : > { %485 = vst.msk [vmem:[#allocation2 + $0x140] sm:$0xff] %vm444_vm0, %v420_v33  ;;  %486 = vst.msk [vmem:[#allocation2 + $0x148] sm:$0xff] %vm444_vm0, %v421_v34  ;;  %v443_v25 = vld [vmem:[%s3561_s2 + $0x1f8] sm:$0xff]  ;;  %v637_v32 = vmul.f32 %v2442_v53, %v442_v20 }
  0x73   : > { %659 = vst.msk [vmem:[#allocation5 + $0xa0] sm:$0xff] %vm444_vm0, %v595_v28  ;;  %660 = vst.msk [vmem:[#allocation5 + $0xa8] sm:$0xff] %vm444_vm0, %v596_v29  ;;  %v633_v28 = vmul.f32 %v2442_v53, %v438_v12  ;;  %v634_v29 = vmul.f32 %v2442_v53, %v439_v13  ;;  %v638_v33 = vmul.f32 %v2442_v53, %v443_v25 }
  0x74   : > { %661 = vst.msk [vmem:[#allocation5 + $0xb0] sm:$0xff] %vm444_vm0, %v597_v30  ;;  %662 = vst.msk [vmem:[#allocation5 + $0xb8] sm:$0xff] %vm444_vm0, %v598_v31  ;;  %v635_v30 = vmul.f32 %v2442_v53, %v440_v18  ;;  %v636_v31 = vmul.f32 %v2442_v53, %v441_v19 }
  0x75   : > { %487 = vst.msk [vmem:[#allocation2 + $0x150] sm:$0xff] %vm444_vm0, %v422_v39  ;;  %488 = vst.msk [vmem:[#allocation2 + $0x158] sm:$0xff] %vm444_vm0, %v423_v40 }
  0x76   : > { %489 = vst.msk [vmem:[#allocation2 + $0x160] sm:$0xff] %vm444_vm0, %v424_v41  ;;  %663 = vst.msk [vmem:[#allocation5 + $0xc0] sm:$0xff] %vm444_vm0, %v599_v35 }
  0x77   : > { %664 = vst.msk [vmem:[#allocation5 + $0xc8] sm:$0xff] %vm444_vm0, %v600_v36  ;;  %665 = vst.msk [vmem:[#allocation5 + $0xd0] sm:$0xff] %vm444_vm0, %v601_v37 }
  0x78   : > { %666 = vst.msk [vmem:[#allocation5 + $0xd8] sm:$0xff] %vm444_vm0, %v602_v38  ;;  %490 = vst.msk [vmem:[#allocation2 + $0x168] sm:$0xff] %vm444_vm0, %v425_v46 }
  0x79   : > { %491 = vst.msk [vmem:[#allocation2 + $0x170] sm:$0xff] %vm444_vm0, %v426_v47  ;;  %492 = vst.msk [vmem:[#allocation2 + $0x178] sm:$0xff] %vm444_vm0, %v427_v48 }
  0x7a   : > { %667 = vst.msk [vmem:[#allocation5 + $0xe0] sm:$0xff] %vm444_vm0, %v603_v42  ;;  %668 = vst.msk [vmem:[#allocation5 + $0xe8] sm:$0xff] %vm444_vm0, %v604_v43 }
  0x7b   : > { %669 = vst.msk [vmem:[#allocation5 + $0xf0] sm:$0xff] %vm444_vm0, %v605_v44  ;;  %670 = vst.msk [vmem:[#allocation5 + $0xf8] sm:$0xff] %vm444_vm0, %v606_v45 }
  0x7c   : > { %493 = vst.msk [vmem:[#allocation2 + $0x180] sm:$0xff] %vm444_vm0, %v428_v54  ;;  %494 = vst.msk [vmem:[#allocation2 + $0x188] sm:$0xff] %vm444_vm0, %v429_v55 }
  0x7d   : > { %495 = vst.msk [vmem:[#allocation2 + $0x190] sm:$0xff] %vm444_vm0, %v430_v56  ;;  %671 = vst.msk [vmem:[#allocation5 + $0x100] sm:$0xff] %vm444_vm0, %v607_v49 }
  0x7e   : > { %672 = vst.msk [vmem:[#allocation5 + $0x108] sm:$0xff] %vm444_vm0, %v608_v50  ;;  %673 = vst.msk [vmem:[#allocation5 + $0x110] sm:$0xff] %vm444_vm0, %v609_v51 }
  0x7f   : > { %674 = vst.msk [vmem:[#allocation5 + $0x118] sm:$0xff] %vm444_vm0, %v610_v52  ;;  %496 = vst.msk [vmem:[#allocation2 + $0x198] sm:$0xff] %vm444_vm0, %v431_v61 }
  0x80   : > { %497 = vst.msk [vmem:[#allocation2 + $0x1a0] sm:$0xff] %vm444_vm0, %v432_v62  ;;  %498 = vst.msk [vmem:[#allocation2 + $0x1a8] sm:$0xff] %vm444_vm0, %v433_v63 }
  0x81   : > { %675 = vst.msk [vmem:[#allocation5 + $0x120] sm:$0xff] %vm444_vm0, %v611_v57  ;;  %676 = vst.msk [vmem:[#allocation5 + $0x128] sm:$0xff] %vm444_vm0, %v612_v58 }
  0x82   : > { %677 = vst.msk [vmem:[#allocation5 + $0x130] sm:$0xff] %vm444_vm0, %v613_v59  ;;  %678 = vst.msk [vmem:[#allocation5 + $0x138] sm:$0xff] %vm444_vm0, %v614_v60 }
  0x83   : > { %499 = vst.msk [vmem:[#allocation2 + $0x1b0] sm:$0xff] %vm444_vm0, %v434_v4  ;;  %500 = vst.msk [vmem:[#allocation2 + $0x1b8] sm:$0xff] %vm444_vm0, %v435_v5 }
  0x84   : > { %501 = vst.msk [vmem:[#allocation2 + $0x1c0] sm:$0xff] %vm444_vm0, %v436_v6  ;;  %679 = vst.msk [vmem:[#allocation5 + $0x140] sm:$0xff] %vm444_vm0, %v615_v0 }
  0x85   : > { %680 = vst.msk [vmem:[#allocation5 + $0x148] sm:$0xff] %vm444_vm0, %v616_v1  ;;  %681 = vst.msk [vmem:[#allocation5 + $0x150] sm:$0xff] %vm444_vm0, %v617_v2 }
  0x86   : > { %682 = vst.msk [vmem:[#allocation5 + $0x158] sm:$0xff] %vm444_vm0, %v618_v3  ;;  %502 = vst.msk [vmem:[#allocation2 + $0x1c8] sm:$0xff] %vm444_vm0, %v437_v11 }
  0x87   : > { %503 = vst.msk [vmem:[#allocation2 + $0x1d0] sm:$0xff] %vm444_vm0, %v438_v12  ;;  %504 = vst.msk [vmem:[#allocation2 + $0x1d8] sm:$0xff] %vm444_vm0, %v439_v13 }
  0x88   : > { %683 = vst.msk [vmem:[#allocation5 + $0x160] sm:$0xff] %vm444_vm0, %v619_v7  ;;  %684 = vst.msk [vmem:[#allocation5 + $0x168] sm:$0xff] %vm444_vm0, %v620_v8 }
  0x89   : > { %685 = vst.msk [vmem:[#allocation5 + $0x170] sm:$0xff] %vm444_vm0, %v621_v9  ;;  %686 = vst.msk [vmem:[#allocation5 + $0x178] sm:$0xff] %vm444_vm0, %v622_v10 }
  0x8a   : > { %505 = vst.msk [vmem:[#allocation2 + $0x1e0] sm:$0xff] %vm444_vm0, %v440_v18  ;;  %506 = vst.msk [vmem:[#allocation2 + $0x1e8] sm:$0xff] %vm444_vm0, %v441_v19 }
  0x8b   : > { %507 = vst.msk [vmem:[#allocation2 + $0x1f0] sm:$0xff] %vm444_vm0, %v442_v20  ;;  %687 = vst.msk [vmem:[#allocation5 + $0x180] sm:$0xff] %vm444_vm0, %v623_v14 }
  0x8c   : > { %688 = vst.msk [vmem:[#allocation5 + $0x188] sm:$0xff] %vm444_vm0, %v624_v15  ;;  %689 = vst.msk [vmem:[#allocation5 + $0x190] sm:$0xff] %vm444_vm0, %v625_v16 }
  0x8d   : > { %690 = vst.msk [vmem:[#allocation5 + $0x198] sm:$0xff] %vm444_vm0, %v626_v17  ;;  %508 = vst.msk [vmem:[#allocation2 + $0x1f8] sm:$0xff] %vm444_vm0, %v443_v25 }
  0x8e   : > { %691 = vst.msk [vmem:[#allocation5 + $0x1a0] sm:$0xff] %vm444_vm0, %v627_v21  ;;  %692 = vst.msk [vmem:[#allocation5 + $0x1a8] sm:$0xff] %vm444_vm0, %v628_v22 }
  0x8f   : > { %693 = vst.msk [vmem:[#allocation5 + $0x1b0] sm:$0xff] %vm444_vm0, %v629_v23  ;;  %694 = vst.msk [vmem:[#allocation5 + $0x1b8] sm:$0xff] %vm444_vm0, %v630_v24 }
  0x90   : > { %695 = vst.msk [vmem:[#allocation5 + $0x1c0] sm:$0xff] %vm444_vm0, %v631_v26  ;;  %696 = vst.msk [vmem:[#allocation5 + $0x1c8] sm:$0xff] %vm444_vm0, %v632_v27 }
  0x91   : > { %697 = vst.msk [vmem:[#allocation5 + $0x1d0] sm:$0xff] %vm444_vm0, %v633_v28  ;;  %698 = vst.msk [vmem:[#allocation5 + $0x1d8] sm:$0xff] %vm444_vm0, %v634_v29 }
  0x92   : > { %699 = vst.msk [vmem:[#allocation5 + $0x1e0] sm:$0xff] %vm444_vm0, %v635_v30  ;;  %700 = vst.msk [vmem:[#allocation5 + $0x1e8] sm:$0xff] %vm444_vm0, %v636_v31 }
  0x93   : > { %701 = vst.msk [vmem:[#allocation5 + $0x1f0] sm:$0xff] %vm444_vm0, %v637_v32  ;;  %702 = vst.msk [vmem:[#allocation5 + $0x1f8] sm:$0xff] %vm444_vm0, %v638_v33 }
  0x94 PF: > { %p703_p1 = scmp.gt.s32.totalorder %s2117_s16, 0 }
  0x96   : > { %p704_p2 = pnand %p703_p1, %p372_p10 }
  0x98   : > { %p705_p3 = pneg %p704_p2 }
  0x9a   : > { %p706_p4 = pnand %p705_p3, %p375_p11 }
  0x9b   : > { %v710_v53 = vld [vmem:[#allocation2] sm:$0xff] (!%p706_p4)  ;;  %vm902_vm1 = vcmask (!%p706_p4), 261120   ;;  %v711_v35 = vld [vmem:[#allocation2 + $0x8] sm:$0xff] (!%p706_p4)  ;;  %v712_v38 = vld [vmem:[#allocation2 + $0x10] sm:$0xff] (!%p706_p4) }
  0x9c   : > { %709 = sbr.rel (%p706_p4) target bundleno = 208 (0xd0), region = 82  ;;  %v774_v34 = vld [vmem:[#allocation3] sm:$0xff] (!%p706_p4)  ;;  %v775_v37 = vld [vmem:[#allocation3 + $0x8] sm:$0xff] (!%p706_p4)  ;;  %v776_v39 = vld [vmem:[#allocation3 + $0x10] sm:$0xff] (!%p706_p4) }
  0x9d   : > { %v838_v36 = vsub.f32 (!%p706_p4), %v710_v53, %v774_v34  ;;  %v839_v40 = vsub.f32 (!%p706_p4), %v711_v35, %v775_v37  ;;  %v840_v41 = vsub.f32 (!%p706_p4), %v712_v38, %v776_v39  ;;  %v713_v42 = vld [vmem:[#allocation2 + $0x18] sm:$0xff] (!%p706_p4)  ;;  %v714_v44 = vld [vmem:[#allocation2 + $0x20] sm:$0xff] (!%p706_p4)  ;;  %v715_v47 = vld [vmem:[#allocation2 + $0x28] sm:$0xff] (!%p706_p4) }
  0x9e   : > { %v777_v43 = vld [vmem:[#allocation3 + $0x18] sm:$0xff] (!%p706_p4)  ;;  %v778_v46 = vld [vmem:[#allocation3 + $0x20] sm:$0xff] (!%p706_p4)  ;;  %v779_v48 = vld [vmem:[#allocation3 + $0x28] sm:$0xff] (!%p706_p4) }
  0x9f   : > { %903 = vst.msk [vmem:[#allocation2] sm:$0xff] (!%p706_p4), %vm902_vm1, %v838_v36  ;;  %v841_v45 = vsub.f32 (!%p706_p4), %v713_v42, %v777_v43  ;;  %904 = vst.msk [vmem:[#allocation2 + $0x8] sm:$0xff] (!%p706_p4), %vm902_vm1, %v839_v40  ;;  %v842_v49 = vsub.f32 (!%p706_p4), %v714_v44, %v778_v46  ;;  %v843_v50 = vsub.f32 (!%p706_p4), %v715_v47, %v779_v48  ;;  %v716_v51 = vld [vmem:[#allocation2 + $0x30] sm:$0xff] (!%p706_p4)  ;;  %v717_v54 = vld [vmem:[#allocation2 + $0x38] sm:$0xff] (!%p706_p4) }
  0xa0   : > { %905 = vst.msk [vmem:[#allocation2 + $0x10] sm:$0xff] (!%p706_p4), %vm902_vm1, %v840_v41  ;;  %v780_v52 = vld [vmem:[#allocation3 + $0x30] sm:$0xff] (!%p706_p4)  ;;  %v781_v56 = vld [vmem:[#allocation3 + $0x38] sm:$0xff] (!%p706_p4)  ;;  %v718_v57 = vld [vmem:[#allocation2 + $0x40] sm:$0xff] (!%p706_p4) }
  0xa1   : > { %906 = vst.msk [vmem:[#allocation2 + $0x18] sm:$0xff] (!%p706_p4), %vm902_vm1, %v841_v45  ;;  %v844_v55 = vsub.f32 (!%p706_p4), %v716_v51, %v780_v52  ;;  %v782_v58 = vld [vmem:[#allocation3 + $0x40] sm:$0xff] (!%p706_p4)  ;;  %907 = vst.msk [vmem:[#allocation2 + $0x20] sm:$0xff] (!%p706_p4), %vm902_vm1, %v842_v49  ;;  %v845_v59 = vsub.f32 (!%p706_p4), %v717_v54, %v781_v56  ;;  %v719_v61 = vld [vmem:[#allocation2 + $0x48] sm:$0xff] (!%p706_p4) }
  0xa2   : > { %908 = vst.msk [vmem:[#allocation2 + $0x28] sm:$0xff] (!%p706_p4), %vm902_vm1, %v843_v50  ;;  %v846_v60 = vsub.f32 (!%p706_p4), %v718_v57, %v782_v58  ;;  %v783_v62 = vld [vmem:[#allocation3 + $0x48] sm:$0xff] (!%p706_p4)  ;;  %v720_v63 = vld [vmem:[#allocation2 + $0x50] sm:$0xff] (!%p706_p4)  ;;  %v721_v2 = vld [vmem:[#allocation2 + $0x58] sm:$0xff] (!%p706_p4) }
  0xa3   : > { %909 = vst.msk [vmem:[#allocation2 + $0x30] sm:$0xff] %vm902_vm1, %v844_v55  ;;  %v847_v0 = vsub.f32 %v719_v61, %v783_v62  ;;  %v784_v1 = vld [vmem:[#allocation3 + $0x50] sm:$0xff]  ;;  %v785_v3 = vld [vmem:[#allocation3 + $0x58] sm:$0xff]  ;;  %910 = vst.msk [vmem:[#allocation2 + $0x38] sm:$0xff] %vm902_vm1, %v845_v59 }
  0xa4   : > { %911 = vst.msk [vmem:[#allocation2 + $0x40] sm:$0xff] %vm902_vm1, %v846_v60  ;;  %v848_v4 = vsub.f32 %v720_v63, %v784_v1  ;;  %v849_v5 = vsub.f32 %v721_v2, %v785_v3  ;;  %v722_v6 = vld [vmem:[#allocation2 + $0x60] sm:$0xff]  ;;  %v723_v8 = vld [vmem:[#allocation2 + $0x68] sm:$0xff]  ;;  %v724_v11 = vld [vmem:[#allocation2 + $0x70] sm:$0xff] }
  0xa5   : > { %v786_v7 = vld [vmem:[#allocation3 + $0x60] sm:$0xff]  ;;  %912 = vst.msk [vmem:[#allocation2 + $0x48] sm:$0xff] %vm902_vm1, %v847_v0  ;;  %v787_v10 = vld [vmem:[#allocation3 + $0x68] sm:$0xff]  ;;  %v788_v12 = vld [vmem:[#allocation3 + $0x70] sm:$0xff] }
  0xa6   : > { %v850_v9 = vsub.f32 %v722_v6, %v786_v7  ;;  %913 = vst.msk [vmem:[#allocation2 + $0x50] sm:$0xff] %vm902_vm1, %v848_v4  ;;  %914 = vst.msk [vmem:[#allocation2 + $0x58] sm:$0xff] %vm902_vm1, %v849_v5  ;;  %v851_v13 = vsub.f32 %v723_v8, %v787_v10  ;;  %v852_v14 = vsub.f32 %v724_v11, %v788_v12  ;;  %v725_v15 = vld [vmem:[#allocation2 + $0x78] sm:$0xff]  ;;  %v726_v17 = vld [vmem:[#allocation2 + $0x80] sm:$0xff] }
  0xa7   : > { %v789_v16 = vld [vmem:[#allocation3 + $0x78] sm:$0xff]  ;;  %v790_v19 = vld [vmem:[#allocation3 + $0x80] sm:$0xff]  ;;  %v727_v20 = vld [vmem:[#allocation2 + $0x88] sm:$0xff] }
  0xa8   : > { %915 = vst.msk [vmem:[#allocation2 + $0x60] sm:$0xff] %vm902_vm1, %v850_v9  ;;  %v853_v18 = vsub.f32 %v725_v15, %v789_v16  ;;  %v791_v21 = vld [vmem:[#allocation3 + $0x88] sm:$0xff]  ;;  %916 = vst.msk [vmem:[#allocation2 + $0x68] sm:$0xff] %vm902_vm1, %v851_v13  ;;  %v854_v22 = vsub.f32 %v726_v17, %v790_v19  ;;  %v728_v24 = vld [vmem:[#allocation2 + $0x90] sm:$0xff] }
  0xa9   : > { %917 = vst.msk [vmem:[#allocation2 + $0x70] sm:$0xff] %vm902_vm1, %v852_v14  ;;  %v855_v23 = vsub.f32 %v727_v20, %v791_v21  ;;  %v792_v25 = vld [vmem:[#allocation3 + $0x90] sm:$0xff]  ;;  %v729_v26 = vld [vmem:[#allocation2 + $0x98] sm:$0xff]  ;;  %v730_v29 = vld [vmem:[#allocation2 + $0xa0] sm:$0xff] }
  0xaa   : > { %918 = vst.msk [vmem:[#allocation2 + $0x78] sm:$0xff] %vm902_vm1, %v853_v18  ;;  %v856_v27 = vsub.f32 %v728_v24, %v792_v25  ;;  %v793_v28 = vld [vmem:[#allocation3 + $0x98] sm:$0xff]  ;;  %v794_v30 = vld [vmem:[#allocation3 + $0xa0] sm:$0xff]  ;;  %919 = vst.msk [vmem:[#allocation2 + $0x80] sm:$0xff] %vm902_vm1, %v854_v22 }
  0xab   : > { %920 = vst.msk [vmem:[#allocation2 + $0x88] sm:$0xff] %vm902_vm1, %v855_v23  ;;  %v857_v31 = vsub.f32 %v729_v26, %v793_v28  ;;  %v858_v32 = vsub.f32 %v730_v29, %v794_v30  ;;  %v731_v33 = vld [vmem:[#allocation2 + $0xa8] sm:$0xff]  ;;  %v732_v34 = vld [vmem:[#allocation2 + $0xb0] sm:$0xff]  ;;  %v733_v37 = vld [vmem:[#allocation2 + $0xb8] sm:$0xff] }
  0xac   : > { %v795_v53 = vld [vmem:[#allocation3 + $0xa8] sm:$0xff]  ;;  %921 = vst.msk [vmem:[#allocation2 + $0x90] sm:$0xff] %vm902_vm1, %v856_v27  ;;  %v796_v36 = vld [vmem:[#allocation3 + $0xb0] sm:$0xff]  ;;  %v797_v38 = vld [vmem:[#allocation3 + $0xb8] sm:$0xff] }
  0xad   : > { %v859_v35 = vsub.f32 %v731_v33, %v795_v53  ;;  %922 = vst.msk [vmem:[#allocation2 + $0x98] sm:$0xff] %vm902_vm1, %v857_v31  ;;  %923 = vst.msk [vmem:[#allocation2 + $0xa0] sm:$0xff] %vm902_vm1, %v858_v32  ;;  %v860_v39 = vsub.f32 %v732_v34, %v796_v36  ;;  %v861_v40 = vsub.f32 %v733_v37, %v797_v38  ;;  %v734_v41 = vld [vmem:[#allocation2 + $0xc0] sm:$0xff]  ;;  %v735_v43 = vld [vmem:[#allocation2 + $0xc8] sm:$0xff] }
  0xae   : > { %v798_v42 = vld [vmem:[#allocation3 + $0xc0] sm:$0xff]  ;;  %v799_v45 = vld [vmem:[#allocation3 + $0xc8] sm:$0xff]  ;;  %v736_v46 = vld [vmem:[#allocation2 + $0xd0] sm:$0xff] }
  0xaf   : > { %924 = vst.msk [vmem:[#allocation2 + $0xa8] sm:$0xff] %vm902_vm1, %v859_v35  ;;  %v862_v44 = vsub.f32 %v734_v41, %v798_v42  ;;  %v800_v47 = vld [vmem:[#allocation3 + $0xd0] sm:$0xff]  ;;  %925 = vst.msk [vmem:[#allocation2 + $0xb0] sm:$0xff] %vm902_vm1, %v860_v39  ;;  %v863_v48 = vsub.f32 %v735_v43, %v799_v45  ;;  %v737_v50 = vld [vmem:[#allocation2 + $0xd8] sm:$0xff] }
  0xb0   : > { %926 = vst.msk [vmem:[#allocation2 + $0xb8] sm:$0xff] %vm902_vm1, %v861_v40  ;;  %v864_v49 = vsub.f32 %v736_v46, %v800_v47  ;;  %v801_v51 = vld [vmem:[#allocation3 + $0xd8] sm:$0xff]  ;;  %v738_v52 = vld [vmem:[#allocation2 + $0xe0] sm:$0xff]  ;;  %v739_v56 = vld [vmem:[#allocation2 + $0xe8] sm:$0xff] }
  0xb1   : > { %927 = vst.msk [vmem:[#allocation2 + $0xc0] sm:$0xff] %vm902_vm1, %v862_v44  ;;  %v865_v54 = vsub.f32 %v737_v50, %v801_v51  ;;  %v802_v55 = vld [vmem:[#allocation3 + $0xe0] sm:$0xff]  ;;  %v803_v57 = vld [vmem:[#allocation3 + $0xe8] sm:$0xff]  ;;  %928 = vst.msk [vmem:[#allocation2 + $0xc8] sm:$0xff] %vm902_vm1, %v863_v48 }
  0xb2   : > { %929 = vst.msk [vmem:[#allocation2 + $0xd0] sm:$0xff] %vm902_vm1, %v864_v49  ;;  %v866_v58 = vsub.f32 %v738_v52, %v802_v55  ;;  %v867_v59 = vsub.f32 %v739_v56, %v803_v57  ;;  %v740_v60 = vld [vmem:[#allocation2 + $0xf0] sm:$0xff]  ;;  %v741_v62 = vld [vmem:[#allocation2 + $0xf8] sm:$0xff]  ;;  %v742_v1 = vld [vmem:[#allocation2 + $0x100] sm:$0xff] }
  0xb3   : > { %v804_v61 = vld [vmem:[#allocation3 + $0xf0] sm:$0xff]  ;;  %930 = vst.msk [vmem:[#allocation2 + $0xd8] sm:$0xff] %vm902_vm1, %v865_v54  ;;  %v805_v0 = vld [vmem:[#allocation3 + $0xf8] sm:$0xff]  ;;  %v806_v2 = vld [vmem:[#allocation3 + $0x100] sm:$0xff] }
  0xb4   : > { %v868_v63 = vsub.f32 %v740_v60, %v804_v61  ;;  %931 = vst.msk [vmem:[#allocation2 + $0xe0] sm:$0xff] %vm902_vm1, %v866_v58  ;;  %932 = vst.msk [vmem:[#allocation2 + $0xe8] sm:$0xff] %vm902_vm1, %v867_v59  ;;  %v869_v3 = vsub.f32 %v741_v62, %v805_v0  ;;  %v870_v4 = vsub.f32 %v742_v1, %v806_v2  ;;  %v743_v5 = vld [vmem:[#allocation2 + $0x108] sm:$0xff]  ;;  %v744_v7 = vld [vmem:[#allocation2 + $0x110] sm:$0xff] }
  0xb5   : > { %v807_v6 = vld [vmem:[#allocation3 + $0x108] sm:$0xff]  ;;  %v808_v9 = vld [vmem:[#allocation3 + $0x110] sm:$0xff]  ;;  %v745_v10 = vld [vmem:[#allocation2 + $0x118] sm:$0xff] }
  0xb6   : > { %933 = vst.msk [vmem:[#allocation2 + $0xf0] sm:$0xff] %vm902_vm1, %v868_v63  ;;  %v871_v8 = vsub.f32 %v743_v5, %v807_v6  ;;  %v809_v11 = vld [vmem:[#allocation3 + $0x118] sm:$0xff]  ;;  %934 = vst.msk [vmem:[#allocation2 + $0xf8] sm:$0xff] %vm902_vm1, %v869_v3  ;;  %v872_v12 = vsub.f32 %v744_v7, %v808_v9  ;;  %v746_v14 = vld [vmem:[#allocation2 + $0x120] sm:$0xff] }
  0xb7   : > { %935 = vst.msk [vmem:[#allocation2 + $0x100] sm:$0xff] %vm902_vm1, %v870_v4  ;;  %v873_v13 = vsub.f32 %v745_v10, %v809_v11  ;;  %v810_v15 = vld [vmem:[#allocation3 + $0x120] sm:$0xff]  ;;  %v747_v16 = vld [vmem:[#allocation2 + $0x128] sm:$0xff]  ;;  %v748_v19 = vld [vmem:[#allocation2 + $0x130] sm:$0xff] }
  0xb8   : > { %936 = vst.msk [vmem:[#allocation2 + $0x108] sm:$0xff] %vm902_vm1, %v871_v8  ;;  %v874_v17 = vsub.f32 %v746_v14, %v810_v15  ;;  %v811_v18 = vld [vmem:[#allocation3 + $0x128] sm:$0xff]  ;;  %v812_v20 = vld [vmem:[#allocation3 + $0x130] sm:$0xff]  ;;  %937 = vst.msk [vmem:[#allocation2 + $0x110] sm:$0xff] %vm902_vm1, %v872_v12 }
  0xb9   : > { %938 = vst.msk [vmem:[#allocation2 + $0x118] sm:$0xff] %vm902_vm1, %v873_v13  ;;  %v875_v21 = vsub.f32 %v747_v16, %v811_v18  ;;  %v876_v22 = vsub.f32 %v748_v19, %v812_v20  ;;  %v749_v23 = vld [vmem:[#allocation2 + $0x138] sm:$0xff]  ;;  %v750_v25 = vld [vmem:[#allocation2 + $0x140] sm:$0xff]  ;;  %v751_v28 = vld [vmem:[#allocation2 + $0x148] sm:$0xff] }
  0xba   : > { %v813_v24 = vld [vmem:[#allocation3 + $0x138] sm:$0xff]  ;;  %939 = vst.msk [vmem:[#allocation2 + $0x120] sm:$0xff] %vm902_vm1, %v874_v17  ;;  %v814_v27 = vld [vmem:[#allocation3 + $0x140] sm:$0xff]  ;;  %v815_v29 = vld [vmem:[#allocation3 + $0x148] sm:$0xff] }
  0xbb   : > { %v877_v26 = vsub.f32 %v749_v23, %v813_v24  ;;  %940 = vst.msk [vmem:[#allocation2 + $0x128] sm:$0xff] %vm902_vm1, %v875_v21  ;;  %941 = vst.msk [vmem:[#allocation2 + $0x130] sm:$0xff] %vm902_vm1, %v876_v22  ;;  %v878_v30 = vsub.f32 %v750_v25, %v814_v27  ;;  %v879_v31 = vsub.f32 %v751_v28, %v815_v29  ;;  %v752_v32 = vld [vmem:[#allocation2 + $0x150] sm:$0xff]  ;;  %v753_v53 = vld [vmem:[#allocation2 + $0x158] sm:$0xff] }
  0xbc   : > { %v816_v33 = vld [vmem:[#allocation3 + $0x150] sm:$0xff]  ;;  %v817_v35 = vld [vmem:[#allocation3 + $0x158] sm:$0xff]  ;;  %v754_v36 = vld [vmem:[#allocation2 + $0x160] sm:$0xff] }
  0xbd   : > { %942 = vst.msk [vmem:[#allocation2 + $0x138] sm:$0xff] %vm902_vm1, %v877_v26  ;;  %v880_v34 = vsub.f32 %v752_v32, %v816_v33  ;;  %v818_v37 = vld [vmem:[#allocation3 + $0x160] sm:$0xff]  ;;  %943 = vst.msk [vmem:[#allocation2 + $0x140] sm:$0xff] %vm902_vm1, %v878_v30  ;;  %v881_v38 = vsub.f32 %v753_v53, %v817_v35  ;;  %v755_v40 = vld [vmem:[#allocation2 + $0x168] sm:$0xff] }
  0xbe   : > { %944 = vst.msk [vmem:[#allocation2 + $0x148] sm:$0xff] %vm902_vm1, %v879_v31  ;;  %v882_v39 = vsub.f32 %v754_v36, %v818_v37  ;;  %v819_v41 = vld [vmem:[#allocation3 + $0x168] sm:$0xff]  ;;  %v756_v42 = vld [vmem:[#allocation2 + $0x170] sm:$0xff]  ;;  %v757_v45 = vld [vmem:[#allocation2 + $0x178] sm:$0xff] }
  0xbf   : > { %945 = vst.msk [vmem:[#allocation2 + $0x150] sm:$0xff] %vm902_vm1, %v880_v34  ;;  %v883_v43 = vsub.f32 %v755_v40, %v819_v41  ;;  %v820_v44 = vld [vmem:[#allocation3 + $0x170] sm:$0xff]  ;;  %v821_v46 = vld [vmem:[#allocation3 + $0x178] sm:$0xff]  ;;  %946 = vst.msk [vmem:[#allocation2 + $0x158] sm:$0xff] %vm902_vm1, %v881_v38 }
  0xc0   : > { %947 = vst.msk [vmem:[#allocation2 + $0x160] sm:$0xff] %vm902_vm1, %v882_v39  ;;  %v884_v47 = vsub.f32 %v756_v42, %v820_v44  ;;  %v885_v48 = vsub.f32 %v757_v45, %v821_v46  ;;  %v758_v49 = vld [vmem:[#allocation2 + $0x180] sm:$0xff]  ;;  %v759_v51 = vld [vmem:[#allocation2 + $0x188] sm:$0xff]  ;;  %v760_v55 = vld [vmem:[#allocation2 + $0x190] sm:$0xff] }
  0xc1   : > { %v822_v50 = vld [vmem:[#allocation3 + $0x180] sm:$0xff]  ;;  %948 = vst.msk [vmem:[#allocation2 + $0x168] sm:$0xff] %vm902_vm1, %v883_v43  ;;  %v823_v54 = vld [vmem:[#allocation3 + $0x188] sm:$0xff]  ;;  %v824_v56 = vld [vmem:[#allocation3 + $0x190] sm:$0xff] }
  0xc2   : > { %v886_v52 = vsub.f32 %v758_v49, %v822_v50  ;;  %949 = vst.msk [vmem:[#allocation2 + $0x170] sm:$0xff] %vm902_vm1, %v884_v47  ;;  %950 = vst.msk [vmem:[#allocation2 + $0x178] sm:$0xff] %vm902_vm1, %v885_v48  ;;  %v887_v57 = vsub.f32 %v759_v51, %v823_v54  ;;  %v888_v58 = vsub.f32 %v760_v55, %v824_v56  ;;  %v761_v59 = vld [vmem:[#allocation2 + $0x198] sm:$0xff]  ;;  %v762_v61 = vld [vmem:[#allocation2 + $0x1a0] sm:$0xff] }
  0xc3   : > { %v825_v60 = vld [vmem:[#allocation3 + $0x198] sm:$0xff]  ;;  %v826_v63 = vld [vmem:[#allocation3 + $0x1a0] sm:$0xff]  ;;  %v763_v0 = vld [vmem:[#allocation2 + $0x1a8] sm:$0xff] }
  0xc4   : > { %951 = vst.msk [vmem:[#allocation2 + $0x180] sm:$0xff] %vm902_vm1, %v886_v52  ;;  %v889_v62 = vsub.f32 %v761_v59, %v825_v60  ;;  %v827_v1 = vld [vmem:[#allocation3 + $0x1a8] sm:$0xff]  ;;  %952 = vst.msk [vmem:[#allocation2 + $0x188] sm:$0xff] %vm902_vm1, %v887_v57  ;;  %v890_v2 = vsub.f32 %v762_v61, %v826_v63  ;;  %v764_v4 = vld [vmem:[#allocation2 + $0x1b0] sm:$0xff] }
  0xc5   : > { %953 = vst.msk [vmem:[#allocation2 + $0x190] sm:$0xff] %vm902_vm1, %v888_v58  ;;  %v891_v3 = vsub.f32 %v763_v0, %v827_v1  ;;  %v828_v5 = vld [vmem:[#allocation3 + $0x1b0] sm:$0xff]  ;;  %v765_v6 = vld [vmem:[#allocation2 + $0x1b8] sm:$0xff]  ;;  %v766_v9 = vld [vmem:[#allocation2 + $0x1c0] sm:$0xff] }
  0xc6   : > { %954 = vst.msk [vmem:[#allocation2 + $0x198] sm:$0xff] %vm902_vm1, %v889_v62  ;;  %v892_v7 = vsub.f32 %v764_v4, %v828_v5  ;;  %v829_v8 = vld [vmem:[#allocation3 + $0x1b8] sm:$0xff]  ;;  %v830_v10 = vld [vmem:[#allocation3 + $0x1c0] sm:$0xff]  ;;  %955 = vst.msk [vmem:[#allocation2 + $0x1a0] sm:$0xff] %vm902_vm1, %v890_v2 }
  0xc7   : > { %956 = vst.msk [vmem:[#allocation2 + $0x1a8] sm:$0xff] %vm902_vm1, %v891_v3  ;;  %v893_v11 = vsub.f32 %v765_v6, %v829_v8  ;;  %v894_v12 = vsub.f32 %v766_v9, %v830_v10  ;;  %v767_v13 = vld [vmem:[#allocation2 + $0x1c8] sm:$0xff]  ;;  %v768_v15 = vld [vmem:[#allocation2 + $0x1d0] sm:$0xff]  ;;  %v769_v18 = vld [vmem:[#allocation2 + $0x1d8] sm:$0xff] }
  0xc8   : > { %v831_v14 = vld [vmem:[#allocation3 + $0x1c8] sm:$0xff]  ;;  %957 = vst.msk [vmem:[#allocation2 + $0x1b0] sm:$0xff] %vm902_vm1, %v892_v7  ;;  %v832_v17 = vld [vmem:[#allocation3 + $0x1d0] sm:$0xff]  ;;  %v833_v19 = vld [vmem:[#allocation3 + $0x1d8] sm:$0xff] }
  0xc9   : > { %v895_v16 = vsub.f32 %v767_v13, %v831_v14  ;;  %958 = vst.msk [vmem:[#allocation2 + $0x1b8] sm:$0xff] %vm902_vm1, %v893_v11  ;;  %959 = vst.msk [vmem:[#allocation2 + $0x1c0] sm:$0xff] %vm902_vm1, %v894_v12  ;;  %v896_v20 = vsub.f32 %v768_v15, %v832_v17  ;;  %v897_v21 = vsub.f32 %v769_v18, %v833_v19  ;;  %v770_v22 = vld [vmem:[#allocation2 + $0x1e0] sm:$0xff]  ;;  %v771_v24 = vld [vmem:[#allocation2 + $0x1e8] sm:$0xff] }
  0xca   : > { %v834_v23 = vld [vmem:[#allocation3 + $0x1e0] sm:$0xff]  ;;  %v835_v26 = vld [vmem:[#allocation3 + $0x1e8] sm:$0xff]  ;;  %v772_v27 = vld [vmem:[#allocation2 + $0x1f0] sm:$0xff] }
  0xcb   : > { %960 = vst.msk [vmem:[#allocation2 + $0x1c8] sm:$0xff] %vm902_vm1, %v895_v16  ;;  %v898_v25 = vsub.f32 %v770_v22, %v834_v23  ;;  %v836_v28 = vld [vmem:[#allocation3 + $0x1f0] sm:$0xff]  ;;  %961 = vst.msk [vmem:[#allocation2 + $0x1d0] sm:$0xff] %vm902_vm1, %v896_v20  ;;  %v899_v29 = vsub.f32 %v771_v24, %v835_v26  ;;  %v773_v31 = vld [vmem:[#allocation2 + $0x1f8] sm:$0xff] }
  0xcc   : > { %962 = vst.msk [vmem:[#allocation2 + $0x1d8] sm:$0xff] %vm902_vm1, %v897_v21  ;;  %v900_v30 = vsub.f32 %v772_v27, %v836_v28  ;;  %v837_v32 = vld [vmem:[#allocation3 + $0x1f8] sm:$0xff] }
  0xcd   : > { %963 = vst.msk [vmem:[#allocation2 + $0x1e0] sm:$0xff] %vm902_vm1, %v898_v25  ;;  %v901_v33 = vsub.f32 %v773_v31, %v837_v32  ;;  %964 = vst.msk [vmem:[#allocation2 + $0x1e8] sm:$0xff] %vm902_vm1, %v899_v29 }
  0xce   : > { %965 = vst.msk [vmem:[#allocation2 + $0x1f0] sm:$0xff] %vm902_vm1, %v900_v30 }
  0xcf   : > { %966 = vst.msk [vmem:[#allocation2 + $0x1f8] sm:$0xff] %vm902_vm1, %v901_v33 }
  0xd0 PF: > { %p1872_p5 = scmp.ne.s32.totalorder %s2109_s14, 0 }
  0xd1   : > { %vm970_vm2 = vcmask (!%p1872_p5), 261120   ;;  %v2136_v53 = vmov (!%p1872_p5), 0.0  }
  0xd2   : > { %969 = sbr.rel (%p1872_p5) target bundleno = 226 (0xe2), region = 86  ;;  %971 = vst.msk [vmem:[#allocation4] sm:$0xff] (!%p1872_p5), %vm970_vm2, %v2136_v53  ;;  %972 = vst.msk [vmem:[#allocation4 + $0x8] sm:$0xff] (!%p1872_p5), %vm970_vm2, %v2136_v53 }
  0xd3   : > { %973 = vst.msk [vmem:[#allocation4 + $0x10] sm:$0xff] (!%p1872_p5), %vm970_vm2, %v2136_v53  ;;  %974 = vst.msk [vmem:[#allocation4 + $0x18] sm:$0xff] (!%p1872_p5), %vm970_vm2, %v2136_v53 }
  0xd4   : > { %975 = vst.msk [vmem:[#allocation4 + $0x20] sm:$0xff] (!%p1872_p5), %vm970_vm2, %v2136_v53  ;;  %976 = vst.msk [vmem:[#allocation4 + $0x28] sm:$0xff] (!%p1872_p5), %vm970_vm2, %v2136_v53 }
  0xd5   : > { %977 = vst.msk [vmem:[#allocation4 + $0x30] sm:$0xff] (!%p1872_p5), %vm970_vm2, %v2136_v53  ;;  %978 = vst.msk [vmem:[#allocation4 + $0x38] sm:$0xff] (!%p1872_p5), %vm970_vm2, %v2136_v53 }
  0xd6   : > { %979 = vst.msk [vmem:[#allocation4 + $0x40] sm:$0xff] (!%p1872_p5), %vm970_vm2, %v2136_v53  ;;  %980 = vst.msk [vmem:[#allocation4 + $0x48] sm:$0xff] (!%p1872_p5), %vm970_vm2, %v2136_v53 }
  0xd7   : > { %981 = vst.msk [vmem:[#allocation4 + $0x50] sm:$0xff] (!%p1872_p5), %vm970_vm2, %v2136_v53  ;;  %982 = vst.msk [vmem:[#allocation4 + $0x58] sm:$0xff] (!%p1872_p5), %vm970_vm2, %v2136_v53 }
  0xd8   : > { %983 = vst.msk [vmem:[#allocation4 + $0x60] sm:$0xff] (!%p1872_p5), %vm970_vm2, %v2136_v53  ;;  %984 = vst.msk [vmem:[#allocation4 + $0x68] sm:$0xff] (!%p1872_p5), %vm970_vm2, %v2136_v53 }
  0xd9   : > { %985 = vst.msk [vmem:[#allocation4 + $0x70] sm:$0xff] %vm970_vm2, %v2136_v53  ;;  %986 = vst.msk [vmem:[#allocation4 + $0x78] sm:$0xff] %vm970_vm2, %v2136_v53 }
  0xda   : > { %987 = vst.msk [vmem:[#allocation4 + $0x80] sm:$0xff] %vm970_vm2, %v2136_v53  ;;  %988 = vst.msk [vmem:[#allocation4 + $0x88] sm:$0xff] %vm970_vm2, %v2136_v53 }
  0xdb   : > { %989 = vst.msk [vmem:[#allocation4 + $0x90] sm:$0xff] %vm970_vm2, %v2136_v53  ;;  %990 = vst.msk [vmem:[#allocation4 + $0x98] sm:$0xff] %vm970_vm2, %v2136_v53 }
  0xdc   : > { %991 = vst.msk [vmem:[#allocation4 + $0xa0] sm:$0xff] %vm970_vm2, %v2136_v53  ;;  %992 = vst.msk [vmem:[#allocation4 + $0xa8] sm:$0xff] %vm970_vm2, %v2136_v53 }
  0xdd   : > { %993 = vst.msk [vmem:[#allocation4 + $0xb0] sm:$0xff] %vm970_vm2, %v2136_v53  ;;  %994 = vst.msk [vmem:[#allocation4 + $0xb8] sm:$0xff] %vm970_vm2, %v2136_v53 }
  0xde   : > { %995 = vst.msk [vmem:[#allocation4 + $0xc0] sm:$0xff] %vm970_vm2, %v2136_v53  ;;  %996 = vst.msk [vmem:[#allocation4 + $0xc8] sm:$0xff] %vm970_vm2, %v2136_v53 }
  0xdf   : > { %997 = vst.msk [vmem:[#allocation4 + $0xd0] sm:$0xff] %vm970_vm2, %v2136_v53  ;;  %998 = vst.msk [vmem:[#allocation4 + $0xd8] sm:$0xff] %vm970_vm2, %v2136_v53 }
  0xe0   : > { %999 = vst.msk [vmem:[#allocation4 + $0xe0] sm:$0xff] %vm970_vm2, %v2136_v53  ;;  %1000 = vst.msk [vmem:[#allocation4 + $0xe8] sm:$0xff] %vm970_vm2, %v2136_v53 }
  0xe1   : > { %1001 = vst.msk [vmem:[#allocation4 + $0xf0] sm:$0xff] %vm970_vm2, %v2136_v53  ;;  %1002 = vst.msk [vmem:[#allocation4 + $0xf8] sm:$0xff] %vm970_vm2, %v2136_v53 }
  0xe2 PF: > { %s1873_s27 = sshll.u32 %s2109_s14, 8  ;;  %v2931_v34 = vld [vmem:[%s2331_s11] sm:$0xff]  ;;  %v2137_v36 = vmov 0.0|0.0   ;;  %v1037_v24 = vld [vmem:[%s2331_s11 + $0x8] sm:$0xff]  ;;  %v1038_v30 = vld [vmem:[%s2331_s11 + $0x10] sm:$0xff]  ;;  %vm1422_vm3 = vcmask 261120  }
  0xe3   : > { %v2934_v35 = vld [vmem:[%s2331_s11 + $0x80] sm:$0xff]  ;;  %1879 = vmatprep.subr.bf16.mxu0 %v2137_v36  ;;  %1927 = vmatprep.subr.bf16.mxu1 %v2137_v36  ;;  %v1069_v37 = vunpack.c.h.bf16 %v2931_v34  ;;  %s2940_s29 = scalar_lea.vmem [#allocation2], %s1873_s27  ;;  %v1053_v25 = vld [vmem:[%s2331_s11 + $0x88] sm:$0xff]  ;;  %v1068_v26 = vunpack.c.l.bf16 %v2931_v34  ;;  %v1071_v28 = vunpack.c.h.bf16 %v1037_v24  ;;  %v1054_v31 = vld [vmem:[%s2331_s11 + $0x90] sm:$0xff]  ;;  %v1070_v32 = vunpack.c.l.bf16 %v1037_v24  ;;  %p1874_p7 = scmp.ne.s32.totalorder %s2109_s14, 1 }
  0xe4   : > { %v1101_v38 = vunpack.c.h.bf16 %v2934_v35  ;;  %v1133_v39 = vld [vmem:[%s2940_s29] sm:$0xff]  ;;  %v1134_v40 = vld [vmem:[%s2940_s29 + $0x8] sm:$0xff]  ;;  %v1135_v41 = vld [vmem:[%s2940_s29 + $0x10] sm:$0xff]  ;;  %v1100_v27 = vunpack.c.l.bf16 %v2934_v35  ;;  %v1103_v29 = vunpack.c.h.bf16 %v1053_v25  ;;  %v1102_v33 = vunpack.c.l.bf16 %v1053_v25  ;;  %s1623_s6 = sadd.s32 (!%p1874_p7), 1, %s2117_s16 }
  0xe5   : > { %v1880_v42 = vpack.c.bf16 %v1134_v40, %v1133_v39  ;;  %v1136_v43 = vld [vmem:[%s2940_s29 + $0x18] sm:$0xff]  ;;  %1229 = vmatprep.mubr.f32.mxu0 %v1069_v37  ;;  %v1137_v45 = vld [vmem:[%s2940_s29 + $0x20] sm:$0xff]  ;;  %v1138_v46 = vld [vmem:[%s2940_s29 + $0x28] sm:$0xff]  ;;  %v1073_v53 = vunpack.c.h.bf16 %v1038_v30  ;;  %v1105_v34 = vunpack.c.h.bf16 %v1054_v31  ;;  %v1072_v35 = vunpack.c.l.bf16 %v1038_v30  ;;  %s3095_s16 = sld [smem:[#allocation6 + %s1623_s6]] (!%p1874_p7) }
  0xe6   : > { %1309 = vmatprep.mubr.f32.mxu1 %v1101_v38  ;;  %v1883_v44 = vpack.c.bf16 %v1136_v43, %v1135_v41  ;;  %v1886_v47 = vpack.c.bf16 %v1138_v46, %v1137_v45  ;;  %v1139_v48 = vld [vmem:[%s2940_s29 + $0x30] sm:$0xff]  ;;  %v1140_v49 = vld [vmem:[%s2940_s29 + $0x38] sm:$0xff]  ;;  %v1141_v51 = vld [vmem:[%s2940_s29 + $0x40] sm:$0xff]  ;;  %v1104_v38 = vunpack.c.l.bf16 %v1054_v31 }
  0xe7   : > { %1881 = vmatpush1.bf16.msra.mxu0 %v1880_v42  ;;  %1943 = vmatpush1.bf16.msra.mxu1 %v1880_v42  ;;  %v1889_v50 = vpack.c.bf16 %v1140_v49, %v1139_v48  ;;  %v1142_v52 = vld [vmem:[%s2940_s29 + $0x48] sm:$0xff]  ;;  %v1143_v55 = vld [vmem:[%s2940_s29 + $0x50] sm:$0xff]  ;;  %v1144_v56 = vld [vmem:[%s2940_s29 + $0x58] sm:$0xff] }
  0xe8   : > { %1882 = vmatprep.subr.bf16.mxu0 %v2137_v36  ;;  %1928 = vmatprep.subr.bf16.mxu1 %v2137_v36  ;;  %v1892_v54 = vpack.c.bf16 %v1142_v52, %v1141_v51  ;;  %v1895_v57 = vpack.c.bf16 %v1144_v56, %v1143_v55  ;;  %v1145_v58 = vld [vmem:[%s2940_s29 + $0x60] sm:$0xff]  ;;  %v1146_v59 = vld [vmem:[%s2940_s29 + $0x68] sm:$0xff]  ;;  %v1147_v61 = vld [vmem:[%s2940_s29 + $0x70] sm:$0xff] }
  0xe9   : > { %v1898_v60 = vpack.c.bf16 %v1146_v59, %v1145_v58  ;;  %v1148_v62 = vld [vmem:[%s2940_s29 + $0x78] sm:$0xff]  ;;  %v1149_v0 = vld [vmem:[%s2940_s29 + $0x80] sm:$0xff]  ;;  %v1150_v1 = vld [vmem:[%s2940_s29 + $0x88] sm:$0xff] }
  0xea   : > { %v1901_v63 = vpack.c.bf16 %v1148_v62, %v1147_v61  ;;  %v1904_v2 = vpack.c.bf16 %v1150_v1, %v1149_v0  ;;  %v1151_v3 = vld [vmem:[%s2940_s29 + $0x90] sm:$0xff]  ;;  %v1152_v4 = vld [vmem:[%s2940_s29 + $0x98] sm:$0xff]  ;;  %v1153_v6 = vld [vmem:[%s2940_s29 + $0xa0] sm:$0xff] }
  0xeb   : > { %1884 = vmatpush1.bf16.msra.mxu0 %v1883_v44  ;;  %1944 = vmatpush1.bf16.msra.mxu1 %v1883_v44  ;;  %v1907_v5 = vpack.c.bf16 %v1152_v4, %v1151_v3  ;;  %v1154_v7 = vld [vmem:[%s2940_s29 + $0xa8] sm:$0xff]  ;;  %v1155_v9 = vld [vmem:[%s2940_s29 + $0xb0] sm:$0xff]  ;;  %v1156_v10 = vld [vmem:[%s2940_s29 + $0xb8] sm:$0xff] }
  0xec   : > { %1885 = vmatprep.subr.bf16.mxu0 %v2137_v36  ;;  %1929 = vmatprep.subr.bf16.mxu1 %v2137_v36  ;;  %v1910_v8 = vpack.c.bf16 %v1154_v7, %v1153_v6  ;;  %v1913_v11 = vpack.c.bf16 %v1156_v10, %v1155_v9  ;;  %v1157_v12 = vld [vmem:[%s2940_s29 + $0xc0] sm:$0xff]  ;;  %v1158_v13 = vld [vmem:[%s2940_s29 + $0xc8] sm:$0xff]  ;;  %v1159_v15 = vld [vmem:[%s2940_s29 + $0xd0] sm:$0xff] }
  0xed   : > { %v1916_v14 = vpack.c.bf16 %v1158_v13, %v1157_v12  ;;  %v1160_v16 = vld [vmem:[%s2940_s29 + $0xd8] sm:$0xff]  ;;  %v1161_v18 = vld [vmem:[%s2940_s29 + $0xe0] sm:$0xff]  ;;  %v1162_v19 = vld [vmem:[%s2940_s29 + $0xe8] sm:$0xff] }
  0xee   : > { %v1919_v17 = vpack.c.bf16 %v1160_v16, %v1159_v15  ;;  %v1922_v20 = vpack.c.bf16 %v1162_v19, %v1161_v18  ;;  %v1163_v21 = vld [vmem:[%s2940_s29 + $0xf0] sm:$0xff]  ;;  %v1164_v22 = vld [vmem:[%s2940_s29 + $0xf8] sm:$0xff]  ;;  %v1040_v41 = vld [vmem:[%s2331_s11 + $0x20] sm:$0xff] }
  0xef   : > { %1887 = vmatpush1.bf16.msra.mxu0 %v1886_v47  ;;  %1945 = vmatpush1.bf16.msra.mxu1 %v1886_v47  ;;  %v1925_v23 = vpack.c.bf16 %v1164_v22, %v1163_v21  ;;  %v1055_v37 = vld [vmem:[%s2331_s11 + $0x98] sm:$0xff]  ;;  %v1056_v42 = vld [vmem:[%s2331_s11 + $0xa0] sm:$0xff]  ;;  %v1077_v45 = vunpack.c.h.bf16 %v1040_v41  ;;  %v1041_v47 = vld [vmem:[%s2331_s11 + $0x28] sm:$0xff]  ;;  %v1076_v49 = vunpack.c.l.bf16 %v1040_v41 }
  0xf0   : > { %1888 = vmatprep.subr.bf16.mxu0 %v2137_v36  ;;  %1930 = vmatprep.subr.bf16.mxu1 %v2137_v36  ;;  %v1107_v40 = vunpack.c.h.bf16 %v1055_v37  ;;  %v1106_v44 = vunpack.c.l.bf16 %v1055_v37  ;;  %v1109_v46 = vunpack.c.h.bf16 %v1056_v42  ;;  %v1057_v48 = vld [vmem:[%s2331_s11 + $0xa8] sm:$0xff]  ;;  %v1079_v51 = vunpack.c.h.bf16 %v1041_v47  ;;  %v1058_v55 = vld [vmem:[%s2331_s11 + $0xb0] sm:$0xff]  ;;  %v1059_v61 = vld [vmem:[%s2331_s11 + $0xb8] sm:$0xff] }
  0xf1   : > { %v1111_v52 = vunpack.c.h.bf16 %v1057_v48  ;;  %v1078_v56 = vunpack.c.l.bf16 %v1041_v47  ;;  %v1113_v59 = vunpack.c.h.bf16 %v1058_v55  ;;  %v1115_v1 = vunpack.c.h.bf16 %v1059_v61  ;;  %v1060_v3 = vld [vmem:[%s2331_s11 + $0xc0] sm:$0xff]  ;;  %v1061_v9 = vld [vmem:[%s2331_s11 + $0xc8] sm:$0xff]  ;;  %v1062_v15 = vld [vmem:[%s2331_s11 + $0xd0] sm:$0xff] }
  0xf2   : > { %v1117_v7 = vunpack.c.h.bf16 %v1060_v3  ;;  %v1119_v13 = vunpack.c.h.bf16 %v1061_v9  ;;  %v1121_v19 = vunpack.c.h.bf16 %v1062_v15  ;;  %v1063_v21 = vld [vmem:[%s2331_s11 + $0xd8] sm:$0xff] }
  0xf3   : > { %1890 = vmatpush1.bf16.msra.mxu0 %v1889_v50  ;;  %1946 = vmatpush1.bf16.msra.mxu1 %v1889_v50  ;;  %v1108_v50 = vunpack.c.l.bf16 %v1056_v42  ;;  %v1123_v25 = vunpack.c.h.bf16 %v1063_v21 }
  0xf4   : > { %1891 = vmatprep.subr.bf16.mxu0 %v2137_v36  ;;  %1931 = vmatprep.subr.bf16.mxu1 %v2137_v36 }
  0xf7   : > { %1893 = vmatpush1.bf16.msra.mxu0 %v1892_v54  ;;  %1947 = vmatpush1.bf16.msra.mxu1 %v1892_v54  ;;  %v1042_v54 = vld [vmem:[%s2331_s11 + $0x30] sm:$0xff] }
  0xf8   : > { %1894 = vmatprep.subr.bf16.mxu0 %v2137_v36  ;;  %1932 = vmatprep.subr.bf16.mxu1 %v2137_v36  ;;  %v1081_v58 = vunpack.c.h.bf16 %v1042_v54  ;;  %v1080_v62 = vunpack.c.l.bf16 %v1042_v54 }
  0xfb   : > { %1896 = vmatpush1.bf16.msra.mxu0 %v1895_v57  ;;  %1948 = vmatpush1.bf16.msra.mxu1 %v1895_v57  ;;  %v1110_v57 = vunpack.c.l.bf16 %v1057_v48 }
  0xfc   : > { %1897 = vmatprep.subr.bf16.mxu0 %v2137_v36  ;;  %1933 = vmatprep.subr.bf16.mxu1 %v2137_v36 }
  0xff   : > { %1899 = vmatpush1.bf16.msra.mxu0 %v1898_v60  ;;  %1949 = vmatpush1.bf16.msra.mxu1 %v1898_v60  ;;  %v1043_v60 = vld [vmem:[%s2331_s11 + $0x38] sm:$0xff] }
 0x100   : > { %1900 = vmatprep.subr.bf16.mxu0 %v2137_v36  ;;  %1934 = vmatprep.subr.bf16.mxu1 %v2137_v36  ;;  %v1083_v0 = vunpack.c.h.bf16 %v1043_v60  ;;  %v1082_v4 = vunpack.c.l.bf16 %v1043_v60  ;;  %v1005_v60 = vld [vmem:[#allocation4 + $0x8] sm:$0xff] }
 0x103   : > { %1902 = vmatpush1.bf16.msra.mxu0 %v1901_v63  ;;  %1950 = vmatpush1.bf16.msra.mxu1 %v1901_v63  ;;  %v1112_v63 = vunpack.c.l.bf16 %v1058_v55 }
 0x104   : > { %1903 = vmatprep.subr.bf16.mxu0 %v2137_v36  ;;  %1935 = vmatprep.subr.bf16.mxu1 %v2137_v36 }
 0x107   : > { %1905 = vmatpush1.bf16.msra.mxu0 %v1904_v2  ;;  %1951 = vmatpush1.bf16.msra.mxu1 %v1904_v2  ;;  %v1044_v2 = vld [vmem:[%s2331_s11 + $0x40] sm:$0xff] }
 0x108   : > { %1906 = vmatprep.subr.bf16.mxu0 %v2137_v36  ;;  %1936 = vmatprep.subr.bf16.mxu1 %v2137_v36  ;;  %v1085_v6 = vunpack.c.h.bf16 %v1044_v2  ;;  %v1084_v10 = vunpack.c.l.bf16 %v1044_v2 }
 0x10b   : > { %1908 = vmatpush1.bf16.msra.mxu0 %v1907_v5  ;;  %1952 = vmatpush1.bf16.msra.mxu1 %v1907_v5  ;;  %v1114_v5 = vunpack.c.l.bf16 %v1059_v61  ;;  %v1021_v61 = vld [vmem:[#allocation4 + $0x88] sm:$0xff] }
 0x10c   : > { %1909 = vmatprep.subr.bf16.mxu0 %v2137_v36  ;;  %1937 = vmatprep.subr.bf16.mxu1 %v2137_v36 }
 0x10f   : > { %1911 = vmatpush1.bf16.msra.mxu0 %v1910_v8  ;;  %1953 = vmatpush1.bf16.msra.mxu1 %v1910_v8  ;;  %v1045_v8 = vld [vmem:[%s2331_s11 + $0x48] sm:$0xff] }
 0x110   : > { %1912 = vmatprep.subr.bf16.mxu0 %v2137_v36  ;;  %1938 = vmatprep.subr.bf16.mxu1 %v2137_v36  ;;  %v1087_v12 = vunpack.c.h.bf16 %v1045_v8  ;;  %v1086_v16 = vunpack.c.l.bf16 %v1045_v8 }
 0x113   : > { %1914 = vmatpush1.bf16.msra.mxu0 %v1913_v11  ;;  %1954 = vmatpush1.bf16.msra.mxu1 %v1913_v11  ;;  %v1116_v11 = vunpack.c.l.bf16 %v1060_v3 }
 0x114   : > { %1915 = vmatprep.subr.bf16.mxu0 %v2137_v36  ;;  %1939 = vmatprep.subr.bf16.mxu1 %v2137_v36 }
 0x117   : > { %1917 = vmatpush1.bf16.msra.mxu0 %v1916_v14  ;;  %1955 = vmatpush1.bf16.msra.mxu1 %v1916_v14  ;;  %v1046_v14 = vld [vmem:[%s2331_s11 + $0x50] sm:$0xff] }
 0x118   : > { %1918 = vmatprep.subr.bf16.mxu0 %v2137_v36  ;;  %1940 = vmatprep.subr.bf16.mxu1 %v2137_v36  ;;  %v1089_v18 = vunpack.c.h.bf16 %v1046_v14  ;;  %v1088_v22 = vunpack.c.l.bf16 %v1046_v14 }
 0x11b   : > { %1920 = vmatpush1.bf16.msra.mxu0 %v1919_v17  ;;  %1956 = vmatpush1.bf16.msra.mxu1 %v1919_v17  ;;  %v1118_v17 = vunpack.c.l.bf16 %v1061_v9 }
 0x11c   : > { %1921 = vmatprep.subr.bf16.mxu0 %v2137_v36  ;;  %1941 = vmatprep.subr.bf16.mxu1 %v2137_v36 }
 0x11f   : > { %1923 = vmatpush1.bf16.msra.mxu0 %v1922_v20  ;;  %1957 = vmatpush1.bf16.msra.mxu1 %v1922_v20  ;;  %v1047_v20 = vld [vmem:[%s2331_s11 + $0x58] sm:$0xff] }
 0x120   : > { %1924 = vmatprep.subr.bf16.mxu0 %v2137_v36  ;;  %1942 = vmatprep.subr.bf16.mxu1 %v2137_v36  ;;  %v1039_v36 = vld [vmem:[%s2331_s11 + $0x18] sm:$0xff]  ;;  %v1091_v24 = vunpack.c.h.bf16 %v1047_v20 }
 0x121   : > { %v1075_v39 = vunpack.c.h.bf16 %v1039_v36  ;;  %v1074_v43 = vunpack.c.l.bf16 %v1039_v36 }
 0x123   : > { %1926 = vmatpush1.bf16.msra.mxu0 %v1925_v23  ;;  %1958 = vmatpush1.bf16.msra.mxu1 %v1925_v23  ;;  %v1120_v23 = vunpack.c.l.bf16 %v1062_v15 }
 0x126   : > { %1230 = vmatmul.mubr.f32.vlgmr.msra.gmra.mrb[0].mxu0 %v1068_v26  ;;  %1310 = vmatmul.mubr.f32.vlgmr.msra.gmra.mrb[0].mxu1 %v1100_v27  ;;  %v1048_v26 = vld [vmem:[%s2331_s11 + $0x60] sm:$0xff] }
 0x127   : > { %1234 = vmatprep.mubr.f32.mxu0 %v1071_v28  ;;  %1314 = vmatprep.mubr.f32.mxu1 %v1103_v29  ;;  %v1064_v27 = vld [vmem:[%s2331_s11 + $0xe0] sm:$0xff]  ;;  %v1090_v28 = vunpack.c.l.bf16 %v1047_v20  ;;  %v1122_v29 = vunpack.c.l.bf16 %v1063_v21  ;;  %v1093_v30 = vunpack.c.h.bf16 %v1048_v26 }
 0x128   : > { %v1125_v31 = vunpack.c.h.bf16 %v1064_v27  ;;  %v1008_v20 = vld [vmem:[#allocation4 + $0x20] sm:$0xff] }
 0x129   : > { %v1024_v21 = vld [vmem:[#allocation4 + $0xa0] sm:$0xff] }
 0x12a   : > { %1235 = vmatmul.mubr.f32.gmra.mrb[2].mxu0 %v1070_v32  ;;  %1315 = vmatmul.mubr.f32.gmra.mrb[2].mxu1 %v1102_v33  ;;  %v1049_v32 = vld [vmem:[%s2331_s11 + $0x68] sm:$0xff] }
 0x12b   : > { %1239 = vmatprep.mubr.f32.mxu0 %v1073_v53  ;;  %1319 = vmatprep.mubr.f32.mxu1 %v1105_v34  ;;  %v1065_v33 = vld [vmem:[%s2331_s11 + $0xe8] sm:$0xff]  ;;  %v1092_v53 = vunpack.c.l.bf16 %v1048_v26  ;;  %v1124_v34 = vunpack.c.l.bf16 %v1064_v27  ;;  %v1095_v36 = vunpack.c.h.bf16 %v1049_v32 }
 0x12c   : > { %v1127_v37 = vunpack.c.h.bf16 %v1065_v33 }
 0x12e   : > { %1240 = vmatmul.mubr.f32.gmra.mrb[4].mxu0 %v1072_v35  ;;  %1320 = vmatmul.mubr.f32.gmra.mrb[4].mxu1 %v1104_v38  ;;  %v1050_v35 = vld [vmem:[%s2331_s11 + $0x70] sm:$0xff] }
 0x12f   : > { %1244 = vmatprep.mubr.f32.mxu0 %v1075_v39  ;;  %1324 = vmatprep.mubr.f32.mxu1 %v1107_v40  ;;  %v1066_v38 = vld [vmem:[%s2331_s11 + $0xf0] sm:$0xff]  ;;  %v1094_v39 = vunpack.c.l.bf16 %v1049_v32  ;;  %v1126_v40 = vunpack.c.l.bf16 %v1065_v33  ;;  %v1097_v41 = vunpack.c.h.bf16 %v1050_v35 }
 0x130   : > { %v1129_v42 = vunpack.c.h.bf16 %v1066_v38 }
 0x132   : > { %1245 = vmatmul.mubr.f32.gmra.mrb[6].mxu0 %v1074_v43  ;;  %1325 = vmatmul.mubr.f32.gmra.mrb[6].mxu1 %v1106_v44  ;;  %v1051_v43 = vld [vmem:[%s2331_s11 + $0x78] sm:$0xff] }
 0x133   : > { %1249 = vmatprep.mubr.f32.mxu0 %v1077_v45  ;;  %1329 = vmatprep.mubr.f32.mxu1 %v1109_v46  ;;  %v1067_v44 = vld [vmem:[%s2331_s11 + $0xf8] sm:$0xff]  ;;  %v1096_v45 = vunpack.c.l.bf16 %v1050_v35  ;;  %v1128_v46 = vunpack.c.l.bf16 %v1066_v38  ;;  %v1099_v47 = vunpack.c.h.bf16 %v1051_v43  ;;  %s3070_s11 = sshll.u32 (!%p1874_p7), %s2113_s15, 8 }
 0x134   : > { %v1131_v48 = vunpack.c.h.bf16 %v1067_v44  ;;  %s3086_s14 = scalar_lea.vmem (!%p1874_p7), [#allocation2], %s3070_s11  ;;  %s3090_s15 = scalar_lea.vmem (!%p1874_p7), [#allocation3], %s3070_s11 }
 0x135   : > { %s3320_s7 = scalar_lea.vmem (!%p1874_p7), [#allocation5], %s3070_s11 }
 0x136   : > { %1250 = vmatmul.mubr.f32.gmra.mrb[8].mxu0 %v1076_v49  ;;  %1330 = vmatmul.mubr.f32.gmra.mrb[8].mxu1 %v1108_v50  ;;  %v1098_v49 = vunpack.c.l.bf16 %v1051_v43  ;;  %v1130_v50 = vunpack.c.l.bf16 %v1067_v44  ;;  %v1011_v43 = vld [vmem:[#allocation4 + $0x38] sm:$0xff] }
 0x137   : > { %1254 = vmatprep.mubr.f32.mxu0 %v1079_v51  ;;  %1334 = vmatprep.mubr.f32.mxu1 %v1111_v52  ;;  %v1004_v51 = vld [vmem:[#allocation4] sm:$0xff]  ;;  %v1027_v44 = vld [vmem:[#allocation4 + $0xb8] sm:$0xff] }
 0x138   : > { %v1020_v52 = vld [vmem:[#allocation4 + $0x80] sm:$0xff] }
 0x13a   : > { %1255 = vmatmul.mubr.f32.gmra.mrb[10].mxu0 %v1078_v56  ;;  %1335 = vmatmul.mubr.f32.gmra.mrb[10].mxu1 %v1110_v57 }
 0x13b   : > { %1259 = vmatprep.mubr.f32.mxu0 %v1081_v58  ;;  %1339 = vmatprep.mubr.f32.mxu1 %v1113_v59 }
 0x13e   : > { %1260 = vmatmul.mubr.f32.gmra.mrb[12].mxu0 %v1080_v62  ;;  %1340 = vmatmul.mubr.f32.gmra.mrb[12].mxu1 %v1112_v63 }
 0x13f   : > { %1264 = vmatprep.mubr.f32.mxu0 %v1083_v0  ;;  %1344 = vmatprep.mubr.f32.mxu1 %v1115_v1 }
 0x142   : > { %1265 = vmatmul.mubr.f32.gmra.mrb[14].mxu0 %v1082_v4  ;;  %1345 = vmatmul.mubr.f32.gmra.mrb[14].mxu1 %v1114_v5  ;;  %v1006_v4 = vld [vmem:[#allocation4 + $0x10] sm:$0xff] }
 0x143   : > { %1269 = vmatprep.mubr.f32.mxu0 %v1085_v6  ;;  %1349 = vmatprep.mubr.f32.mxu1 %v1117_v7  ;;  %v1022_v5 = vld [vmem:[#allocation4 + $0x90] sm:$0xff] }
 0x146   : > { %1270 = vmatmul.mubr.f32.gmra.mrb[16].mxu0 %v1084_v10  ;;  %1350 = vmatmul.mubr.f32.gmra.mrb[16].mxu1 %v1116_v11 }
 0x147   : > { %1274 = vmatprep.mubr.f32.mxu0 %v1087_v12  ;;  %1354 = vmatprep.mubr.f32.mxu1 %v1119_v13  ;;  %v1007_v12 = vld [vmem:[#allocation4 + $0x18] sm:$0xff] }
 0x148   : > { %v1023_v13 = vld [vmem:[#allocation4 + $0x98] sm:$0xff] }
 0x14a   : > { %1275 = vmatmul.mubr.f32.gmra.mrb[18].mxu0 %v1086_v16  ;;  %1355 = vmatmul.mubr.f32.gmra.mrb[18].mxu1 %v1118_v17 }
 0x14b   : > { %1279 = vmatprep.mubr.f32.mxu0 %v1089_v18  ;;  %1359 = vmatprep.mubr.f32.mxu1 %v1121_v19 }
 0x14e   : > { %1280 = vmatmul.mubr.f32.gmra.mrb[20].mxu0 %v1088_v22  ;;  %1360 = vmatmul.mubr.f32.gmra.mrb[20].mxu1 %v1120_v23 }
 0x14f   : > { %1284 = vmatprep.mubr.f32.mxu0 %v1091_v24  ;;  %1364 = vmatprep.mubr.f32.mxu1 %v1123_v25 }
 0x152   : > { %1285 = vmatmul.mubr.f32.gmra.mrb[22].mxu0 %v1090_v28  ;;  %1365 = vmatmul.mubr.f32.gmra.mrb[22].mxu1 %v1122_v29  ;;  %v1009_v28 = vld [vmem:[#allocation4 + $0x28] sm:$0xff] }
 0x153   : > { %1289 = vmatprep.mubr.f32.mxu0 %v1093_v30  ;;  %1369 = vmatprep.mubr.f32.mxu1 %v1125_v31  ;;  %v1025_v29 = vld [vmem:[#allocation4 + $0xa8] sm:$0xff] }
 0x156   : > { %1290 = vmatmul.mubr.f32.gmra.mrb[24].mxu0 %v1092_v53  ;;  %1370 = vmatmul.mubr.f32.gmra.mrb[24].mxu1 %v1124_v34 }
 0x157   : > { %1294 = vmatprep.mubr.f32.mxu0 %v1095_v36  ;;  %1374 = vmatprep.mubr.f32.mxu1 %v1127_v37  ;;  %v1010_v36 = vld [vmem:[#allocation4 + $0x30] sm:$0xff] }
 0x158   : > { %v1026_v37 = vld [vmem:[#allocation4 + $0xb0] sm:$0xff] }
 0x15a   : > { %1295 = vmatmul.mubr.f32.gmra.mrb[26].mxu0 %v1094_v39  ;;  %1375 = vmatmul.mubr.f32.gmra.mrb[26].mxu1 %v1126_v40 }
 0x15b   : > { %1299 = vmatprep.mubr.f32.mxu0 %v1097_v41  ;;  %1379 = vmatprep.mubr.f32.mxu1 %v1129_v42 }
 0x15e   : > { %1300 = vmatmul.mubr.f32.gmra.mrb[28].mxu0 %v1096_v45  ;;  %1380 = vmatmul.mubr.f32.gmra.mrb[28].mxu1 %v1128_v46 }
 0x15f   : > { %1304 = vmatprep.mubr.f32.mxu0 %v1099_v47  ;;  %1384 = vmatprep.mubr.f32.mxu1 %v1131_v48 }
 0x162   : > { %1305 = vmatmul.mubr.f32.gmra.mrb[30].mxu0 %v1098_v49  ;;  %1385 = vmatmul.mubr.f32.gmra.mrb[30].mxu1 %v1130_v50 }
 0x1f9   : > { %v1231_v54 = vpop.f32.mrb[0].mxu0  ;;  %v1311_v55 = vpop.f32.mrb[0].mxu1 }
 0x1fa   : > { %v1390_v56 = vadd.f32 %v1231_v54, %v1004_v51  ;;  %v1406_v57 = vadd.f32 %v1311_v55, %v1020_v52  ;;  %v1233_v58 = vpop.f32.mrb[1].mxu0  ;;  %v1313_v59 = vpop.f32.mrb[1].mxu1  ;;  %v1012_v51 = vld [vmem:[#allocation4 + $0x40] sm:$0xff] }
 0x1fb   : > { %v1028_v52 = vld [vmem:[#allocation4 + $0xc0] sm:$0xff] }
 0x1fc   : > { %1423 = vst.msk [vmem:[#allocation4] sm:$0xff] %vm1422_vm3, %v1390_v56  ;;  %1439 = vst.msk [vmem:[#allocation4 + $0x80] sm:$0xff] %vm1422_vm3, %v1406_v57 }
 0x1fd   : > { %v1236_v62 = vpop.f32.mrb[2].mxu0  ;;  %v1316_v63 = vpop.f32.mrb[2].mxu1 }
 0x1fe   : > { %v1391_v0 = vadd.f32 %v1236_v62, %v1005_v60  ;;  %v1407_v1 = vadd.f32 %v1316_v63, %v1021_v61  ;;  %v1238_v2 = vpop.f32.mrb[3].mxu0  ;;  %v1318_v3 = vpop.f32.mrb[3].mxu1  ;;  %v1013_v60 = vld [vmem:[#allocation4 + $0x48] sm:$0xff] }
 0x1ff   : > { %v1029_v61 = vld [vmem:[#allocation4 + $0xc8] sm:$0xff] }
 0x200   : > { %1424 = vst.msk [vmem:[#allocation4 + $0x8] sm:$0xff] %vm1422_vm3, %v1391_v0  ;;  %1440 = vst.msk [vmem:[#allocation4 + $0x88] sm:$0xff] %vm1422_vm3, %v1407_v1 }
 0x201   : > { %v1241_v6 = vpop.f32.mrb[4].mxu0  ;;  %v1321_v7 = vpop.f32.mrb[4].mxu1 }
 0x202   : > { %v1392_v8 = vadd.f32 %v1241_v6, %v1006_v4  ;;  %v1408_v9 = vadd.f32 %v1321_v7, %v1022_v5  ;;  %v1243_v10 = vpop.f32.mrb[5].mxu0  ;;  %v1323_v11 = vpop.f32.mrb[5].mxu1  ;;  %v1014_v4 = vld [vmem:[#allocation4 + $0x50] sm:$0xff] }
 0x203   : > { %v1030_v5 = vld [vmem:[#allocation4 + $0xd0] sm:$0xff] }
 0x204   : > { %1425 = vst.msk [vmem:[#allocation4 + $0x10] sm:$0xff] %vm1422_vm3, %v1392_v8  ;;  %1441 = vst.msk [vmem:[#allocation4 + $0x90] sm:$0xff] %vm1422_vm3, %v1408_v9 }
 0x205   : > { %v1246_v14 = vpop.f32.mrb[6].mxu0  ;;  %v1326_v15 = vpop.f32.mrb[6].mxu1 }
 0x206   : > { %v1393_v16 = vadd.f32 %v1246_v14, %v1007_v12  ;;  %v1409_v17 = vadd.f32 %v1326_v15, %v1023_v13  ;;  %v1248_v18 = vpop.f32.mrb[7].mxu0  ;;  %v1328_v19 = vpop.f32.mrb[7].mxu1  ;;  %v1015_v12 = vld [vmem:[#allocation4 + $0x58] sm:$0xff] }
 0x207   : > { %v1031_v13 = vld [vmem:[#allocation4 + $0xd8] sm:$0xff] }
 0x208   : > { %1426 = vst.msk [vmem:[#allocation4 + $0x18] sm:$0xff] %vm1422_vm3, %v1393_v16  ;;  %1442 = vst.msk [vmem:[#allocation4 + $0x98] sm:$0xff] %vm1422_vm3, %v1409_v17 }
 0x209   : > { %v1251_v22 = vpop.f32.mrb[8].mxu0  ;;  %v1331_v23 = vpop.f32.mrb[8].mxu1 }
 0x20a   : > { %v1394_v24 = vadd.f32 %v1251_v22, %v1008_v20  ;;  %v1410_v25 = vadd.f32 %v1331_v23, %v1024_v21  ;;  %v1253_v26 = vpop.f32.mrb[9].mxu0  ;;  %v1333_v27 = vpop.f32.mrb[9].mxu1  ;;  %v1016_v20 = vld [vmem:[#allocation4 + $0x60] sm:$0xff] }
 0x20b   : > { %v1032_v21 = vld [vmem:[#allocation4 + $0xe0] sm:$0xff] }
 0x20c   : > { %1427 = vst.msk [vmem:[#allocation4 + $0x20] sm:$0xff] %vm1422_vm3, %v1394_v24  ;;  %1443 = vst.msk [vmem:[#allocation4 + $0xa0] sm:$0xff] %vm1422_vm3, %v1410_v25 }
 0x20d   : > { %v1256_v30 = vpop.f32.mrb[10].mxu0  ;;  %v1336_v31 = vpop.f32.mrb[10].mxu1 }
 0x20e   : > { %v1395_v32 = vadd.f32 %v1256_v30, %v1009_v28  ;;  %v1411_v33 = vadd.f32 %v1336_v31, %v1025_v29  ;;  %v1258_v53 = vpop.f32.mrb[11].mxu0  ;;  %v1338_v34 = vpop.f32.mrb[11].mxu1  ;;  %v1017_v28 = vld [vmem:[#allocation4 + $0x68] sm:$0xff] }
 0x20f   : > { %v1033_v29 = vld [vmem:[#allocation4 + $0xe8] sm:$0xff] }
 0x210   : > { %1428 = vst.msk [vmem:[#allocation4 + $0x28] sm:$0xff] %vm1422_vm3, %v1395_v32  ;;  %1444 = vst.msk [vmem:[#allocation4 + $0xa8] sm:$0xff] %vm1422_vm3, %v1411_v33 }
 0x211   : > { %v1261_v35 = vpop.f32.mrb[12].mxu0  ;;  %v1341_v38 = vpop.f32.mrb[12].mxu1 }
 0x212   : > { %v1396_v39 = vadd.f32 %v1261_v35, %v1010_v36  ;;  %v1412_v40 = vadd.f32 %v1341_v38, %v1026_v37  ;;  %v1263_v41 = vpop.f32.mrb[13].mxu0  ;;  %v1343_v42 = vpop.f32.mrb[13].mxu1  ;;  %v1018_v36 = vld [vmem:[#allocation4 + $0x70] sm:$0xff] }
 0x213   : > { %v1034_v37 = vld [vmem:[#allocation4 + $0xf0] sm:$0xff] }
 0x214   : > { %1429 = vst.msk [vmem:[#allocation4 + $0x30] sm:$0xff] %vm1422_vm3, %v1396_v39  ;;  %1445 = vst.msk [vmem:[#allocation4 + $0xb0] sm:$0xff] %vm1422_vm3, %v1412_v40 }
 0x215   : > { %v1266_v45 = vpop.f32.mrb[14].mxu0  ;;  %v1346_v46 = vpop.f32.mrb[14].mxu1 }
 0x216   : > { %v1397_v47 = vadd.f32 %v1266_v45, %v1011_v43  ;;  %v1413_v48 = vadd.f32 %v1346_v46, %v1027_v44  ;;  %v1268_v49 = vpop.f32.mrb[15].mxu0  ;;  %v1348_v50 = vpop.f32.mrb[15].mxu1  ;;  %v1019_v43 = vld [vmem:[#allocation4 + $0x78] sm:$0xff] }
 0x217   : > { %v1035_v44 = vld [vmem:[#allocation4 + $0xf8] sm:$0xff] }
 0x218   : > { %1430 = vst.msk [vmem:[#allocation4 + $0x38] sm:$0xff] %vm1422_vm3, %v1397_v47  ;;  %1446 = vst.msk [vmem:[#allocation4 + $0xb8] sm:$0xff] %vm1422_vm3, %v1413_v48 }
 0x219   : > { %v1271_v54 = vpop.f32.mrb[16].mxu0  ;;  %v1351_v55 = vpop.f32.mrb[16].mxu1 }
 0x21a   : > { %v1398_v56 = vadd.f32 %v1271_v54, %v1012_v51  ;;  %v1414_v57 = vadd.f32 %v1351_v55, %v1028_v52  ;;  %v1273_v58 = vpop.f32.mrb[17].mxu0  ;;  %v1353_v59 = vpop.f32.mrb[17].mxu1  ;;  %v3072_v51 = vld [vmem:[#allocation4] sm:$0xff] (!%p1874_p7)  ;;  %v3075_v52 = vld [vmem:[#allocation4 + $0x8] sm:$0xff] (!%p1874_p7)  ;;  %v3077_v54 = vld [vmem:[#allocation4 + $0x10] sm:$0xff] (!%p1874_p7) }
 0x21b   : > { %v3079_v55 = vld [vmem:[#allocation4 + $0x18] sm:$0xff] (!%p1874_p7)  ;;  %v1493_v58 = vld [vmem:[%s3086_s14] sm:$0xff] (!%p1874_p7)  ;;  %1558 = vst.msk [vmem:[%s3090_s15] sm:$0xff] (!%p1874_p7), %vm1422_vm3, %v3072_v51  ;;  %v1494_v59 = vld [vmem:[%s3086_s14 + $0x8] sm:$0xff] (!%p1874_p7) }
 0x21c   : > { %1431 = vst.msk [vmem:[#allocation4 + $0x40] sm:$0xff] %vm1422_vm3, %v1398_v56  ;;  %1447 = vst.msk [vmem:[#allocation4 + $0xc0] sm:$0xff] %vm1422_vm3, %v1414_v57  ;;  %v3081_v56 = vld [vmem:[#allocation4 + $0x20] sm:$0xff] (!%p1874_p7)  ;;  %v3083_v57 = vld [vmem:[#allocation4 + $0x28] sm:$0xff] (!%p1874_p7) }
 0x21d   : > { %v1276_v62 = vpop.f32.mrb[18].mxu0  ;;  %v1356_v63 = vpop.f32.mrb[18].mxu1  ;;  %1559 = vst.msk [vmem:[%s3090_s15 + $0x8] sm:$0xff] (!%p1874_p7), %vm1422_vm3, %v3075_v52  ;;  %1560 = vst.msk [vmem:[%s3090_s15 + $0x10] sm:$0xff] (!%p1874_p7), %vm1422_vm3, %v3077_v54 }
 0x21e   : > { %v1399_v0 = vadd.f32 %v1276_v62, %v1013_v60  ;;  %v1415_v1 = vadd.f32 %v1356_v63, %v1029_v61  ;;  %v1278_v2 = vpop.f32.mrb[19].mxu0  ;;  %v1358_v3 = vpop.f32.mrb[19].mxu1  ;;  %v1495_v60 = vld [vmem:[%s3086_s14 + $0x10] sm:$0xff] (!%p1874_p7)  ;;  %1561 = vst.msk [vmem:[%s3090_s15 + $0x18] sm:$0xff] (!%p1874_p7), %vm1422_vm3, %v3079_v55  ;;  %1562 = vst.msk [vmem:[%s3090_s15 + $0x20] sm:$0xff] (!%p1874_p7), %vm1422_vm3, %v3081_v56  ;;  %v1496_v61 = vld [vmem:[%s3086_s14 + $0x18] sm:$0xff] (!%p1874_p7) }
 0x21f   : > { %1563 = vst.msk [vmem:[%s3090_s15 + $0x28] sm:$0xff] (!%p1874_p7), %vm1422_vm3, %v3083_v57  ;;  %v1497_v62 = vld [vmem:[%s3086_s14 + $0x20] sm:$0xff] (!%p1874_p7)  ;;  %v1498_v63 = vld [vmem:[%s3086_s14 + $0x28] sm:$0xff] (!%p1874_p7)  ;;  %v1467_v2 = vld [vmem:[#allocation4 + $0x38] sm:$0xff] (!%p1874_p7) }
 0x220   : > { %1432 = vst.msk [vmem:[#allocation4 + $0x48] sm:$0xff] %vm1422_vm3, %v1399_v0  ;;  %1448 = vst.msk [vmem:[#allocation4 + $0xc8] sm:$0xff] %vm1422_vm3, %v1415_v1  ;;  %v1466_v0 = vld [vmem:[#allocation4 + $0x30] sm:$0xff] (!%p1874_p7)  ;;  %v1500_v3 = vld [vmem:[%s3086_s14 + $0x38] sm:$0xff] (!%p1874_p7) }
 0x221   : > { %v1281_v6 = vpop.f32.mrb[20].mxu0  ;;  %v1361_v7 = vpop.f32.mrb[20].mxu1  ;;  %v1499_v1 = vld [vmem:[%s3086_s14 + $0x30] sm:$0xff] (!%p1874_p7)  ;;  %1564 = vst.msk [vmem:[%s3090_s15 + $0x30] sm:$0xff] (!%p1874_p7), %vm1422_vm3, %v1466_v0  ;;  %1565 = vst.msk [vmem:[%s3090_s15 + $0x38] sm:$0xff] (!%p1874_p7), %vm1422_vm3, %v1467_v2 }
 0x222   : > { %v1400_v8 = vadd.f32 %v1281_v6, %v1014_v4  ;;  %v1416_v9 = vadd.f32 %v1361_v7, %v1030_v5  ;;  %v1283_v10 = vpop.f32.mrb[21].mxu0  ;;  %v1363_v11 = vpop.f32.mrb[21].mxu1  ;;  %v1501_v5 = vld [vmem:[%s3086_s14 + $0x40] sm:$0xff] (!%p1874_p7)  ;;  %v3129_v7 = vld [vmem:[%s3086_s14 + $0x48] sm:$0xff] (!%p1874_p7) }
 0x223   : > { %v1468_v4 = vld [vmem:[#allocation4 + $0x40] sm:$0xff] (!%p1874_p7)  ;;  %v1526_v10 = vsub.f32 (!%p1874_p7), %v1494_v59, %v3075_v52  ;;  %v1527_v11 = vsub.f32 (!%p1874_p7), %v1495_v60, %v3077_v54  ;;  %v1481_v59 = vld [vmem:[#allocation4 + $0xa8] sm:$0xff] (!%p1874_p7) }
 0x224   : > { %1433 = vst.msk [vmem:[#allocation4 + $0x50] sm:$0xff] %vm1422_vm3, %v1400_v8  ;;  %1449 = vst.msk [vmem:[#allocation4 + $0xd0] sm:$0xff] %vm1422_vm3, %v1416_v9  ;;  %v1525_v9 = vsub.f32 (!%p1874_p7), %v1493_v58, %v3072_v51  ;;  %v1512_v51 = vld [vmem:[%s3086_s14 + $0x98] sm:$0xff] (!%p1874_p7)  ;;  %v1480_v52 = vld [vmem:[#allocation4 + $0xa0] sm:$0xff] (!%p1874_p7) }
 0x225   : > { %v1286_v14 = vpop.f32.mrb[22].mxu0  ;;  %v1366_v15 = vpop.f32.mrb[22].mxu1  ;;  %1566 = vst.msk [vmem:[%s3090_s15 + $0x40] sm:$0xff] (!%p1874_p7), %vm1422_vm3, %v1468_v4  ;;  %v1513_v54 = vld [vmem:[%s3086_s14 + $0xa0] sm:$0xff] (!%p1874_p7)  ;;  %1578 = vst.msk [vmem:[%s3090_s15 + $0xa0] sm:$0xff] (!%p1874_p7), %vm1422_vm3, %v1480_v52  ;;  %v1514_v60 = vld [vmem:[%s3086_s14 + $0xa8] sm:$0xff] (!%p1874_p7) }
 0x226   : > { %v1401_v16 = vadd.f32 %v1286_v14, %v1015_v12  ;;  %v1417_v17 = vadd.f32 %v1366_v15, %v1031_v13  ;;  %v1288_v18 = vpop.f32.mrb[23].mxu0  ;;  %v1368_v19 = vpop.f32.mrb[23].mxu1  ;;  %v1528_v12 = vsub.f32 (!%p1874_p7), %v1496_v61, %v3079_v55  ;;  %v1503_v13 = vld [vmem:[%s3086_s14 + $0x50] sm:$0xff] (!%p1874_p7)  ;;  %v1504_v15 = vld [vmem:[%s3086_s14 + $0x58] sm:$0xff] (!%p1874_p7)  ;;  %1579 = vst.msk [vmem:[%s3090_s15 + $0xa8] sm:$0xff] (!%p1874_p7), %vm1422_vm3, %v1481_v59 }
 0x227   : > { %v3126_v6 = vld [vmem:[#allocation4 + $0x48] sm:$0xff] (!%p1874_p7)  ;;  %v1530_v18 = vsub.f32 (!%p1874_p7), %v1498_v63, %v3083_v57  ;;  %v1531_v19 = vsub.f32 (!%p1874_p7), %v1499_v1, %v1466_v0  ;;  %v1482_v61 = vld [vmem:[#allocation4 + $0xb0] sm:$0xff] (!%p1874_p7) }
 0x228   : > { %1434 = vst.msk [vmem:[#allocation4 + $0x58] sm:$0xff] %vm1422_vm3, %v1401_v16  ;;  %1450 = vst.msk [vmem:[#allocation4 + $0xd8] sm:$0xff] %vm1422_vm3, %v1417_v17  ;;  %v3146_v16 = vstv (!%p1874_p7), %s3095_s16  ;;  %v1529_v17 = vsub.f32 (!%p1874_p7), %v1497_v62, %v3081_v56 }
 0x229   : > { %v1291_v22 = vpop.f32.mrb[24].mxu0  ;;  %v1371_v23 = vpop.f32.mrb[24].mxu1  ;;  %1567 = vst.msk [vmem:[%s3090_s15 + $0x48] sm:$0xff] (!%p1874_p7), %vm1422_vm3, %v3126_v6  ;;  %1580 = vst.msk [vmem:[%s3090_s15 + $0xb0] sm:$0xff] (!%p1874_p7), %vm1422_vm3, %v1482_v61 }
 0x22a   : > { %v1402_v24 = vadd.f32 %v1291_v22, %v1016_v20  ;;  %v1418_v25 = vadd.f32 %v1371_v23, %v1032_v21  ;;  %v1293_v26 = vpop.f32.mrb[25].mxu0  ;;  %v1373_v27 = vpop.f32.mrb[25].mxu1  ;;  %v1505_v21 = vld [vmem:[%s3086_s14 + $0x60] sm:$0xff] (!%p1874_p7)  ;;  %v1532_v23 = vsub.f32 (!%p1874_p7), %v1500_v3, %v1467_v2  ;;  %v1515_v2 = vld [vmem:[%s3086_s14 + $0xb0] sm:$0xff] (!%p1874_p7)  ;;  %v1483_v3 = vld [vmem:[#allocation4 + $0xb8] sm:$0xff] (!%p1874_p7) }
 0x22b   : > { %v3131_v8 = vld [vmem:[#allocation4 + $0x50] sm:$0xff] (!%p1874_p7)  ;;  %1581 = vst.msk [vmem:[%s3090_s15 + $0xb8] sm:$0xff] (!%p1874_p7), %vm1422_vm3, %v1483_v3 }
 0x22c   : > { %1435 = vst.msk [vmem:[#allocation4 + $0x60] sm:$0xff] %vm1422_vm3, %v1402_v24  ;;  %1451 = vst.msk [vmem:[#allocation4 + $0xe0] sm:$0xff] %vm1422_vm3, %v1418_v25  ;;  %v1533_v24 = vsub.f32 (!%p1874_p7), %v1501_v5, %v1468_v4  ;;  %v3158_v25 = vld [vmem:[%s3086_s14 + $0x68] sm:$0xff] (!%p1874_p7)  ;;  %v1507_v27 = vld [vmem:[%s3086_s14 + $0x70] sm:$0xff] (!%p1874_p7) }
 0x22d   : > { %v1296_v30 = vpop.f32.mrb[26].mxu0  ;;  %v1376_v31 = vpop.f32.mrb[26].mxu1  ;;  %1568 = vst.msk [vmem:[%s3090_s15 + $0x50] sm:$0xff] (!%p1874_p7), %vm1422_vm3, %v3131_v8  ;;  %v1516_v4 = vld [vmem:[%s3086_s14 + $0xb8] sm:$0xff] (!%p1874_p7) }
 0x22e   : > { %v1403_v32 = vadd.f32 %v1296_v30, %v1017_v28  ;;  %v1419_v33 = vadd.f32 %v1376_v31, %v1033_v29  ;;  %v1298_v53 = vpop.f32.mrb[27].mxu0  ;;  %v1378_v34 = vpop.f32.mrb[27].mxu1  ;;  %v1534_v28 = vsub.f32 (!%p1874_p7), %v3129_v7, %v3126_v6  ;;  %v1535_v29 = vsub.f32 (!%p1874_p7), %v1503_v13, %v3131_v8 }
 0x22f   : > { %v1471_v14 = vld [vmem:[#allocation4 + $0x58] sm:$0xff] (!%p1874_p7)  ;;  %v3177_v53 = vmul.f32 (!%p1874_p7), %v3146_v16, %v1525_v9  ;;  %v3180_v34 = vmul.f32 (!%p1874_p7), %v3146_v16, %v1526_v10  ;;  %v1545_v6 = vsub.f32 (!%p1874_p7), %v1513_v54, %v1480_v52  ;;  %v1546_v7 = vsub.f32 (!%p1874_p7), %v1514_v60, %v1481_v59  ;;  %v1484_v9 = vld [vmem:[#allocation4 + $0xc0] sm:$0xff] (!%p1874_p7) }
 0x230   : > { %1436 = vst.msk [vmem:[#allocation4 + $0x68] sm:$0xff] %vm1422_vm3, %v1403_v32  ;;  %1452 = vst.msk [vmem:[#allocation4 + $0xe8] sm:$0xff] %vm1422_vm3, %v1419_v33  ;;  %v1536_v30 = vsub.f32 (!%p1874_p7), %v1504_v15, %v1471_v14  ;;  %v3172_v32 = vld [vmem:[%s3086_s14 + $0x78] sm:$0xff] (!%p1874_p7)  ;;  %v3174_v33 = vld [vmem:[#allocation4 + $0x80] sm:$0xff] (!%p1874_p7)  ;;  %v3229_v62 = vmul.f32 (!%p1874_p7), %v3146_v16, %v1534_v28  ;;  %v3232_v63 = vmul.f32 (!%p1874_p7), %v3146_v16, %v1535_v29 }
 0x231   : > { %v1301_v35 = vpop.f32.mrb[28].mxu0  ;;  %v1381_v38 = vpop.f32.mrb[28].mxu1  ;;  %1569 = vst.msk [vmem:[%s3090_s15 + $0x58] sm:$0xff] (!%p1874_p7), %vm1422_vm3, %v1471_v14  ;;  %1574 = vst.msk [vmem:[%s3090_s15 + $0x80] sm:$0xff] (!%p1874_p7), %vm1422_vm3, %v3174_v33  ;;  %v1547_v8 = vsub.f32 (!%p1874_p7), %v1515_v2, %v1482_v61  ;;  %v1517_v10 = vld [vmem:[%s3086_s14 + $0xc0] sm:$0xff] (!%p1874_p7)  ;;  %v1548_v14 = vsub.f32 (!%p1874_p7), %v1516_v4, %v1483_v3  ;;  %v3314_v54 = vld [vmem:[%s3086_s14 + $0xf8] sm:$0xff] (!%p1874_p7) }
 0x232   : > { %v1404_v39 = vadd.f32 %v1301_v35, %v1018_v36  ;;  %v1420_v40 = vadd.f32 %v1381_v38, %v1034_v37  ;;  %v1303_v41 = vpop.f32.mrb[29].mxu0  ;;  %v1383_v42 = vpop.f32.mrb[29].mxu1  ;;  %1458 = sbr.rel (%p1874_p7) target bundleno = 608 (0x260), region = 90  ;;  %v3183_v36 = vmul.f32 (!%p1874_p7), %v3146_v16, %v1527_v11  ;;  %v3186_v37 = vmul.f32 (!%p1874_p7), %v3146_v16, %v1528_v12  ;;  %v1509_v35 = vld [vmem:[%s3086_s14 + $0x80] sm:$0xff] (!%p1874_p7)  ;;  %v1477_v38 = vld [vmem:[#allocation4 + $0x88] sm:$0xff] (!%p1874_p7)  ;;  %1582 = vst.msk [vmem:[%s3090_s15 + $0xc0] sm:$0xff] (!%p1874_p7), %vm1422_vm3, %v1484_v9 }
 0x233   : > { %v1472_v20 = vld [vmem:[#allocation4 + $0x60] sm:$0xff] (!%p1874_p7)  ;;  %v3200_v41 = vmul.f32 (!%p1874_p7), %v3146_v16, %v1530_v18  ;;  %v3203_v42 = vmul.f32 (!%p1874_p7), %v3146_v16, %v1531_v19  ;;  %1575 = vst.msk [vmem:[%s3090_s15 + $0x88] sm:$0xff] (!%p1874_p7), %vm1422_vm3, %v1477_v38  ;;  %v1541_v56 = vsub.f32 (!%p1874_p7), %v1509_v35, %v3174_v33  ;;  %v3235_v0 = vmul.f32 (!%p1874_p7), %v3146_v16, %v1536_v30  ;;  %v1485_v11 = vld [vmem:[#allocation4 + $0xc8] sm:$0xff] (!%p1874_p7)  ;;  %v1486_v18 = vld [vmem:[#allocation4 + $0xd0] sm:$0xff] (!%p1874_p7) }
 0x234   : > { %1437 = vst.msk [vmem:[#allocation4 + $0x70] sm:$0xff] %vm1422_vm3, %v1404_v39  ;;  %1453 = vst.msk [vmem:[#allocation4 + $0xf0] sm:$0xff] %vm1422_vm3, %v1420_v40  ;;  %v1510_v39 = vld [vmem:[%s3086_s14 + $0x88] sm:$0xff] (!%p1874_p7)  ;;  %v3197_v40 = vmul.f32 (!%p1874_p7), %v3146_v16, %v1529_v17  ;;  %v1549_v15 = vsub.f32 (!%p1874_p7), %v1517_v10, %v1484_v9  ;;  %v1519_v19 = vld [vmem:[%s3086_s14 + $0xd0] sm:$0xff] (!%p1874_p7)  ;;  %v3286_v35 = vmul.f32 (!%p1874_p7), %v3146_v16, %v1545_v6 }
 0x235   : > { %v1306_v45 = vpop.f32.mrb[30].mxu0  ;;  %v1386_v46 = vpop.f32.mrb[30].mxu1  ;;  %1570 = vst.msk [vmem:[%s3090_s15 + $0x60] sm:$0xff] (!%p1874_p7), %vm1422_vm3, %v1472_v20  ;;  %v1542_v57 = vsub.f32 (!%p1874_p7), %v1510_v39, %v1477_v38  ;;  %v1518_v17 = vld [vmem:[%s3086_s14 + $0xc8] sm:$0xff] (!%p1874_p7)  ;;  %1583 = vst.msk [vmem:[%s3090_s15 + $0xc8] sm:$0xff] (!%p1874_p7), %vm1422_vm3, %v1485_v11  ;;  %v1551_v29 = vsub.f32 (!%p1874_p7), %v1519_v19, %v1486_v18  ;;  %v3289_v38 = vmul.f32 (!%p1874_p7), %v3146_v16, %v1546_v7  ;;  %v1593_v61 = vld [vmem:[%s3320_s7 + $0x10] sm:$0xff] (!%p1874_p7) }
 0x236   : > { %v1405_v47 = vadd.f32 %v1306_v45, %v1019_v43  ;;  %v1421_v48 = vadd.f32 %v1386_v46, %v1035_v44  ;;  %v1308_v49 = vpop.f32.mrb[31].mxu0  ;;  %v1388_v50 = vpop.f32.mrb[31].mxu1  ;;  %v1537_v43 = vsub.f32 (!%p1874_p7), %v1505_v21, %v1472_v20  ;;  %v1478_v44 = vld [vmem:[#allocation4 + $0x90] sm:$0xff] (!%p1874_p7)  ;;  %v1479_v46 = vld [vmem:[#allocation4 + $0x98] sm:$0xff] (!%p1874_p7)  ;;  %v3265_v21 = vmul.f32 (!%p1874_p7), %v3146_v16, %v1541_v56  ;;  %1584 = vst.msk [vmem:[%s3090_s15 + $0xd0] sm:$0xff] (!%p1874_p7), %vm1422_vm3, %v1486_v18  ;;  %v1522_v33 = vld [vmem:[%s3086_s14 + $0xe8] sm:$0xff] (!%p1874_p7) }
 0x237   : > { %v3153_v22 = vld [vmem:[#allocation4 + $0x68] sm:$0xff] (!%p1874_p7)  ;;  %v1511_v45 = vld [vmem:[%s3086_s14 + $0x90] sm:$0xff] (!%p1874_p7)  ;;  %1576 = vst.msk [vmem:[%s3090_s15 + $0x90] sm:$0xff] (!%p1874_p7), %vm1422_vm3, %v1478_v44  ;;  %1577 = vst.msk [vmem:[%s3090_s15 + $0x98] sm:$0xff] (!%p1874_p7), %vm1422_vm3, %v1479_v46  ;;  %v1544_v1 = vsub.f32 (!%p1874_p7), %v1512_v51, %v1479_v46  ;;  %v1550_v28 = vsub.f32 (!%p1874_p7), %v1518_v17, %v1485_v11  ;;  %v3292_v39 = vmul.f32 (!%p1874_p7), %v3146_v16, %v1547_v8 }
 0x238   : > { %1438 = vst.msk [vmem:[#allocation4 + $0x78] sm:$0xff] %vm1422_vm3, %v1405_v47  ;;  %1454 = vst.msk [vmem:[#allocation4 + $0xf8] sm:$0xff] %vm1422_vm3, %v1421_v48  ;;  %v3209_v47 = vmul.f32 (!%p1874_p7), %v3146_v16, %v1532_v23  ;;  %v3212_v48 = vmul.f32 (!%p1874_p7), %v3146_v16, %v1533_v24  ;;  %v1538_v49 = vsub.f32 (!%p1874_p7), %v3158_v25, %v3153_v22  ;;  %v1487_v24 = vld [vmem:[#allocation4 + $0xd8] sm:$0xff] (!%p1874_p7)  ;;  %v1592_v56 = vld [vmem:[%s3320_s7 + $0x8] sm:$0xff] (!%p1874_p7) }
 0x239   : > { %1571 = vst.msk [vmem:[%s3090_s15 + $0x68] sm:$0xff] %vm1422_vm3, %v3153_v22  ;;  %v1543_v58 = vsub.f32 %v1511_v45, %v1478_v44  ;;  %v3244_v5 = vmul.f32 %v3146_v16, %v1537_v43  ;;  %v3268_v22 = vmul.f32 %v3146_v16, %v1542_v57  ;;  %v1520_v25 = vld [vmem:[%s3086_s14 + $0xd8] sm:$0xff]  ;;  %1585 = vst.msk [vmem:[%s3090_s15 + $0xd8] sm:$0xff] %vm1422_vm3, %v1487_v24  ;;  %v1523_v45 = vld [vmem:[%s3086_s14 + $0xf0] sm:$0xff] }
 0x23a   : > { %v3250_v12 = vmul.f32 %v3146_v16, %v1538_v49  ;;  %v1552_v30 = vsub.f32 %v1520_v25, %v1487_v24  ;;  %v3302_v49 = vmul.f32 %v3146_v16, %v1548_v14  ;;  %v3308_v51 = vmul.f32 %v3146_v16, %v1550_v28  ;;  %v1595_v2 = vld [vmem:[%s3320_s7 + $0x20] sm:$0xff]  ;;  %v1597_v8 = vld [vmem:[%s3320_s7 + $0x30] sm:$0xff]  ;;  %v1598_v9 = vld [vmem:[%s3320_s7 + $0x38] sm:$0xff] }
 0x23b   : > { %v1474_v26 = vld [vmem:[#allocation4 + $0x70] sm:$0xff]  ;;  %v3271_v23 = vmul.f32 %v3146_v16, %v1543_v58  ;;  %v3325_v57 = vmul.f32 %v3146_v16, %v1551_v29  ;;  %v1659_v4 = vadd.f32 %v3180_v34, %v1592_v56  ;;  %v1660_v6 = vadd.f32 %v3183_v36, %v1593_v61  ;;  %v1599_v11 = vld [vmem:[%s3320_s7 + $0x40] sm:$0xff]  ;;  %v1600_v14 = vld [vmem:[%s3320_s7 + $0x48] sm:$0xff] }
 0x23c   : > { %1572 = vst.msk [vmem:[%s3090_s15 + $0x70] sm:$0xff] %vm1422_vm3, %v1474_v26  ;;  %v1539_v50 = vsub.f32 %v1507_v27, %v1474_v26  ;;  %v1488_v26 = vld [vmem:[#allocation4 + $0xe0] sm:$0xff]  ;;  %v3277_v27 = vmul.f32 %v3146_v16, %v1544_v1  ;;  %v3296_v44 = vld [vmem:[#allocation4 + $0xf0] sm:$0xff]  ;;  %v3328_v58 = vmul.f32 %v3146_v16, %v1552_v30  ;;  %v1594_v1 = vld [vmem:[%s3320_s7 + $0x18] sm:$0xff]  ;;  %v1662_v34 = vadd.f32 %v3197_v40, %v1595_v2 }
 0x23d   : > { %1586 = vst.msk [vmem:[%s3090_s15 + $0xe0] sm:$0xff] %vm1422_vm3, %v1488_v26  ;;  %1588 = vst.msk [vmem:[%s3090_s15 + $0xf0] sm:$0xff] %vm1422_vm3, %v3296_v44  ;;  %v1555_v59 = vsub.f32 %v1523_v45, %v3296_v44  ;;  %v1661_v7 = vadd.f32 %v3186_v37, %v1594_v1  ;;  %v1664_v37 = vadd.f32 %v3203_v42, %v1597_v8  ;;  %v1602_v18 = vld [vmem:[%s3320_s7 + $0x58] sm:$0xff]  ;;  %v1603_v19 = vld [vmem:[%s3320_s7 + $0x60] sm:$0xff] }
 0x23e   : > { %v3253_v13 = vmul.f32 %v3146_v16, %v1539_v50  ;;  %v3305_v50 = vmul.f32 %v3146_v16, %v1549_v15  ;;  %v1601_v15 = vld [vmem:[%s3320_s7 + $0x50] sm:$0xff]  ;;  %1691 = vst.msk [vmem:[%s3320_s7 + $0x8] sm:$0xff] %vm1422_vm3, %v1659_v4  ;;  %1723 = vst.msk [vmem:[%s2342_s25 + $0x8] sm:$0xff] %vm1422_vm3, %v1659_v4  ;;  %v1665_v40 = vadd.f32 %v3209_v47, %v1598_v9  ;;  %v1604_v24 = vld [vmem:[%s3320_s7 + $0x68] sm:$0xff] }
 0x23f   : > { %v3169_v31 = vld [vmem:[#allocation4 + $0x78] sm:$0xff]  ;;  %1692 = vst.msk [vmem:[%s3320_s7 + $0x10] sm:$0xff] %vm1422_vm3, %v1660_v6  ;;  %1724 = vst.msk [vmem:[%s2342_s25 + $0x10] sm:$0xff] %vm1422_vm3, %v1660_v6  ;;  %v1667_v42 = vadd.f32 %v3229_v62, %v1600_v14  ;;  %v1668_v17 = vadd.f32 %v3232_v63, %v1601_v15  ;;  %v1669_v47 = vadd.f32 %v3235_v0, %v1602_v18  ;;  %v1605_v63 = vld [vmem:[%s3320_s7 + $0x70] sm:$0xff] }
 0x240   : > { %1573 = vst.msk [vmem:[%s3090_s15 + $0x78] sm:$0xff] %vm1422_vm3, %v3169_v31  ;;  %v1540_v55 = vsub.f32 %v3172_v32, %v3169_v31  ;;  %v1521_v31 = vld [vmem:[%s3086_s14 + $0xe0] sm:$0xff]  ;;  %v1489_v32 = vld [vmem:[#allocation4 + $0xe8] sm:$0xff]  ;;  %v3299_v46 = vld [vmem:[#allocation4 + $0xf8] sm:$0xff]  ;;  %v1671_v62 = vadd.f32 %v3250_v12, %v1604_v24  ;;  %v3397_v29 = vmul.f32 %v3146_v16, %v1555_v59  ;;  %v1672_v0 = vadd.f32 %v3253_v13, %v1605_v63 }
 0x241   : > { %v1553_v43 = vsub.f32 %v1521_v31, %v1488_v26  ;;  %1587 = vst.msk [vmem:[%s3090_s15 + $0xe8] sm:$0xff] %vm1422_vm3, %v1489_v32  ;;  %v1554_v52 = vsub.f32 %v1522_v33, %v1489_v32  ;;  %1589 = vst.msk [vmem:[%s3090_s15 + $0xf8] sm:$0xff] %vm1422_vm3, %v3299_v46  ;;  %v1556_v10 = vsub.f32 %v3314_v54, %v3299_v46  ;;  %v1606_v26 = vld [vmem:[%s3320_s7 + $0x78] sm:$0xff]  ;;  %v1607_v28 = vld [vmem:[%s3320_s7 + $0x80] sm:$0xff] }
 0x242   : > { %v3262_v20 = vmul.f32 %v3146_v16, %v1540_v55  ;;  %v1591_v55 = vld [vmem:[%s3320_s7] sm:$0xff]  ;;  %1693 = vst.msk [vmem:[%s3320_s7 + $0x18] sm:$0xff] %vm1422_vm3, %v1661_v7  ;;  %1725 = vst.msk [vmem:[%s2342_s25 + $0x18] sm:$0xff] %vm1422_vm3, %v1661_v7  ;;  %v1674_v12 = vadd.f32 %v3265_v21, %v1607_v28  ;;  %v1608_v30 = vld [vmem:[%s3320_s7 + $0x88] sm:$0xff] }
 0x243   : > { %v1658_v60 = vadd.f32 %v3177_v53, %v1591_v55  ;;  %v3336_v3 = vmul.f32 %v3146_v16, %v1553_v43  ;;  %v1596_v53 = vld [vmem:[%s3320_s7 + $0x28] sm:$0xff]  ;;  %v3376_v25 = vmul.f32 %v3146_v16, %v1554_v52  ;;  %1694 = vst.msk [vmem:[%s3320_s7 + $0x20] sm:$0xff] %vm1422_vm3, %v1662_v34  ;;  %1726 = vst.msk [vmem:[%s2342_s25 + $0x20] sm:$0xff] %vm1422_vm3, %v1662_v34  ;;  %v1609_v31 = vld [vmem:[%s3320_s7 + $0x90] sm:$0xff] }
 0x244   : > { %v1663_v36 = vadd.f32 %v3200_v41, %v1596_v53  ;;  %v1666_v41 = vadd.f32 %v3212_v48, %v1599_v11  ;;  %1696 = vst.msk [vmem:[%s3320_s7 + $0x30] sm:$0xff] %vm1422_vm3, %v1664_v37  ;;  %1728 = vst.msk [vmem:[%s2342_s25 + $0x30] sm:$0xff] %vm1422_vm3, %v1664_v37  ;;  %v1670_v48 = vadd.f32 %v3244_v5, %v1603_v19  ;;  %v1610_v32 = vld [vmem:[%s3320_s7 + $0x98] sm:$0xff]  ;;  %v1611_v21 = vld [vmem:[%s3320_s7 + $0xa0] sm:$0xff] }
 0x245   : > { %1690 = vst.msk [vmem:[%s3320_s7] sm:$0xff] %vm1422_vm3, %v1658_v60  ;;  %1722 = vst.msk [vmem:[%s2342_s25] sm:$0xff] %vm1422_vm3, %v1658_v60  ;;  %v1673_v5 = vadd.f32 %v3262_v20, %v1606_v26  ;;  %v1657_v33 = vmul.f32 %v3146_v16, %v1556_v10  ;;  %v1675_v13 = vadd.f32 %v3268_v22, %v1608_v30  ;;  %v1612_v43 = vld [vmem:[%s3320_s7 + $0xa8] sm:$0xff]  ;;  %v1613_v44 = vld [vmem:[%s3320_s7 + $0xb0] sm:$0xff] }
 0x246   : > { %1695 = vst.msk [vmem:[%s3320_s7 + $0x28] sm:$0xff] %vm1422_vm3, %v1663_v36  ;;  %1727 = vst.msk [vmem:[%s2342_s25 + $0x28] sm:$0xff] %vm1422_vm3, %v1663_v36  ;;  %v1676_v16 = vadd.f32 %v3271_v23, %v1609_v31  ;;  %v1677_v20 = vadd.f32 %v3277_v27, %v1610_v32  ;;  %v1678_v22 = vadd.f32 %v3286_v35, %v1611_v21  ;;  %v1614_v45 = vld [vmem:[%s3320_s7 + $0xb8] sm:$0xff]  ;;  %v1615_v46 = vld [vmem:[%s3320_s7 + $0xc0] sm:$0xff] }
 0x247   : > { %1697 = vst.msk [vmem:[%s3320_s7 + $0x38] sm:$0xff] %vm1422_vm3, %v1665_v40  ;;  %1729 = vst.msk [vmem:[%s2342_s25 + $0x38] sm:$0xff] %vm1422_vm3, %v1665_v40  ;;  %v1679_v23 = vadd.f32 %v3289_v38, %v1612_v43  ;;  %v1680_v27 = vadd.f32 %v3292_v39, %v1613_v44  ;;  %v1616_v52 = vld [vmem:[%s3320_s7 + $0xc8] sm:$0xff]  ;;  %v1681_v35 = vadd.f32 %v3302_v49, %v1614_v45  ;;  %v1617_v54 = vld [vmem:[%s3320_s7 + $0xd0] sm:$0xff] }
 0x248   : > { %1698 = vst.msk [vmem:[%s3320_s7 + $0x40] sm:$0xff] %vm1422_vm3, %v1666_v41  ;;  %1730 = vst.msk [vmem:[%s2342_s25 + $0x40] sm:$0xff] %vm1422_vm3, %v1666_v41  ;;  %v1682_v38 = vadd.f32 %v3305_v50, %v1615_v46  ;;  %v1683_v39 = vadd.f32 %v3308_v51, %v1616_v52  ;;  %v1618_v55 = vld [vmem:[%s3320_s7 + $0xd8] sm:$0xff]  ;;  %v1619_v56 = vld [vmem:[%s3320_s7 + $0xe0] sm:$0xff]  ;;  %v1684_v49 = vadd.f32 %v3325_v57, %v1617_v54 }
 0x249   : > { %1699 = vst.msk [vmem:[%s3320_s7 + $0x48] sm:$0xff] %vm1422_vm3, %v1667_v42  ;;  %1731 = vst.msk [vmem:[%s2342_s25 + $0x48] sm:$0xff] %vm1422_vm3, %v1667_v42  ;;  %v1685_v50 = vadd.f32 %v3328_v58, %v1618_v55  ;;  %v1686_v51 = vadd.f32 %v3336_v3, %v1619_v56  ;;  %v1620_v59 = vld [vmem:[%s3320_s7 + $0xe8] sm:$0xff]  ;;  %v1621_v60 = vld [vmem:[%s3320_s7 + $0xf0] sm:$0xff] }
 0x24a   : > { %1700 = vst.msk [vmem:[%s3320_s7 + $0x50] sm:$0xff] %vm1422_vm3, %v1668_v17  ;;  %1732 = vst.msk [vmem:[%s2342_s25 + $0x50] sm:$0xff] %vm1422_vm3, %v1668_v17  ;;  %v1622_v61 = vld [vmem:[%s3320_s7 + $0xf8] sm:$0xff]  ;;  %v1687_v57 = vadd.f32 %v3376_v25, %v1620_v59  ;;  %v1688_v58 = vadd.f32 %v3397_v29, %v1621_v60 }
 0x24b   : > { %1701 = vst.msk [vmem:[%s3320_s7 + $0x58] sm:$0xff] %vm1422_vm3, %v1669_v47  ;;  %1733 = vst.msk [vmem:[%s2342_s25 + $0x58] sm:$0xff] %vm1422_vm3, %v1669_v47  ;;  %v1689_v1 = vadd.f32 %v1657_v33, %v1622_v61 }
 0x24c   : > { %1702 = vst.msk [vmem:[%s3320_s7 + $0x60] sm:$0xff] %vm1422_vm3, %v1670_v48  ;;  %1734 = vst.msk [vmem:[%s2342_s25 + $0x60] sm:$0xff] %vm1422_vm3, %v1670_v48 }
 0x24d   : > { %1703 = vst.msk [vmem:[%s3320_s7 + $0x68] sm:$0xff] %vm1422_vm3, %v1671_v62  ;;  %1735 = vst.msk [vmem:[%s2342_s25 + $0x68] sm:$0xff] %vm1422_vm3, %v1671_v62 }
 0x24e   : > { %1704 = vst.msk [vmem:[%s3320_s7 + $0x70] sm:$0xff] %vm1422_vm3, %v1672_v0  ;;  %1736 = vst.msk [vmem:[%s2342_s25 + $0x70] sm:$0xff] %vm1422_vm3, %v1672_v0 }
 0x24f   : > { %1705 = vst.msk [vmem:[%s3320_s7 + $0x78] sm:$0xff] %vm1422_vm3, %v1673_v5  ;;  %1737 = vst.msk [vmem:[%s2342_s25 + $0x78] sm:$0xff] %vm1422_vm3, %v1673_v5 }
 0x250   : > { %1706 = vst.msk [vmem:[%s3320_s7 + $0x80] sm:$0xff] %vm1422_vm3, %v1674_v12  ;;  %1738 = vst.msk [vmem:[%s2342_s25 + $0x80] sm:$0xff] %vm1422_vm3, %v1674_v12 }
 0x251   : > { %1707 = vst.msk [vmem:[%s3320_s7 + $0x88] sm:$0xff] %vm1422_vm3, %v1675_v13  ;;  %1739 = vst.msk [vmem:[%s2342_s25 + $0x88] sm:$0xff] %vm1422_vm3, %v1675_v13 }
 0x252   : > { %1708 = vst.msk [vmem:[%s3320_s7 + $0x90] sm:$0xff] %vm1422_vm3, %v1676_v16  ;;  %1740 = vst.msk [vmem:[%s2342_s25 + $0x90] sm:$0xff] %vm1422_vm3, %v1676_v16 }
 0x253   : > { %1709 = vst.msk [vmem:[%s3320_s7 + $0x98] sm:$0xff] %vm1422_vm3, %v1677_v20  ;;  %1741 = vst.msk [vmem:[%s2342_s25 + $0x98] sm:$0xff] %vm1422_vm3, %v1677_v20 }
 0x254   : > { %1710 = vst.msk [vmem:[%s3320_s7 + $0xa0] sm:$0xff] %vm1422_vm3, %v1678_v22  ;;  %1742 = vst.msk [vmem:[%s2342_s25 + $0xa0] sm:$0xff] %vm1422_vm3, %v1678_v22 }
 0x255   : > { %1711 = vst.msk [vmem:[%s3320_s7 + $0xa8] sm:$0xff] %vm1422_vm3, %v1679_v23  ;;  %1743 = vst.msk [vmem:[%s2342_s25 + $0xa8] sm:$0xff] %vm1422_vm3, %v1679_v23 }
 0x256   : > { %1712 = vst.msk [vmem:[%s3320_s7 + $0xb0] sm:$0xff] %vm1422_vm3, %v1680_v27  ;;  %1744 = vst.msk [vmem:[%s2342_s25 + $0xb0] sm:$0xff] %vm1422_vm3, %v1680_v27 }
 0x257   : > { %1713 = vst.msk [vmem:[%s3320_s7 + $0xb8] sm:$0xff] %vm1422_vm3, %v1681_v35  ;;  %1745 = vst.msk [vmem:[%s2342_s25 + $0xb8] sm:$0xff] %vm1422_vm3, %v1681_v35 }
 0x258   : > { %1714 = vst.msk [vmem:[%s3320_s7 + $0xc0] sm:$0xff] %vm1422_vm3, %v1682_v38  ;;  %1746 = vst.msk [vmem:[%s2342_s25 + $0xc0] sm:$0xff] %vm1422_vm3, %v1682_v38 }
 0x259   : > { %1715 = vst.msk [vmem:[%s3320_s7 + $0xc8] sm:$0xff] %vm1422_vm3, %v1683_v39  ;;  %1747 = vst.msk [vmem:[%s2342_s25 + $0xc8] sm:$0xff] %vm1422_vm3, %v1683_v39 }
 0x25a   : > { %1716 = vst.msk [vmem:[%s3320_s7 + $0xd0] sm:$0xff] %vm1422_vm3, %v1684_v49  ;;  %1748 = vst.msk [vmem:[%s2342_s25 + $0xd0] sm:$0xff] %vm1422_vm3, %v1684_v49 }
 0x25b   : > { %1717 = vst.msk [vmem:[%s3320_s7 + $0xd8] sm:$0xff] %vm1422_vm3, %v1685_v50  ;;  %1749 = vst.msk [vmem:[%s2342_s25 + $0xd8] sm:$0xff] %vm1422_vm3, %v1685_v50 }
 0x25c   : > { %1718 = vst.msk [vmem:[%s3320_s7 + $0xe0] sm:$0xff] %vm1422_vm3, %v1686_v51  ;;  %1750 = vst.msk [vmem:[%s2342_s25 + $0xe0] sm:$0xff] %vm1422_vm3, %v1686_v51 }
 0x25d   : > { %1719 = vst.msk [vmem:[%s3320_s7 + $0xe8] sm:$0xff] %vm1422_vm3, %v1687_v57  ;;  %1751 = vst.msk [vmem:[%s2342_s25 + $0xe8] sm:$0xff] %vm1422_vm3, %v1687_v57 }
 0x25e   : > { %1720 = vst.msk [vmem:[%s3320_s7 + $0xf0] sm:$0xff] %vm1422_vm3, %v1688_v58  ;;  %1752 = vst.msk [vmem:[%s2342_s25 + $0xf0] sm:$0xff] %vm1422_vm3, %v1688_v58 }
 0x25f   : > { %1721 = vst.msk [vmem:[%s3320_s7 + $0xf8] sm:$0xff] %vm1422_vm3, %v1689_v1  ;;  %1753 = vst.msk [vmem:[%s2342_s25 + $0xf8] sm:$0xff] %vm1422_vm3, %v1689_v1 }
 0x260 PF: > { %s14_s20 = sadd.s32 1, %s2133_s20   ;;  %s3566_s12 = smov %s2105_s13 }
 0x261   : > { %p11_p8 = scmp.ge.s32.totalorder %s14_s20, 18   ;;  %s3567_s13 = smov %s2234_s4 }
 0x262   : > { %s3568_s14 = smov %s2121_s17  ;;  %s3569_s15 = smov %s2125_s18 }
 0x263   : > { %s3570_s16 = smov %s2129_s19  ;;  %s3571_s17 = smov %s3575_s22 }
 0x264   : > { %s3572_s18 = smov %s3579_s23  ;;  %s3573_s19 = smov %s3583_s24 }
 0x265   :  { %13 = sbr.rel (!%p11_p8) target bundleno = 5 (0x5), region = 130 }
 0x26c   :  { %1776 = vsyncpa [#allocation7], 1 }
 0x26d   :  { %1778 = vsyncpa [#allocation7 + $0x1], 1 }

</bundles_post_ra>
